<compile_context>
chip_gen: v7x
topology: tpu7x:2x2x1
jax: 0.10.0
libtpu: 0.0.40
codegen_flags: <defaults>
</compile_context>

<pallas_src>
import functools

import jax
import jax.numpy as jnp
from jax.experimental import pallas as pl
from jax.experimental.pallas import tpu as pltpu

BN_EPS = 1e-5

_PARALLEL = pltpu.CompilerParams(dimension_semantics=("parallel",))


# ----------------------------------------------------------------------------
# In-kernel math helpers
# ----------------------------------------------------------------------------
def _mxu_dot(act, w_bf16):
    """MXU matmul: bf16 operands (weights already bf16 in HBM), f32 accumulate."""
    return jnp.dot(act.astype(jnp.bfloat16), w_bf16,
                   preferred_element_type=jnp.float32)


def _fc_head(act, w1, b1, g, beta, w2, b2):
    """Linear -> BatchNorm1d (training mode, batch stats over the rows of this
    per-view block, biased variance, eps=1e-5) -> ReLU -> Linear.
    Matmuls on the MXU (bf16 / f32-acc), BN math in f32; BN+ReLU+bf16-cast
    happen in one fused VPU pass before the second matmul."""
    h = _mxu_dot(act, w1) + b1
    mean = jnp.mean(h, axis=0, keepdims=True)
    var = jnp.mean((h - mean) * (h - mean), axis=0, keepdims=True)
    h = (h - mean) * jax.lax.rsqrt(var + BN_EPS) * g + beta
    h = jnp.maximum(h, 0.0).astype(jnp.bfloat16)
    return jnp.dot(h, w2, preferred_element_type=jnp.float32) + b2


def _select_view(x1_ref, x2_ref):
    """Pick this grid step's view without the wrapper ever materializing
    concatenate([x1, x2]) in HBM.  The grid position is broadcast as i32 and
    compared element-wise (plain vector cmp + select)."""
    x1 = x1_ref[...]
    x2 = x2_ref[...]
    view = jnp.full(x1.shape, pl.program_id(0), dtype=jnp.int32)
    return jnp.where(view == 0, x1, x2)


# ----------------------------------------------------------------------------
# Kernel bodies  (grid = (n_views,), one view per grid step)
# ----------------------------------------------------------------------------
def _online_pred_kernel(x1_ref, x2_ref,
                        bw, bb, w1, b1, g, beta, w2, b2,          # encoder_q
                        pw1, pb1, pg, pbeta, pw2, pb2,            # predictor
                        p_ref):
    """p = predictor(encoder_q(x)) for one view, fully fused in VMEM."""
    x = _select_view(x1_ref, x2_ref)
    feat = jnp.maximum(_mxu_dot(x, bw[...]) + bb[...], 0.0)        # backbone
    z = _fc_head(feat, w1[...], b1[...], g[...], beta[...], w2[...], b2[...])
    p = _fc_head(z, pw1[...], pb1[...], pg[...], pbeta[...], pw2[...], pb2[...])
    p_ref[...] = p.astype(p_ref.dtype)


def _key_encoder_kernel(x1_ref, x2_ref,
                        bw, bb, w1, b1, g, beta, w2, b2,          # blended k
                        z_ref):
    """z = encoder_k(x) for one view, using the momentum-blended key weights
    that were materialized once (f32 masters) outside the kernel."""
    x = _select_view(x1_ref, x2_ref)
    feat = jnp.maximum(_mxu_dot(x, bw[...]) + bb[...], 0.0)
    z = _fc_head(feat, w1[...], b1[...], g[...], beta[...], w2[...], b2[...])
    z_ref[...] = z.astype(z_ref.dtype)


# ----------------------------------------------------------------------------
# BlockSpecs / pallas_call wrappers
# ----------------------------------------------------------------------------
def _const_spec(shape, single_buffer):
    """Spec for a grid-invariant operand (weights / biases / the two views):
    constant index_map => DMA'd once; Buffered(1) halves its VMEM footprint
    since there is nothing to double-buffer."""
    idx = lambda i: (0,) * len(shape)
    if single_buffer:
        return pl.BlockSpec(shape, idx, pipeline_mode=pl.Buffered(1))
    return pl.BlockSpec(shape, idx)


def _enc_args(p):
    """Encoder params as kernel operands: matmul weights cast to bf16 (halves
    DMA bytes + VMEM), biases / BN params kept f32 and reshaped to (1, N)."""
    EC = p["backbone_w"].shape[1]
    Hd = p["fc_w1"].shape[1]
    Nd = p["fc_w2"].shape[1]
    return (p["backbone_w"].astype(jnp.bfloat16),
            p["backbone_b"].reshape(1, EC),
            p["fc_w1"].astype(jnp.bfloat16),
            p["fc_b1"].reshape(1, Hd),
            p["fc_g"].reshape(1, Hd),
            p["fc_beta"].reshape(1, Hd),
            p["fc_w2"].astype(jnp.bfloat16),
            p["fc_b2"].reshape(1, Nd))


def _pred_args(p):
    Hd = p["w1"].shape[1]
    Nd = p["w2"].shape[1]
    return (p["w1"].astype(jnp.bfloat16), p["b1"].reshape(1, Hd),
            p["g"].reshape(1, Hd), p["beta"].reshape(1, Hd),
            p["w2"].astype(jnp.bfloat16), p["b2"].reshape(1, Nd))


def _view_grid_call(kernel, x1f, x2f, param_args, out_dim, single_buffer):
    """One pallas_call with grid=(2,) (one view per step, megacore-parallel).
    Every input is grid-invariant (views + params); only the output block
    moves with the grid index, keeping the (B, out_dim) store lane-dense."""
    B, _ = x1f.shape
    n_views = 2
    inputs = (x1f, x2f, *param_args)
    in_specs = [_const_spec(a.shape, single_buffer) for a in inputs]
    return pl.pallas_call(
        kernel,
        grid=(n_views,),
        in_specs=in_specs,
        out_specs=pl.BlockSpec((B, out_dim), lambda i: (i, 0)),
        out_shape=jax.ShapeDtypeStruct((n_views * B, out_dim), jnp.float32),
        compiler_params=_PARALLEL,
    )(*inputs)


# ----------------------------------------------------------------------------
# Parameter init (deterministic, scaled-down BYOL dims)
# ----------------------------------------------------------------------------
def init_encoder_params(key, in_features, encoder_channel, hidden_dim, pred_dim):
    ks = jax.random.split(key, 3)
    s = 0.02
    return {
        # TODO(synk): the original BYOL wraps an arbitrary encoder_q backbone;
        # here it is a synthetic flatten + Linear + ReLU stem.
        "backbone_w": s * jax.random.normal(ks[0], (in_features, encoder_channel), jnp.float32),
        "backbone_b": jnp.zeros((encoder_channel,), jnp.float32),
        "fc_w1": s * jax.random.normal(ks[1], (encoder_channel, hidden_dim), jnp.float32),
        "fc_b1": jnp.zeros((hidden_dim,), jnp.float32),
        "fc_g": jnp.ones((hidden_dim,), jnp.float32),
        "fc_beta": jnp.zeros((hidden_dim,), jnp.float32),
        "fc_w2": s * jax.random.normal(ks[2], (hidden_dim, pred_dim), jnp.float32),
        "fc_b2": jnp.zeros((pred_dim,), jnp.float32),
    }


def init_predictor_params(key, pred_dim, hidden_dim):
    ks = jax.random.split(key, 2)
    s = 0.02
    return {
        "w1": s * jax.random.normal(ks[0], (pred_dim, hidden_dim), jnp.float32),
        "b1": jnp.zeros((hidden_dim,), jnp.float32),
        "g": jnp.ones((hidden_dim,), jnp.float32),
        "beta": jnp.zeros((hidden_dim,), jnp.float32),
        "w2": s * jax.random.normal(ks[1], (hidden_dim, pred_dim), jnp.float32),
        "b2": jnp.zeros((pred_dim,), jnp.float32),
    }


# ----------------------------------------------------------------------------
# BYOL forward (functional).  The momentum update of encoder_k is materialized
# (blended in f32 on the masters) and returned as the new encoder_k params,
# fixing the "update is never written back" gap of the previous version.
# ----------------------------------------------------------------------------
@functools.partial(jax.jit, static_argnames=("m", "single_buffer_weights"))
def byol_forward(params, x1, x2, *, m, single_buffer_weights=True):
    B = x1.shape[0]

    # Momentum update of the key encoder: blend on f32 masters (never on bf16
    # copies, to avoid EMA drift), materialized once and reused by the kernel.
    enc_k_new = jax.tree_util.tree_map(
        lambda q, k: k * m + q * (1.0 - m), params["enc_q"], params["enc_k"])

    # Flatten views (row-major, matching NCHW flatten) and ship them as bf16
    # matmul operands.  No concatenate([x1, x2]) — the kernel selects the view.
    # TODO(synk): in a real pipeline the bf16 copies would come straight from
    # the data loader instead of being cast from f32 here.
    x1f = x1.reshape(B, -1).astype(jnp.bfloat16)
    x2f = x2.reshape(B, -1).astype(jnp.bfloat16)

    pred_dim = params["enc_q"]["fc_w2"].shape[1]

    # Online branch: predictor(encoder_q(x)) fused into ONE kernel per view.
    p_all = _view_grid_call(
        _online_pred_kernel, x1f, x2f,
        _enc_args(params["enc_q"]) + _pred_args(params["pred"]),
        pred_dim, single_buffer_weights)

    # Key branch: encoder_k forward with the already-blended weights.
    z_all = _view_grid_call(
        _key_encoder_kernel, x1f, x2f,
        _enc_args(enc_k_new), pred_dim, single_buffer_weights)

    p1, p2 = p_all[:B], p_all[B:]
    z1, z2 = z_all[:B], z_all[B:]
    return (p1, p2,
            jax.lax.stop_gradient(z1), jax.lax.stop_gradient(z2)), enc_k_new


# ----------------------------------------------------------------------------
# Pure-JAX reference (f32) for validation
# ----------------------------------------------------------------------------
def _ref_fc_head(x, w1, b1, g, beta, w2, b2):
    h = x @ w1 + b1
    mean = h.mean(0, keepdims=True)
    var = ((h - mean) ** 2).mean(0, keepdims=True)
    h = (h - mean) / jnp.sqrt(var + BN_EPS) * g + beta
    h = jnp.maximum(h, 0.0)
    return h @ w2 + b2


def _ref_encoder(p, x):
    B = x.shape[0]
    feat = jnp.maximum(x.reshape(B, -1) @ p["backbone_w"] + p["backbone_b"], 0.0)
    return _ref_fc_head(feat, p["fc_w1"], p["fc_b1"], p["fc_g"], p["fc_beta"],
                        p["fc_w2"], p["fc_b2"])


def _ref_forward(params, x1, x2, m):
    enc_k = jax.tree_util.tree_map(lambda q, k: k * m + q * (1.0 - m),
                                   params["enc_q"], params["enc_k"])
    pr = params["pred"]

    def pred(z):
        return _ref_fc_head(z, pr["w1"], pr["b1"], pr["g"], pr["beta"],
                            pr["w2"], pr["b2"])

    p1 = pred(_ref_encoder(params["enc_q"], x1))
    p2 = pred(_ref_encoder(params["enc_q"], x2))
    z1 = _ref_encoder(enc_k, x1)
    z2 = _ref_encoder(enc_k, x2)
    return p1, p2, z1, z2, enc_k


# ----------------------------------------------------------------------------
if __name__ == "__main__":
    # small, lane-aligned stand-ins for the real BYOL dims (512 / 4096 / 256)
    B, C, H, W = 8, 4, 16, 16
    encoder_channel = 128
    hidden_dim = 256
    pred_dim = 128
    momentum = 0.996

    key = jax.random.PRNGKey(0)
    k_x1, k_x2, k_eq, k_pred = jax.random.split(key, 4)

    x1 = jax.random.normal(k_x1, (B, C, H, W), jnp.float32)
    x2 = jax.random.normal(k_x2, (B, C, H, W), jnp.float32)

    enc_q = init_encoder_params(k_eq, C * H * W, encoder_channel, hidden_dim, pred_dim)
    enc_k = jax.tree_util.tree_map(lambda a: a + 0.0, enc_q)   # deepcopy of encoder_q
    pred_p = init_predictor_params(k_pred, pred_dim, hidden_dim)
    params = {"enc_q": enc_q, "enc_k": enc_k, "pred": pred_p}

    # Prefer single-buffered (Buffered(1)) grid-invariant blocks; fall back to
    # default double-buffering if this JAX/Mosaic build rejects pipeline_mode.
    try:
        (p1, p2, z1, z2), enc_k_new = byol_forward(
            params, x1, x2, m=momentum, single_buffer_weights=True)
        jax.block_until_ready((p1, p2, z1, z2))
    except Exception:
        (p1, p2, z1, z2), enc_k_new = byol_forward(
            params, x1, x2, m=momentum, single_buffer_weights=False)
        jax.block_until_ready((p1, p2, z1, z2))

    assert p1.shape == (B, pred_dim) and p2.shape == (B, pred_dim)
    assert z1.shape == (B, pred_dim) and z2.shape == (B, pred_dim)

    # validate against pure-JAX f32 reference (loosened tolerance: bf16 matmuls)
    r1, r2, rz1, rz2, enc_k_ref = _ref_forward(params, x1, x2, momentum)
    for got, want in ((p1, r1), (p2, r2), (z1, rz1), (z2, rz2)):
        assert bool(jnp.all(jnp.isfinite(got)))
        assert bool(jnp.allclose(got, want, atol=5e-2, rtol=5e-2)), \
            float(jnp.max(jnp.abs(got - want)))

    # the materialized momentum update must match the f32 EMA exactly
    for got, want in zip(jax.tree_util.tree_leaves(enc_k_new),
                         jax.tree_util.tree_leaves(enc_k_ref)):
        assert bool(jnp.allclose(got, want, atol=1e-6, rtol=1e-6))

    print("KERNEL_OK")
</pallas_src>

<mosaic_0001>
module attributes {stable_mosaic.version = 11 : i64} {
  func.func @_key_encoder_kernel(%arg0: i32, %arg1: memref<8x1024xbf16, #tpu.memory_space<vmem>>, %arg2: memref<8x1024xbf16, #tpu.memory_space<vmem>>, %arg3: memref<1024x128xbf16, #tpu.memory_space<vmem>>, %arg4: memref<1x128xf32, #tpu.memory_space<vmem>>, %arg5: memref<128x256xbf16, #tpu.memory_space<vmem>>, %arg6: memref<1x256xf32, #tpu.memory_space<vmem>>, %arg7: memref<1x256xf32, #tpu.memory_space<vmem>>, %arg8: memref<1x256xf32, #tpu.memory_space<vmem>>, %arg9: memref<256x128xbf16, #tpu.memory_space<vmem>>, %arg10: memref<1x128xf32, #tpu.memory_space<vmem>>, %arg11: memref<8x128xf32, #tpu.memory_space<vmem>>) attributes {dimension_semantics = [#tpu.dimension_semantics<parallel>], iteration_bounds = array<i64: 2>, scalar_prefetch = 0 : i64, scratch_operands = 0 : i64, tpu.core_type = #tpu.core_type<tc>, window_params = [{pipeline_mode = #tpu.pipeline_mode<synchronous>, transform_indices = @transform_0, window_bounds = array<i64: 8, 1024>}, {pipeline_mode = #tpu.pipeline_mode<synchronous>, transform_indices = @transform_1, window_bounds = array<i64: 8, 1024>}, {pipeline_mode = #tpu.pipeline_mode<synchronous>, transform_indices = @transform_2, window_bounds = array<i64: 1024, 128>}, {pipeline_mode = #tpu.pipeline_mode<synchronous>, transform_indices = @transform_3, window_bounds = array<i64: 1, 128>}, {pipeline_mode = #tpu.pipeline_mode<synchronous>, transform_indices = @transform_4, window_bounds = array<i64: 128, 256>}, {pipeline_mode = #tpu.pipeline_mode<synchronous>, transform_indices = @transform_5, window_bounds = array<i64: 1, 256>}, {pipeline_mode = #tpu.pipeline_mode<synchronous>, transform_indices = @transform_6, window_bounds = array<i64: 1, 256>}, {pipeline_mode = #tpu.pipeline_mode<synchronous>, transform_indices = @transform_7, window_bounds = array<i64: 1, 256>}, {pipeline_mode = #tpu.pipeline_mode<synchronous>, transform_indices = @transform_8, window_bounds = array<i64: 256, 128>}, {pipeline_mode = #tpu.pipeline_mode<synchronous>, transform_indices = @transform_9, window_bounds = array<i64: 1, 128>}, {transform_indices = @transform_10, window_bounds = array<i64: 8, 128>}]} {
    %c0 = arith.constant 0 : index
    %c0_0 = arith.constant 0 : index
    %0 = vector.load %arg1[%c0, %c0_0] : memref<8x1024xbf16, #tpu.memory_space<vmem>>, vector<8x1024xbf16>
    %c0_1 = arith.constant 0 : index
    %c0_2 = arith.constant 0 : index
    %1 = vector.load %arg2[%c0_1, %c0_2] : memref<8x1024xbf16, #tpu.memory_space<vmem>>, vector<8x1024xbf16>
    %2 = vector.broadcast %arg0 : i32 to vector<8x1024xi32>
    %c0_i32 = arith.constant 0 : i32
    %3 = vector.broadcast %c0_i32 : i32 to vector<8x1024xi32>
    %4 = arith.cmpi eq, %2, %3 : vector<8x1024xi32>
    %5 = arith.select %4, %0, %1 : vector<8x1024xi1>, vector<8x1024xbf16>
    %c0_3 = arith.constant 0 : index
    %c0_4 = arith.constant 0 : index
    %6 = vector.load %arg3[%c0_3, %c0_4] : memref<1024x128xbf16, #tpu.memory_space<vmem>>, vector<1024x128xbf16>
    %cst = arith.constant dense<0.000000e+00> : vector<8x128xf32>
    %7 = tpu.matmul %5, %6, %cst {dimension_numbers = #tpu.dot_dimension_numbers<[1], [0], [0], [1], [0, 0, 1, 1], [], []>} : vector<8x1024xbf16>, vector<1024x128xbf16>, vector<8x128xf32> -> vector<8x128xf32>
    %c0_5 = arith.constant 0 : index
    %c0_6 = arith.constant 0 : index
    %8 = vector.load %arg4[%c0_5, %c0_6] : memref<1x128xf32, #tpu.memory_space<vmem>>, vector<1x128xf32>
    %9 = vector.broadcast %8 : vector<1x128xf32> to vector<8x128xf32>
    %10 = arith.addf %7, %9 : vector<8x128xf32>
    %cst_7 = arith.constant 0.000000e+00 : f32
    %11 = vector.broadcast %cst_7 : f32 to vector<8x128xf32>
    %12 = arith.maximumf %10, %11 : vector<8x128xf32>
    %c0_8 = arith.constant 0 : index
    %c0_9 = arith.constant 0 : index
    %13 = vector.load %arg5[%c0_8, %c0_9] : memref<128x256xbf16, #tpu.memory_space<vmem>>, vector<128x256xbf16>
    %c0_10 = arith.constant 0 : index
    %c0_11 = arith.constant 0 : index
    %14 = vector.load %arg6[%c0_10, %c0_11] : memref<1x256xf32, #tpu.memory_space<vmem>>, vector<1x256xf32>
    %c0_12 = arith.constant 0 : index
    %c0_13 = arith.constant 0 : index
    %15 = vector.load %arg7[%c0_12, %c0_13] : memref<1x256xf32, #tpu.memory_space<vmem>>, vector<1x256xf32>
    %c0_14 = arith.constant 0 : index
    %c0_15 = arith.constant 0 : index
    %16 = vector.load %arg8[%c0_14, %c0_15] : memref<1x256xf32, #tpu.memory_space<vmem>>, vector<1x256xf32>
    %c0_16 = arith.constant 0 : index
    %c0_17 = arith.constant 0 : index
    %17 = vector.load %arg9[%c0_16, %c0_17] : memref<256x128xbf16, #tpu.memory_space<vmem>>, vector<256x128xbf16>
    %c0_18 = arith.constant 0 : index
    %c0_19 = arith.constant 0 : index
    %18 = vector.load %arg10[%c0_18, %c0_19] : memref<1x128xf32, #tpu.memory_space<vmem>>, vector<1x128xf32>
    %19 = arith.truncf %12 : vector<8x128xf32> to vector<8x128xbf16>
    %cst_20 = arith.constant dense<0.000000e+00> : vector<8x256xf32>
    %20 = tpu.matmul %19, %13, %cst_20 {dimension_numbers = #tpu.dot_dimension_numbers<[1], [0], [0], [1], [0, 0, 1, 1], [], []>} : vector<8x128xbf16>, vector<128x256xbf16>, vector<8x256xf32> -> vector<8x256xf32>
    %21 = vector.broadcast %14 : vector<1x256xf32> to vector<8x256xf32>
    %22 = arith.addf %20, %21 : vector<8x256xf32>
    %cst_21 = arith.constant dense<0.000000e+00> : vector<256xf32>
    %23 = vector.multi_reduction <add>, %22, %cst_21 [0] : vector<8x256xf32> to vector<256xf32>
    %24 = vector.shape_cast %23 : vector<256xf32> to vector<1x256xf32>
    %cst_22 = arith.constant 8.000000e+00 : f32
    %25 = vector.broadcast %cst_22 : f32 to vector<1x256xf32>
    %26 = arith.divf %24, %25 : vector<1x256xf32>
    %27 = vector.broadcast %26 : vector<1x256xf32> to vector<8x256xf32>
    %28 = arith.subf %22, %27 : vector<8x256xf32>
    %29 = vector.broadcast %26 : vector<1x256xf32> to vector<8x256xf32>
    %30 = arith.subf %22, %29 : vector<8x256xf32>
    %31 = arith.mulf %28, %30 : vector<8x256xf32>
    %cst_23 = arith.constant dense<0.000000e+00> : vector<256xf32>
    %32 = vector.multi_reduction <add>, %31, %cst_23 [0] : vector<8x256xf32> to vector<256xf32>
    %33 = vector.shape_cast %32 : vector<256xf32> to vector<1x256xf32>
    %cst_24 = arith.constant 8.000000e+00 : f32
    %34 = vector.broadcast %cst_24 : f32 to vector<1x256xf32>
    %35 = arith.divf %33, %34 : vector<1x256xf32>
    %36 = vector.broadcast %26 : vector<1x256xf32> to vector<8x256xf32>
    %37 = arith.subf %22, %36 : vector<8x256xf32>
    %cst_25 = arith.constant 9.99999974E-6 : f32
    %38 = vector.broadcast %cst_25 : f32 to vector<1x256xf32>
    %39 = arith.addf %35, %38 : vector<1x256xf32>
    %40 = math.rsqrt %39 : vector<1x256xf32>
    %41 = vector.broadcast %40 : vector<1x256xf32> to vector<8x256xf32>
    %42 = arith.mulf %37, %41 : vector<8x256xf32>
    %43 = vector.broadcast %15 : vector<1x256xf32> to vector<8x256xf32>
    %44 = arith.mulf %42, %43 : vector<8x256xf32>
    %45 = vector.broadcast %16 : vector<1x256xf32> to vector<8x256xf32>
    %46 = arith.addf %44, %45 : vector<8x256xf32>
    %cst_26 = arith.constant 0.000000e+00 : f32
    %47 = vector.broadcast %cst_26 : f32 to vector<8x256xf32>
    %48 = arith.maximumf %46, %47 : vector<8x256xf32>
    %49 = arith.truncf %48 : vector<8x256xf32> to vector<8x256xbf16>
    %cst_27 = arith.constant dense<0.000000e+00> : vector<8x128xf32>
    %50 = tpu.matmul %49, %17, %cst_27 {dimension_numbers = #tpu.dot_dimension_numbers<[1], [0], [0], [1], [0, 0, 1, 1], [], []>} : vector<8x256xbf16>, vector<256x128xbf16>, vector<8x128xf32> -> vector<8x128xf32>
    %51 = vector.broadcast %18 : vector<1x128xf32> to vector<8x128xf32>
    %52 = arith.addf %50, %51 : vector<8x128xf32>
    %c0_28 = arith.constant 0 : index
    %c0_29 = arith.constant 0 : index
    %53 = vector.load %arg11[%c0_28, %c0_29] : memref<8x128xf32, #tpu.memory_space<vmem>>, vector<8x128xf32>
    tpu.vector_store %arg11[%c0_28, %c0_29], %52 {strides = array<i32>} : memref<8x128xf32, #tpu.memory_space<vmem>>, vector<8x128xf32>,
    return
  }
  func.func @transform_0(%arg0: i32) -> (i32, i32) {
    %c0_i32 = arith.constant 0 : i32
    %c0_i32_0 = arith.constant 0 : i32
    %c0_i32_1 = arith.constant 0 : i32
    return %c0_i32, %c0_i32_0 : i32, i32
  }
  func.func @transform_1(%arg0: i32) -> (i32, i32) {
    %c0_i32 = arith.constant 0 : i32
    %c0_i32_0 = arith.constant 0 : i32
    %c0_i32_1 = arith.constant 0 : i32
    return %c0_i32, %c0_i32_0 : i32, i32
  }
  func.func @transform_2(%arg0: i32) -> (i32, i32) {
    %c0_i32 = arith.constant 0 : i32
    %c0_i32_0 = arith.constant 0 : i32
    %c0_i32_1 = arith.constant 0 : i32
    return %c0_i32, %c0_i32_0 : i32, i32
  }
  func.func @transform_3(%arg0: i32) -> (i32, i32) {
    %c0_i32 = arith.constant 0 : i32
    %c0_i32_0 = arith.constant 0 : i32
    %c0_i32_1 = arith.constant 0 : i32
    return %c0_i32, %c0_i32_0 : i32, i32
  }
  func.func @transform_4(%arg0: i32) -> (i32, i32) {
    %c0_i32 = arith.constant 0 : i32
    %c0_i32_0 = arith.constant 0 : i32
    %c0_i32_1 = arith.constant 0 : i32
    return %c0_i32, %c0_i32_0 : i32, i32
  }
  func.func @transform_5(%arg0: i32) -> (i32, i32) {
    %c0_i32 = arith.constant 0 : i32
    %c0_i32_0 = arith.constant 0 : i32
    %c0_i32_1 = arith.constant 0 : i32
    return %c0_i32, %c0_i32_0 : i32, i32
  }
  func.func @transform_6(%arg0: i32) -> (i32, i32) {
    %c0_i32 = arith.constant 0 : i32
    %c0_i32_0 = arith.constant 0 : i32
    %c0_i32_1 = arith.constant 0 : i32
    return %c0_i32, %c0_i32_0 : i32, i32
  }
  func.func @transform_7(%arg0: i32) -> (i32, i32) {
    %c0_i32 = arith.constant 0 : i32
    %c0_i32_0 = arith.constant 0 : i32
    %c0_i32_1 = arith.constant 0 : i32
    return %c0_i32, %c0_i32_0 : i32, i32
  }
  func.func @transform_8(%arg0: i32) -> (i32, i32) {
    %c0_i32 = arith.constant 0 : i32
    %c0_i32_0 = arith.constant 0 : i32
    %c0_i32_1 = arith.constant 0 : i32
    return %c0_i32, %c0_i32_0 : i32, i32
  }
  func.func @transform_9(%arg0: i32) -> (i32, i32) {
    %c0_i32 = arith.constant 0 : i32
    %c0_i32_0 = arith.constant 0 : i32
    %c0_i32_1 = arith.constant 0 : i32
    return %c0_i32, %c0_i32_0 : i32, i32
  }
  func.func @transform_10(%arg0: i32) -> (i32, i32) {
    %c0_i32 = arith.constant 0 : i32
    %c0_i32_0 = arith.constant 0 : i32
    return %arg0, %c0_i32 : i32, i32
  }
}

module attributes {stable_mosaic.version = 11 : i64} {
  func.func @_online_pred_kernel(%arg0: i32, %arg1: memref<8x1024xbf16, #tpu.memory_space<vmem>>, %arg2: memref<8x1024xbf16, #tpu.memory_space<vmem>>, %arg3: memref<1024x128xbf16, #tpu.memory_space<vmem>>, %arg4: memref<1x128xf32, #tpu.memory_space<vmem>>, %arg5: memref<128x256xbf16, #tpu.memory_space<vmem>>, %arg6: memref<1x256xf32, #tpu.memory_space<vmem>>, %arg7: memref<1x256xf32, #tpu.memory_space<vmem>>, %arg8: memref<1x256xf32, #tpu.memory_space<vmem>>, %arg9: memref<256x128xbf16, #tpu.memory_space<vmem>>, %arg10: memref<1x128xf32, #tpu.memory_space<vmem>>, %arg11: memref<128x256xbf16, #tpu.memory_space<vmem>>, %arg12: memref<1x256xf32, #tpu.memory_space<vmem>>, %arg13: memref<1x256xf32, #tpu.memory_space<vmem>>, %arg14: memref<1x256xf32, #tpu.memory_space<vmem>>, %arg15: memref<256x128xbf16, #tpu.memory_space<vmem>>, %arg16: memref<1x128xf32, #tpu.memory_space<vmem>>, %arg17: memref<8x128xf32, #tpu.memory_space<vmem>>) attributes {dimension_semantics = [#tpu.dimension_semantics<parallel>], iteration_bounds = array<i64: 2>, scalar_prefetch = 0 : i64, scratch_operands = 0 : i64, tpu.core_type = #tpu.core_type<tc>, window_params = [{pipeline_mode = #tpu.pipeline_mode<synchronous>, transform_indices = @transform_0, window_bounds = array<i64: 8, 1024>}, {pipeline_mode = #tpu.pipeline_mode<synchronous>, transform_indices = @transform_1, window_bounds = array<i64: 8, 1024>}, {pipeline_mode = #tpu.pipeline_mode<synchronous>, transform_indices = @transform_2, window_bounds = array<i64: 1024, 128>}, {pipeline_mode = #tpu.pipeline_mode<synchronous>, transform_indices = @transform_3, window_bounds = array<i64: 1, 128>}, {pipeline_mode = #tpu.pipeline_mode<synchronous>, transform_indices = @transform_4, window_bounds = array<i64: 128, 256>}, {pipeline_mode = #tpu.pipeline_mode<synchronous>, transform_indices = @transform_5, window_bounds = array<i64: 1, 256>}, {pipeline_mode = #tpu.pipeline_mode<synchronous>, transform_indices = @transform_6, window_bounds = array<i64: 1, 256>}, {pipeline_mode = #tpu.pipeline_mode<synchronous>, transform_indices = @transform_7, window_bounds = array<i64: 1, 256>}, {pipeline_mode = #tpu.pipeline_mode<synchronous>, transform_indices = @transform_8, window_bounds = array<i64: 256, 128>}, {pipeline_mode = #tpu.pipeline_mode<synchronous>, transform_indices = @transform_9, window_bounds = array<i64: 1, 128>}, {pipeline_mode = #tpu.pipeline_mode<synchronous>, transform_indices = @transform_10, window_bounds = array<i64: 128, 256>}, {pipeline_mode = #tpu.pipeline_mode<synchronous>, transform_indices = @transform_11, window_bounds = array<i64: 1, 256>}, {pipeline_mode = #tpu.pipeline_mode<synchronous>, transform_indices = @transform_12, window_bounds = array<i64: 1, 256>}, {pipeline_mode = #tpu.pipeline_mode<synchronous>, transform_indices = @transform_13, window_bounds = array<i64: 1, 256>}, {pipeline_mode = #tpu.pipeline_mode<synchronous>, transform_indices = @transform_14, window_bounds = array<i64: 256, 128>}, {pipeline_mode = #tpu.pipeline_mode<synchronous>, transform_indices = @transform_15, window_bounds = array<i64: 1, 128>}, {transform_indices = @transform_16, window_bounds = array<i64: 8, 128>}]} {
    %c0 = arith.constant 0 : index
    %c0_0 = arith.constant 0 : index
    %0 = vector.load %arg1[%c0, %c0_0] : memref<8x1024xbf16, #tpu.memory_space<vmem>>, vector<8x1024xbf16>
    %c0_1 = arith.constant 0 : index
    %c0_2 = arith.constant 0 : index
    %1 = vector.load %arg2[%c0_1, %c0_2] : memref<8x1024xbf16, #tpu.memory_space<vmem>>, vector<8x1024xbf16>
    %2 = vector.broadcast %arg0 : i32 to vector<8x1024xi32>
    %c0_i32 = arith.constant 0 : i32
    %3 = vector.broadcast %c0_i32 : i32 to vector<8x1024xi32>
    %4 = arith.cmpi eq, %2, %3 : vector<8x1024xi32>
    %5 = arith.select %4, %0, %1 : vector<8x1024xi1>, vector<8x1024xbf16>
    %c0_3 = arith.constant 0 : index
    %c0_4 = arith.constant 0 : index
    %6 = vector.load %arg3[%c0_3, %c0_4] : memref<1024x128xbf16, #tpu.memory_space<vmem>>, vector<1024x128xbf16>
    %cst = arith.constant dense<0.000000e+00> : vector<8x128xf32>
    %7 = tpu.matmul %5, %6, %cst {dimension_numbers = #tpu.dot_dimension_numbers<[1], [0], [0], [1], [0, 0, 1, 1], [], []>} : vector<8x1024xbf16>, vector<1024x128xbf16>, vector<8x128xf32> -> vector<8x128xf32>
    %c0_5 = arith.constant 0 : index
    %c0_6 = arith.constant 0 : index
    %8 = vector.load %arg4[%c0_5, %c0_6] : memref<1x128xf32, #tpu.memory_space<vmem>>, vector<1x128xf32>
    %9 = vector.broadcast %8 : vector<1x128xf32> to vector<8x128xf32>
    %10 = arith.addf %7, %9 : vector<8x128xf32>
    %cst_7 = arith.constant 0.000000e+00 : f32
    %11 = vector.broadcast %cst_7 : f32 to vector<8x128xf32>
    %12 = arith.maximumf %10, %11 : vector<8x128xf32>
    %c0_8 = arith.constant 0 : index
    %c0_9 = arith.constant 0 : index
    %13 = vector.load %arg5[%c0_8, %c0_9] : memref<128x256xbf16, #tpu.memory_space<vmem>>, vector<128x256xbf16>
    %c0_10 = arith.constant 0 : index
    %c0_11 = arith.constant 0 : index
    %14 = vector.load %arg6[%c0_10, %c0_11] : memref<1x256xf32, #tpu.memory_space<vmem>>, vector<1x256xf32>
    %c0_12 = arith.constant 0 : index
    %c0_13 = arith.constant 0 : index
    %15 = vector.load %arg7[%c0_12, %c0_13] : memref<1x256xf32, #tpu.memory_space<vmem>>, vector<1x256xf32>
    %c0_14 = arith.constant 0 : index
    %c0_15 = arith.constant 0 : index
    %16 = vector.load %arg8[%c0_14, %c0_15] : memref<1x256xf32, #tpu.memory_space<vmem>>, vector<1x256xf32>
    %c0_16 = arith.constant 0 : index
    %c0_17 = arith.constant 0 : index
    %17 = vector.load %arg9[%c0_16, %c0_17] : memref<256x128xbf16, #tpu.memory_space<vmem>>, vector<256x128xbf16>
    %c0_18 = arith.constant 0 : index
    %c0_19 = arith.constant 0 : index
    %18 = vector.load %arg10[%c0_18, %c0_19] : memref<1x128xf32, #tpu.memory_space<vmem>>, vector<1x128xf32>
    %19 = arith.truncf %12 : vector<8x128xf32> to vector<8x128xbf16>
    %cst_20 = arith.constant dense<0.000000e+00> : vector<8x256xf32>
    %20 = tpu.matmul %19, %13, %cst_20 {dimension_numbers = #tpu.dot_dimension_numbers<[1], [0], [0], [1], [0, 0, 1, 1], [], []>} : vector<8x128xbf16>, vector<128x256xbf16>, vector<8x256xf32> -> vector<8x256xf32>
    %21 = vector.broadcast %14 : vector<1x256xf32> to vector<8x256xf32>
    %22 = arith.addf %20, %21 : vector<8x256xf32>
    %cst_21 = arith.constant dense<0.000000e+00> : vector<256xf32>
    %23 = vector.multi_reduction <add>, %22, %cst_21 [0] : vector<8x256xf32> to vector<256xf32>
    %24 = vector.shape_cast %23 : vector<256xf32> to vector<1x256xf32>
    %cst_22 = arith.constant 8.000000e+00 : f32
    %25 = vector.broadcast %cst_22 : f32 to vector<1x256xf32>
    %26 = arith.divf %24, %25 : vector<1x256xf32>
    %27 = vector.broadcast %26 : vector<1x256xf32> to vector<8x256xf32>
    %28 = arith.subf %22, %27 : vector<8x256xf32>
    %29 = vector.broadcast %26 : vector<1x256xf32> to vector<8x256xf32>
    %30 = arith.subf %22, %29 : vector<8x256xf32>
    %31 = arith.mulf %28, %30 : vector<8x256xf32>
    %cst_23 = arith.constant dense<0.000000e+00> : vector<256xf32>
    %32 = vector.multi_reduction <add>, %31, %cst_23 [0] : vector<8x256xf32> to vector<256xf32>
    %33 = vector.shape_cast %32 : vector<256xf32> to vector<1x256xf32>
    %cst_24 = arith.constant 8.000000e+00 : f32
    %34 = vector.broadcast %cst_24 : f32 to vector<1x256xf32>
    %35 = arith.divf %33, %34 : vector<1x256xf32>
    %36 = vector.broadcast %26 : vector<1x256xf32> to vector<8x256xf32>
    %37 = arith.subf %22, %36 : vector<8x256xf32>
    %cst_25 = arith.constant 9.99999974E-6 : f32
    %38 = vector.broadcast %cst_25 : f32 to vector<1x256xf32>
    %39 = arith.addf %35, %38 : vector<1x256xf32>
    %40 = math.rsqrt %39 : vector<1x256xf32>
    %41 = vector.broadcast %40 : vector<1x256xf32> to vector<8x256xf32>
    %42 = arith.mulf %37, %41 : vector<8x256xf32>
    %43 = vector.broadcast %15 : vector<1x256xf32> to vector<8x256xf32>
    %44 = arith.mulf %42, %43 : vector<8x256xf32>
    %45 = vector.broadcast %16 : vector<1x256xf32> to vector<8x256xf32>
    %46 = arith.addf %44, %45 : vector<8x256xf32>
    %cst_26 = arith.constant 0.000000e+00 : f32
    %47 = vector.broadcast %cst_26 : f32 to vector<8x256xf32>
    %48 = arith.maximumf %46, %47 : vector<8x256xf32>
    %49 = arith.truncf %48 : vector<8x256xf32> to vector<8x256xbf16>
    %cst_27 = arith.constant dense<0.000000e+00> : vector<8x128xf32>
    %50 = tpu.matmul %49, %17, %cst_27 {dimension_numbers = #tpu.dot_dimension_numbers<[1], [0], [0], [1], [0, 0, 1, 1], [], []>} : vector<8x256xbf16>, vector<256x128xbf16>, vector<8x128xf32> -> vector<8x128xf32>
    %51 = vector.broadcast %18 : vector<1x128xf32> to vector<8x128xf32>
    %52 = arith.addf %50, %51 : vector<8x128xf32>
    %c0_28 = arith.constant 0 : index
    %c0_29 = arith.constant 0 : index
    %53 = vector.load %arg11[%c0_28, %c0_29] : memref<128x256xbf16, #tpu.memory_space<vmem>>, vector<128x256xbf16>
    %c0_30 = arith.constant 0 : index
    %c0_31 = arith.constant 0 : index
    %54 = vector.load %arg12[%c0_30, %c0_31] : memref<1x256xf32, #tpu.memory_space<vmem>>, vector<1x256xf32>
    %c0_32 = arith.constant 0 : index
    %c0_33 = arith.constant 0 : index
    %55 = vector.load %arg13[%c0_32, %c0_33] : memref<1x256xf32, #tpu.memory_space<vmem>>, vector<1x256xf32>
    %c0_34 = arith.constant 0 : index
    %c0_35 = arith.constant 0 : index
    %56 = vector.load %arg14[%c0_34, %c0_35] : memref<1x256xf32, #tpu.memory_space<vmem>>, vector<1x256xf32>
    %c0_36 = arith.constant 0 : index
    %c0_37 = arith.constant 0 : index
    %57 = vector.load %arg15[%c0_36, %c0_37] : memref<256x128xbf16, #tpu.memory_space<vmem>>, vector<256x128xbf16>
    %c0_38 = arith.constant 0 : index
    %c0_39 = arith.constant 0 : index
    %58 = vector.load %arg16[%c0_38, %c0_39] : memref<1x128xf32, #tpu.memory_space<vmem>>, vector<1x128xf32>
    %59 = arith.truncf %52 : vector<8x128xf32> to vector<8x128xbf16>
    %cst_40 = arith.constant dense<0.000000e+00> : vector<8x256xf32>
    %60 = tpu.matmul %59, %53, %cst_40 {dimension_numbers = #tpu.dot_dimension_numbers<[1], [0], [0], [1], [0, 0, 1, 1], [], []>} : vector<8x128xbf16>, vector<128x256xbf16>, vector<8x256xf32> -> vector<8x256xf32>
    %61 = vector.broadcast %54 : vector<1x256xf32> to vector<8x256xf32>
    %62 = arith.addf %60, %61 : vector<8x256xf32>
    %cst_41 = arith.constant dense<0.000000e+00> : vector<256xf32>
    %63 = vector.multi_reduction <add>, %62, %cst_41 [0] : vector<8x256xf32> to vector<256xf32>
    %64 = vector.shape_cast %63 : vector<256xf32> to vector<1x256xf32>
    %cst_42 = arith.constant 8.000000e+00 : f32
    %65 = vector.broadcast %cst_42 : f32 to vector<1x256xf32>
    %66 = arith.divf %64, %65 : vector<1x256xf32>
    %67 = vector.broadcast %66 : vector<1x256xf32> to vector<8x256xf32>
    %68 = arith.subf %62, %67 : vector<8x256xf32>
    %69 = vector.broadcast %66 : vector<1x256xf32> to vector<8x256xf32>
    %70 = arith.subf %62, %69 : vector<8x256xf32>
    %71 = arith.mulf %68, %70 : vector<8x256xf32>
    %cst_43 = arith.constant dense<0.000000e+00> : vector<256xf32>
    %72 = vector.multi_reduction <add>, %71, %cst_43 [0] : vector<8x256xf32> to vector<256xf32>
    %73 = vector.shape_cast %72 : vector<256xf32> to vector<1x256xf32>
    %cst_44 = arith.constant 8.000000e+00 : f32
    %74 = vector.broadcast %cst_44 : f32 to vector<1x256xf32>
    %75 = arith.divf %73, %74 : vector<1x256xf32>
    %76 = vector.broadcast %66 : vector<1x256xf32> to vector<8x256xf32>
    %77 = arith.subf %62, %76 : vector<8x256xf32>
    %cst_45 = arith.constant 9.99999974E-6 : f32
    %78 = vector.broadcast %cst_45 : f32 to vector<1x256xf32>
    %79 = arith.addf %75, %78 : vector<1x256xf32>
    %80 = math.rsqrt %79 : vector<1x256xf32>
    %81 = vector.broadcast %80 : vector<1x256xf32> to vector<8x256xf32>
    %82 = arith.mulf %77, %81 : vector<8x256xf32>
    %83 = vector.broadcast %55 : vector<1x256xf32> to vector<8x256xf32>
    %84 = arith.mulf %82, %83 : vector<8x256xf32>
    %85 = vector.broadcast %56 : vector<1x256xf32> to vector<8x256xf32>
    %86 = arith.addf %84, %85 : vector<8x256xf32>
    %cst_46 = arith.constant 0.000000e+00 : f32
    %87 = vector.broadcast %cst_46 : f32 to vector<8x256xf32>
    %88 = arith.maximumf %86, %87 : vector<8x256xf32>
    %89 = arith.truncf %88 : vector<8x256xf32> to vector<8x256xbf16>
    %cst_47 = arith.constant dense<0.000000e+00> : vector<8x128xf32>
    %90 = tpu.matmul %89, %57, %cst_47 {dimension_numbers = #tpu.dot_dimension_numbers<[1], [0], [0], [1], [0, 0, 1, 1], [], []>} : vector<8x256xbf16>, vector<256x128xbf16>, vector<8x128xf32> -> vector<8x128xf32>
    %91 = vector.broadcast %58 : vector<1x128xf32> to vector<8x128xf32>
    %92 = arith.addf %90, %91 : vector<8x128xf32>
    %c0_48 = arith.constant 0 : index
    %c0_49 = arith.constant 0 : index
    %93 = vector.load %arg17[%c0_48, %c0_49] : memref<8x128xf32, #tpu.memory_space<vmem>>, vector<8x128xf32>
    tpu.vector_store %arg17[%c0_48, %c0_49], %92 {strides = array<i32>} : memref<8x128xf32, #tpu.memory_space<vmem>>, vector<8x128xf32>,
    return
  }
  func.func @transform_0(%arg0: i32) -> (i32, i32) {
    %c0_i32 = arith.constant 0 : i32
    %c0_i32_0 = arith.constant 0 : i32
    %c0_i32_1 = arith.constant 0 : i32
    return %c0_i32, %c0_i32_0 : i32, i32
  }
  func.func @transform_1(%arg0: i32) -> (i32, i32) {
    %c0_i32 = arith.constant 0 : i32
    %c0_i32_0 = arith.constant 0 : i32
    %c0_i32_1 = arith.constant 0 : i32
    return %c0_i32, %c0_i32_0 : i32, i32
  }
  func.func @transform_2(%arg0: i32) -> (i32, i32) {
    %c0_i32 = arith.constant 0 : i32
    %c0_i32_0 = arith.constant 0 : i32
    %c0_i32_1 = arith.constant 0 : i32
    return %c0_i32, %c0_i32_0 : i32, i32
  }
  func.func @transform_3(%arg0: i32) -> (i32, i32) {
    %c0_i32 = arith.constant 0 : i32
    %c0_i32_0 = arith.constant 0 : i32
    %c0_i32_1 = arith.constant 0 : i32
    return %c0_i32, %c0_i32_0 : i32, i32
  }
  func.func @transform_4(%arg0: i32) -> (i32, i32) {
    %c0_i32 = arith.constant 0 : i32
    %c0_i32_0 = arith.constant 0 : i32
    %c0_i32_1 = arith.constant 0 : i32
    return %c0_i32, %c0_i32_0 : i32, i32
  }
  func.func @transform_5(%arg0: i32) -> (i32, i32) {
    %c0_i32 = arith.constant 0 : i32
    %c0_i32_0 = arith.constant 0 : i32
    %c0_i32_1 = arith.constant 0 : i32
    return %c0_i32, %c0_i32_0 : i32, i32
  }
  func.func @transform_6(%arg0: i32) -> (i32, i32) {
    %c0_i32 = arith.constant 0 : i32
    %c0_i32_0 = arith.constant 0 : i32
    %c0_i32_1 = arith.constant 0 : i32
    return %c0_i32, %c0_i32_0 : i32, i32
  }
  func.func @transform_7(%arg0: i32) -> (i32, i32) {
    %c0_i32 = arith.constant 0 : i32
    %c0_i32_0 = arith.constant 0 : i32
    %c0_i32_1 = arith.constant 0 : i32
    return %c0_i32, %c0_i32_0 : i32, i32
  }
  func.func @transform_8(%arg0: i32) -> (i32, i32) {
    %c0_i32 = arith.constant 0 : i32
    %c0_i32_0 = arith.constant 0 : i32
    %c0_i32_1 = arith.constant 0 : i32
    return %c0_i32, %c0_i32_0 : i32, i32
  }
  func.func @transform_9(%arg0: i32) -> (i32, i32) {
    %c0_i32 = arith.constant 0 : i32
    %c0_i32_0 = arith.constant 0 : i32
    %c0_i32_1 = arith.constant 0 : i32
    return %c0_i32, %c0_i32_0 : i32, i32
  }
  func.func @transform_10(%arg0: i32) -> (i32, i32) {
    %c0_i32 = arith.constant 0 : i32
    %c0_i32_0 = arith.constant 0 : i32
    %c0_i32_1 = arith.constant 0 : i32
    return %c0_i32, %c0_i32_0 : i32, i32
  }
  func.func @transform_11(%arg0: i32) -> (i32, i32) {
    %c0_i32 = arith.constant 0 : i32
    %c0_i32_0 = arith.constant 0 : i32
    %c0_i32_1 = arith.constant 0 : i32
    return %c0_i32, %c0_i32_0 : i32, i32
  }
  func.func @transform_12(%arg0: i32) -> (i32, i32) {
    %c0_i32 = arith.constant 0 : i32
    %c0_i32_0 = arith.constant 0 : i32
    %c0_i32_1 = arith.constant 0 : i32
    return %c0_i32, %c0_i32_0 : i32, i32
  }
  func.func @transform_13(%arg0: i32) -> (i32, i32) {
    %c0_i32 = arith.constant 0 : i32
    %c0_i32_0 = arith.constant 0 : i32
    %c0_i32_1 = arith.constant 0 : i32
    return %c0_i32, %c0_i32_0 : i32, i32
  }
  func.func @transform_14(%arg0: i32) -> (i32, i32) {
    %c0_i32 = arith.constant 0 : i32
    %c0_i32_0 = arith.constant 0 : i32
    %c0_i32_1 = arith.constant 0 : i32
    return %c0_i32, %c0_i32_0 : i32, i32
  }
  func.func @transform_15(%arg0: i32) -> (i32, i32) {
    %c0_i32 = arith.constant 0 : i32
    %c0_i32_0 = arith.constant 0 : i32
    %c0_i32_1 = arith.constant 0 : i32
    return %c0_i32, %c0_i32_0 : i32, i32
  }
  func.func @transform_16(%arg0: i32) -> (i32, i32) {
    %c0_i32 = arith.constant 0 : i32
    %c0_i32_0 = arith.constant 0 : i32
    return %arg0, %c0_i32 : i32, i32
  }
}

module attributes {stable_mosaic.version = 11 : i64} {
  func.func @_key_encoder_kernel(%arg0: i32, %arg1: memref<8x1024xbf16, #tpu.memory_space<vmem>>, %arg2: memref<8x1024xbf16, #tpu.memory_space<vmem>>, %arg3: memref<1024x128xbf16, #tpu.memory_space<vmem>>, %arg4: memref<1x128xf32, #tpu.memory_space<vmem>>, %arg5: memref<128x256xbf16, #tpu.memory_space<vmem>>, %arg6: memref<1x256xf32, #tpu.memory_space<vmem>>, %arg7: memref<1x256xf32, #tpu.memory_space<vmem>>, %arg8: memref<1x256xf32, #tpu.memory_space<vmem>>, %arg9: memref<256x128xbf16, #tpu.memory_space<vmem>>, %arg10: memref<1x128xf32, #tpu.memory_space<vmem>>, %arg11: memref<8x128xf32, #tpu.memory_space<vmem>>) attributes {dimension_semantics = [#tpu.dimension_semantics<parallel>], iteration_bounds = array<i64: 2>, scalar_prefetch = 0 : i64, scratch_operands = 0 : i64, tpu.core_type = #tpu.core_type<tc>, window_params = [{pipeline_mode = #tpu.pipeline_mode<synchronous>, transform_indices = @transform_0, window_bounds = array<i64: 8, 1024>}, {pipeline_mode = #tpu.pipeline_mode<synchronous>, transform_indices = @transform_1, window_bounds = array<i64: 8, 1024>}, {pipeline_mode = #tpu.pipeline_mode<synchronous>, transform_indices = @transform_2, window_bounds = array<i64: 1024, 128>}, {pipeline_mode = #tpu.pipeline_mode<synchronous>, transform_indices = @transform_3, window_bounds = array<i64: 1, 128>}, {pipeline_mode = #tpu.pipeline_mode<synchronous>, transform_indices = @transform_4, window_bounds = array<i64: 128, 256>}, {pipeline_mode = #tpu.pipeline_mode<synchronous>, transform_indices = @transform_5, window_bounds = array<i64: 1, 256>}, {pipeline_mode = #tpu.pipeline_mode<synchronous>, transform_indices = @transform_6, window_bounds = array<i64: 1, 256>}, {pipeline_mode = #tpu.pipeline_mode<synchronous>, transform_indices = @transform_7, window_bounds = array<i64: 1, 256>}, {pipeline_mode = #tpu.pipeline_mode<synchronous>, transform_indices = @transform_8, window_bounds = array<i64: 256, 128>}, {pipeline_mode = #tpu.pipeline_mode<synchronous>, transform_indices = @transform_9, window_bounds = array<i64: 1, 128>}, {transform_indices = @transform_10, window_bounds = array<i64: 8, 128>}]} {
    %c0 = arith.constant 0 : index
    %c0_0 = arith.constant 0 : index
    %0 = vector.load %arg1[%c0, %c0_0] : memref<8x1024xbf16, #tpu.memory_space<vmem>>, vector<8x1024xbf16>
    %c0_1 = arith.constant 0 : index
    %c0_2 = arith.constant 0 : index
    %1 = vector.load %arg2[%c0_1, %c0_2] : memref<8x1024xbf16, #tpu.memory_space<vmem>>, vector<8x1024xbf16>
    %2 = vector.broadcast %arg0 : i32 to vector<8x1024xi32>
    %c0_i32 = arith.constant 0 : i32
    %3 = vector.broadcast %c0_i32 : i32 to vector<8x1024xi32>
    %4 = arith.cmpi eq, %2, %3 : vector<8x1024xi32>
    %5 = arith.select %4, %0, %1 : vector<8x1024xi1>, vector<8x1024xbf16>
    %c0_3 = arith.constant 0 : index
    %c0_4 = arith.constant 0 : index
    %6 = vector.load %arg3[%c0_3, %c0_4] : memref<1024x128xbf16, #tpu.memory_space<vmem>>, vector<1024x128xbf16>
    %cst = arith.constant dense<0.000000e+00> : vector<8x128xf32>
    %7 = tpu.matmul %5, %6, %cst {dimension_numbers = #tpu.dot_dimension_numbers<[1], [0], [0], [1], [0, 0, 1, 1], [], []>} : vector<8x1024xbf16>, vector<1024x128xbf16>, vector<8x128xf32> -> vector<8x128xf32>
    %c0_5 = arith.constant 0 : index
    %c0_6 = arith.constant 0 : index
    %8 = vector.load %arg4[%c0_5, %c0_6] : memref<1x128xf32, #tpu.memory_space<vmem>>, vector<1x128xf32>
    %9 = vector.broadcast %8 : vector<1x128xf32> to vector<8x128xf32>
    %10 = arith.addf %7, %9 : vector<8x128xf32>
    %cst_7 = arith.constant 0.000000e+00 : f32
    %11 = vector.broadcast %cst_7 : f32 to vector<8x128xf32>
    %12 = arith.maximumf %10, %11 : vector<8x128xf32>
    %c0_8 = arith.constant 0 : index
    %c0_9 = arith.constant 0 : index
    %13 = vector.load %arg5[%c0_8, %c0_9] : memref<128x256xbf16, #tpu.memory_space<vmem>>, vector<128x256xbf16>
    %c0_10 = arith.constant 0 : index
    %c0_11 = arith.constant 0 : index
    %14 = vector.load %arg6[%c0_10, %c0_11] : memref<1x256xf32, #tpu.memory_space<vmem>>, vector<1x256xf32>
    %c0_12 = arith.constant 0 : index
    %c0_13 = arith.constant 0 : index
    %15 = vector.load %arg7[%c0_12, %c0_13] : memref<1x256xf32, #tpu.memory_space<vmem>>, vector<1x256xf32>
    %c0_14 = arith.constant 0 : index
    %c0_15 = arith.constant 0 : index
    %16 = vector.load %arg8[%c0_14, %c0_15] : memref<1x256xf32, #tpu.memory_space<vmem>>, vector<1x256xf32>
    %c0_16 = arith.constant 0 : index
    %c0_17 = arith.constant 0 : index
    %17 = vector.load %arg9[%c0_16, %c0_17] : memref<256x128xbf16, #tpu.memory_space<vmem>>, vector<256x128xbf16>
    %c0_18 = arith.constant 0 : index
    %c0_19 = arith.constant 0 : index
    %18 = vector.load %arg10[%c0_18, %c0_19] : memref<1x128xf32, #tpu.memory_space<vmem>>, vector<1x128xf32>
    %19 = arith.truncf %12 : vector<8x128xf32> to vector<8x128xbf16>
    %cst_20 = arith.constant dense<0.000000e+00> : vector<8x256xf32>
    %20 = tpu.matmul %19, %13, %cst_20 {dimension_numbers = #tpu.dot_dimension_numbers<[1], [0], [0], [1], [0, 0, 1, 1], [], []>} : vector<8x128xbf16>, vector<128x256xbf16>, vector<8x256xf32> -> vector<8x256xf32>
    %21 = vector.broadcast %14 : vector<1x256xf32> to vector<8x256xf32>
    %22 = arith.addf %20, %21 : vector<8x256xf32>
    %cst_21 = arith.constant dense<0.000000e+00> : vector<256xf32>
    %23 = vector.multi_reduction <add>, %22, %cst_21 [0] : vector<8x256xf32> to vector<256xf32>
    %24 = vector.shape_cast %23 : vector<256xf32> to vector<1x256xf32>
    %cst_22 = arith.constant 8.000000e+00 : f32
    %25 = vector.broadcast %cst_22 : f32 to vector<1x256xf32>
    %26 = arith.divf %24, %25 : vector<1x256xf32>
    %27 = vector.broadcast %26 : vector<1x256xf32> to vector<8x256xf32>
    %28 = arith.subf %22, %27 : vector<8x256xf32>
    %29 = vector.broadcast %26 : vector<1x256xf32> to vector<8x256xf32>
    %30 = arith.subf %22, %29 : vector<8x256xf32>
    %31 = arith.mulf %28, %30 : vector<8x256xf32>
    %cst_23 = arith.constant dense<0.000000e+00> : vector<256xf32>
    %32 = vector.multi_reduction <add>, %31, %cst_23 [0] : vector<8x256xf32> to vector<256xf32>
    %33 = vector.shape_cast %32 : vector<256xf32> to vector<1x256xf32>
    %cst_24 = arith.constant 8.000000e+00 : f32
    %34 = vector.broadcast %cst_24 : f32 to vector<1x256xf32>
    %35 = arith.divf %33, %34 : vector<1x256xf32>
    %36 = vector.broadcast %26 : vector<1x256xf32> to vector<8x256xf32>
    %37 = arith.subf %22, %36 : vector<8x256xf32>
    %cst_25 = arith.constant 9.99999974E-6 : f32
    %38 = vector.broadcast %cst_25 : f32 to vector<1x256xf32>
    %39 = arith.addf %35, %38 : vector<1x256xf32>
    %40 = math.rsqrt %39 : vector<1x256xf32>
    %41 = vector.broadcast %40 : vector<1x256xf32> to vector<8x256xf32>
    %42 = arith.mulf %37, %41 : vector<8x256xf32>
    %43 = vector.broadcast %15 : vector<1x256xf32> to vector<8x256xf32>
    %44 = arith.mulf %42, %43 : vector<8x256xf32>
    %45 = vector.broadcast %16 : vector<1x256xf32> to vector<8x256xf32>
    %46 = arith.addf %44, %45 : vector<8x256xf32>
    %cst_26 = arith.constant 0.000000e+00 : f32
    %47 = vector.broadcast %cst_26 : f32 to vector<8x256xf32>
    %48 = arith.maximumf %46, %47 : vector<8x256xf32>
    %49 = arith.truncf %48 : vector<8x256xf32> to vector<8x256xbf16>
    %cst_27 = arith.constant dense<0.000000e+00> : vector<8x128xf32>
    %50 = tpu.matmul %49, %17, %cst_27 {dimension_numbers = #tpu.dot_dimension_numbers<[1], [0], [0], [1], [0, 0, 1, 1], [], []>} : vector<8x256xbf16>, vector<256x128xbf16>, vector<8x128xf32> -> vector<8x128xf32>
    %51 = vector.broadcast %18 : vector<1x128xf32> to vector<8x128xf32>
    %52 = arith.addf %50, %51 : vector<8x128xf32>
    %c0_28 = arith.constant 0 : index
    %c0_29 = arith.constant 0 : index
    %53 = vector.load %arg11[%c0_28, %c0_29] : memref<8x128xf32, #tpu.memory_space<vmem>>, vector<8x128xf32>
    tpu.vector_store %arg11[%c0_28, %c0_29], %52 {strides = array<i32>} : memref<8x128xf32, #tpu.memory_space<vmem>>, vector<8x128xf32>,
    return
  }
  func.func @transform_0(%arg0: i32) -> (i32, i32) {
    %c0_i32 = arith.constant 0 : i32
    %c0_i32_0 = arith.constant 0 : i32
    %c0_i32_1 = arith.constant 0 : i32
    return %c0_i32, %c0_i32_0 : i32, i32
  }
  func.func @transform_1(%arg0: i32) -> (i32, i32) {
    %c0_i32 = arith.constant 0 : i32
    %c0_i32_0 = arith.constant 0 : i32
    %c0_i32_1 = arith.constant 0 : i32
    return %c0_i32, %c0_i32_0 : i32, i32
  }
  func.func @transform_2(%arg0: i32) -> (i32, i32) {
    %c0_i32 = arith.constant 0 : i32
    %c0_i32_0 = arith.constant 0 : i32
    %c0_i32_1 = arith.constant 0 : i32
    return %c0_i32, %c0_i32_0 : i32, i32
  }
  func.func @transform_3(%arg0: i32) -> (i32, i32) {
    %c0_i32 = arith.constant 0 : i32
    %c0_i32_0 = arith.constant 0 : i32
    %c0_i32_1 = arith.constant 0 : i32
    return %c0_i32, %c0_i32_0 : i32, i32
  }
  func.func @transform_4(%arg0: i32) -> (i32, i32) {
    %c0_i32 = arith.constant 0 : i32
    %c0_i32_0 = arith.constant 0 : i32
    %c0_i32_1 = arith.constant 0 : i32
    return %c0_i32, %c0_i32_0 : i32, i32
  }
  func.func @transform_5(%arg0: i32) -> (i32, i32) {
    %c0_i32 = arith.constant 0 : i32
    %c0_i32_0 = arith.constant 0 : i32
    %c0_i32_1 = arith.constant 0 : i32
    return %c0_i32, %c0_i32_0 : i32, i32
  }
  func.func @transform_6(%arg0: i32) -> (i32, i32) {
    %c0_i32 = arith.constant 0 : i32
    %c0_i32_0 = arith.constant 0 : i32
    %c0_i32_1 = arith.constant 0 : i32
    return %c0_i32, %c0_i32_0 : i32, i32
  }
  func.func @transform_7(%arg0: i32) -> (i32, i32) {
    %c0_i32 = arith.constant 0 : i32
    %c0_i32_0 = arith.constant 0 : i32
    %c0_i32_1 = arith.constant 0 : i32
    return %c0_i32, %c0_i32_0 : i32, i32
  }
  func.func @transform_8(%arg0: i32) -> (i32, i32) {
    %c0_i32 = arith.constant 0 : i32
    %c0_i32_0 = arith.constant 0 : i32
    %c0_i32_1 = arith.constant 0 : i32
    return %c0_i32, %c0_i32_0 : i32, i32
  }
  func.func @transform_9(%arg0: i32) -> (i32, i32) {
    %c0_i32 = arith.constant 0 : i32
    %c0_i32_0 = arith.constant 0 : i32
    %c0_i32_1 = arith.constant 0 : i32
    return %c0_i32, %c0_i32_0 : i32, i32
  }
  func.func @transform_10(%arg0: i32) -> (i32, i32) {
    %c0_i32 = arith.constant 0 : i32
    %c0_i32_0 = arith.constant 0 : i32
    return %arg0, %c0_i32 : i32, i32
  }
}

module attributes {stable_mosaic.version = 11 : i64} {
  func.func @_online_pred_kernel(%arg0: i32, %arg1: memref<8x1024xbf16, #tpu.memory_space<vmem>>, %arg2: memref<8x1024xbf16, #tpu.memory_space<vmem>>, %arg3: memref<1024x128xbf16, #tpu.memory_space<vmem>>, %arg4: memref<1x128xf32, #tpu.memory_space<vmem>>, %arg5: memref<128x256xbf16, #tpu.memory_space<vmem>>, %arg6: memref<1x256xf32, #tpu.memory_space<vmem>>, %arg7: memref<1x256xf32, #tpu.memory_space<vmem>>, %arg8: memref<1x256xf32, #tpu.memory_space<vmem>>, %arg9: memref<256x128xbf16, #tpu.memory_space<vmem>>, %arg10: memref<1x128xf32, #tpu.memory_space<vmem>>, %arg11: memref<128x256xbf16, #tpu.memory_space<vmem>>, %arg12: memref<1x256xf32, #tpu.memory_space<vmem>>, %arg13: memref<1x256xf32, #tpu.memory_space<vmem>>, %arg14: memref<1x256xf32, #tpu.memory_space<vmem>>, %arg15: memref<256x128xbf16, #tpu.memory_space<vmem>>, %arg16: memref<1x128xf32, #tpu.memory_space<vmem>>, %arg17: memref<8x128xf32, #tpu.memory_space<vmem>>) attributes {dimension_semantics = [#tpu.dimension_semantics<parallel>], iteration_bounds = array<i64: 2>, scalar_prefetch = 0 : i64, scratch_operands = 0 : i64, tpu.core_type = #tpu.core_type<tc>, window_params = [{pipeline_mode = #tpu.pipeline_mode<synchronous>, transform_indices = @transform_0, window_bounds = array<i64: 8, 1024>}, {pipeline_mode = #tpu.pipeline_mode<synchronous>, transform_indices = @transform_1, window_bounds = array<i64: 8, 1024>}, {pipeline_mode = #tpu.pipeline_mode<synchronous>, transform_indices = @transform_2, window_bounds = array<i64: 1024, 128>}, {pipeline_mode = #tpu.pipeline_mode<synchronous>, transform_indices = @transform_3, window_bounds = array<i64: 1, 128>}, {pipeline_mode = #tpu.pipeline_mode<synchronous>, transform_indices = @transform_4, window_bounds = array<i64: 128, 256>}, {pipeline_mode = #tpu.pipeline_mode<synchronous>, transform_indices = @transform_5, window_bounds = array<i64: 1, 256>}, {pipeline_mode = #tpu.pipeline_mode<synchronous>, transform_indices = @transform_6, window_bounds = array<i64: 1, 256>}, {pipeline_mode = #tpu.pipeline_mode<synchronous>, transform_indices = @transform_7, window_bounds = array<i64: 1, 256>}, {pipeline_mode = #tpu.pipeline_mode<synchronous>, transform_indices = @transform_8, window_bounds = array<i64: 256, 128>}, {pipeline_mode = #tpu.pipeline_mode<synchronous>, transform_indices = @transform_9, window_bounds = array<i64: 1, 128>}, {pipeline_mode = #tpu.pipeline_mode<synchronous>, transform_indices = @transform_10, window_bounds = array<i64: 128, 256>}, {pipeline_mode = #tpu.pipeline_mode<synchronous>, transform_indices = @transform_11, window_bounds = array<i64: 1, 256>}, {pipeline_mode = #tpu.pipeline_mode<synchronous>, transform_indices = @transform_12, window_bounds = array<i64: 1, 256>}, {pipeline_mode = #tpu.pipeline_mode<synchronous>, transform_indices = @transform_13, window_bounds = array<i64: 1, 256>}, {pipeline_mode = #tpu.pipeline_mode<synchronous>, transform_indices = @transform_14, window_bounds = array<i64: 256, 128>}, {pipeline_mode = #tpu.pipeline_mode<synchronous>, transform_indices = @transform_15, window_bounds = array<i64: 1, 128>}, {transform_indices = @transform_16, window_bounds = array<i64: 8, 128>}]} {
    %c0 = arith.constant 0 : index
    %c0_0 = arith.constant 0 : index
    %0 = vector.load %arg1[%c0, %c0_0] : memref<8x1024xbf16, #tpu.memory_space<vmem>>, vector<8x1024xbf16>
    %c0_1 = arith.constant 0 : index
    %c0_2 = arith.constant 0 : index
    %1 = vector.load %arg2[%c0_1, %c0_2] : memref<8x1024xbf16, #tpu.memory_space<vmem>>, vector<8x1024xbf16>
    %2 = vector.broadcast %arg0 : i32 to vector<8x1024xi32>
    %c0_i32 = arith.constant 0 : i32
    %3 = vector.broadcast %c0_i32 : i32 to vector<8x1024xi32>
    %4 = arith.cmpi eq, %2, %3 : vector<8x1024xi32>
    %5 = arith.select %4, %0, %1 : vector<8x1024xi1>, vector<8x1024xbf16>
    %c0_3 = arith.constant 0 : index
    %c0_4 = arith.constant 0 : index
    %6 = vector.load %arg3[%c0_3, %c0_4] : memref<1024x128xbf16, #tpu.memory_space<vmem>>, vector<1024x128xbf16>
    %cst = arith.constant dense<0.000000e+00> : vector<8x128xf32>
    %7 = tpu.matmul %5, %6, %cst {dimension_numbers = #tpu.dot_dimension_numbers<[1], [0], [0], [1], [0, 0, 1, 1], [], []>} : vector<8x1024xbf16>, vector<1024x128xbf16>, vector<8x128xf32> -> vector<8x128xf32>
    %c0_5 = arith.constant 0 : index
    %c0_6 = arith.constant 0 : index
    %8 = vector.load %arg4[%c0_5, %c0_6] : memref<1x128xf32, #tpu.memory_space<vmem>>, vector<1x128xf32>
    %9 = vector.broadcast %8 : vector<1x128xf32> to vector<8x128xf32>
    %10 = arith.addf %7, %9 : vector<8x128xf32>
    %cst_7 = arith.constant 0.000000e+00 : f32
    %11 = vector.broadcast %cst_7 : f32 to vector<8x128xf32>
    %12 = arith.maximumf %10, %11 : vector<8x128xf32>
    %c0_8 = arith.constant 0 : index
    %c0_9 = arith.constant 0 : index
    %13 = vector.load %arg5[%c0_8, %c0_9] : memref<128x256xbf16, #tpu.memory_space<vmem>>, vector<128x256xbf16>
    %c0_10 = arith.constant 0 : index
    %c0_11 = arith.constant 0 : index
    %14 = vector.load %arg6[%c0_10, %c0_11] : memref<1x256xf32, #tpu.memory_space<vmem>>, vector<1x256xf32>
    %c0_12 = arith.constant 0 : index
    %c0_13 = arith.constant 0 : index
    %15 = vector.load %arg7[%c0_12, %c0_13] : memref<1x256xf32, #tpu.memory_space<vmem>>, vector<1x256xf32>
    %c0_14 = arith.constant 0 : index
    %c0_15 = arith.constant 0 : index
    %16 = vector.load %arg8[%c0_14, %c0_15] : memref<1x256xf32, #tpu.memory_space<vmem>>, vector<1x256xf32>
    %c0_16 = arith.constant 0 : index
    %c0_17 = arith.constant 0 : index
    %17 = vector.load %arg9[%c0_16, %c0_17] : memref<256x128xbf16, #tpu.memory_space<vmem>>, vector<256x128xbf16>
    %c0_18 = arith.constant 0 : index
    %c0_19 = arith.constant 0 : index
    %18 = vector.load %arg10[%c0_18, %c0_19] : memref<1x128xf32, #tpu.memory_space<vmem>>, vector<1x128xf32>
    %19 = arith.truncf %12 : vector<8x128xf32> to vector<8x128xbf16>
    %cst_20 = arith.constant dense<0.000000e+00> : vector<8x256xf32>
    %20 = tpu.matmul %19, %13, %cst_20 {dimension_numbers = #tpu.dot_dimension_numbers<[1], [0], [0], [1], [0, 0, 1, 1], [], []>} : vector<8x128xbf16>, vector<128x256xbf16>, vector<8x256xf32> -> vector<8x256xf32>
    %21 = vector.broadcast %14 : vector<1x256xf32> to vector<8x256xf32>
    %22 = arith.addf %20, %21 : vector<8x256xf32>
    %cst_21 = arith.constant dense<0.000000e+00> : vector<256xf32>
    %23 = vector.multi_reduction <add>, %22, %cst_21 [0] : vector<8x256xf32> to vector<256xf32>
    %24 = vector.shape_cast %23 : vector<256xf32> to vector<1x256xf32>
    %cst_22 = arith.constant 8.000000e+00 : f32
    %25 = vector.broadcast %cst_22 : f32 to vector<1x256xf32>
    %26 = arith.divf %24, %25 : vector<1x256xf32>
    %27 = vector.broadcast %26 : vector<1x256xf32> to vector<8x256xf32>
    %28 = arith.subf %22, %27 : vector<8x256xf32>
    %29 = vector.broadcast %26 : vector<1x256xf32> to vector<8x256xf32>
    %30 = arith.subf %22, %29 : vector<8x256xf32>
    %31 = arith.mulf %28, %30 : vector<8x256xf32>
    %cst_23 = arith.constant dense<0.000000e+00> : vector<256xf32>
    %32 = vector.multi_reduction <add>, %31, %cst_23 [0] : vector<8x256xf32> to vector<256xf32>
    %33 = vector.shape_cast %32 : vector<256xf32> to vector<1x256xf32>
    %cst_24 = arith.constant 8.000000e+00 : f32
    %34 = vector.broadcast %cst_24 : f32 to vector<1x256xf32>
    %35 = arith.divf %33, %34 : vector<1x256xf32>
    %36 = vector.broadcast %26 : vector<1x256xf32> to vector<8x256xf32>
    %37 = arith.subf %22, %36 : vector<8x256xf32>
    %cst_25 = arith.constant 9.99999974E-6 : f32
    %38 = vector.broadcast %cst_25 : f32 to vector<1x256xf32>
    %39 = arith.addf %35, %38 : vector<1x256xf32>
    %40 = math.rsqrt %39 : vector<1x256xf32>
    %41 = vector.broadcast %40 : vector<1x256xf32> to vector<8x256xf32>
    %42 = arith.mulf %37, %41 : vector<8x256xf32>
    %43 = vector.broadcast %15 : vector<1x256xf32> to vector<8x256xf32>
    %44 = arith.mulf %42, %43 : vector<8x256xf32>
    %45 = vector.broadcast %16 : vector<1x256xf32> to vector<8x256xf32>
    %46 = arith.addf %44, %45 : vector<8x256xf32>
    %cst_26 = arith.constant 0.000000e+00 : f32
    %47 = vector.broadcast %cst_26 : f32 to vector<8x256xf32>
    %48 = arith.maximumf %46, %47 : vector<8x256xf32>
    %49 = arith.truncf %48 : vector<8x256xf32> to vector<8x256xbf16>
    %cst_27 = arith.constant dense<0.000000e+00> : vector<8x128xf32>
    %50 = tpu.matmul %49, %17, %cst_27 {dimension_numbers = #tpu.dot_dimension_numbers<[1], [0], [0], [1], [0, 0, 1, 1], [], []>} : vector<8x256xbf16>, vector<256x128xbf16>, vector<8x128xf32> -> vector<8x128xf32>
    %51 = vector.broadcast %18 : vector<1x128xf32> to vector<8x128xf32>
    %52 = arith.addf %50, %51 : vector<8x128xf32>
    %c0_28 = arith.constant 0 : index
    %c0_29 = arith.constant 0 : index
    %53 = vector.load %arg11[%c0_28, %c0_29] : memref<128x256xbf16, #tpu.memory_space<vmem>>, vector<128x256xbf16>
    %c0_30 = arith.constant 0 : index
    %c0_31 = arith.constant 0 : index
    %54 = vector.load %arg12[%c0_30, %c0_31] : memref<1x256xf32, #tpu.memory_space<vmem>>, vector<1x256xf32>
    %c0_32 = arith.constant 0 : index
    %c0_33 = arith.constant 0 : index
    %55 = vector.load %arg13[%c0_32, %c0_33] : memref<1x256xf32, #tpu.memory_space<vmem>>, vector<1x256xf32>
    %c0_34 = arith.constant 0 : index
    %c0_35 = arith.constant 0 : index
    %56 = vector.load %arg14[%c0_34, %c0_35] : memref<1x256xf32, #tpu.memory_space<vmem>>, vector<1x256xf32>
    %c0_36 = arith.constant 0 : index
    %c0_37 = arith.constant 0 : index
    %57 = vector.load %arg15[%c0_36, %c0_37] : memref<256x128xbf16, #tpu.memory_space<vmem>>, vector<256x128xbf16>
    %c0_38 = arith.constant 0 : index
    %c0_39 = arith.constant 0 : index
    %58 = vector.load %arg16[%c0_38, %c0_39] : memref<1x128xf32, #tpu.memory_space<vmem>>, vector<1x128xf32>
    %59 = arith.truncf %52 : vector<8x128xf32> to vector<8x128xbf16>
    %cst_40 = arith.constant dense<0.000000e+00> : vector<8x256xf32>
    %60 = tpu.matmul %59, %53, %cst_40 {dimension_numbers = #tpu.dot_dimension_numbers<[1], [0], [0], [1], [0, 0, 1, 1], [], []>} : vector<8x128xbf16>, vector<128x256xbf16>, vector<8x256xf32> -> vector<8x256xf32>
    %61 = vector.broadcast %54 : vector<1x256xf32> to vector<8x256xf32>
    %62 = arith.addf %60, %61 : vector<8x256xf32>
    %cst_41 = arith.constant dense<0.000000e+00> : vector<256xf32>
    %63 = vector.multi_reduction <add>, %62, %cst_41 [0] : vector<8x256xf32> to vector<256xf32>
    %64 = vector.shape_cast %63 : vector<256xf32> to vector<1x256xf32>
    %cst_42 = arith.constant 8.000000e+00 : f32
    %65 = vector.broadcast %cst_42 : f32 to vector<1x256xf32>
    %66 = arith.divf %64, %65 : vector<1x256xf32>
    %67 = vector.broadcast %66 : vector<1x256xf32> to vector<8x256xf32>
    %68 = arith.subf %62, %67 : vector<8x256xf32>
    %69 = vector.broadcast %66 : vector<1x256xf32> to vector<8x256xf32>
    %70 = arith.subf %62, %69 : vector<8x256xf32>
    %71 = arith.mulf %68, %70 : vector<8x256xf32>
    %cst_43 = arith.constant dense<0.000000e+00> : vector<256xf32>
    %72 = vector.multi_reduction <add>, %71, %cst_43 [0] : vector<8x256xf32> to vector<256xf32>
    %73 = vector.shape_cast %72 : vector<256xf32> to vector<1x256xf32>
    %cst_44 = arith.constant 8.000000e+00 : f32
    %74 = vector.broadcast %cst_44 : f32 to vector<1x256xf32>
    %75 = arith.divf %73, %74 : vector<1x256xf32>
    %76 = vector.broadcast %66 : vector<1x256xf32> to vector<8x256xf32>
    %77 = arith.subf %62, %76 : vector<8x256xf32>
    %cst_45 = arith.constant 9.99999974E-6 : f32
    %78 = vector.broadcast %cst_45 : f32 to vector<1x256xf32>
    %79 = arith.addf %75, %78 : vector<1x256xf32>
    %80 = math.rsqrt %79 : vector<1x256xf32>
    %81 = vector.broadcast %80 : vector<1x256xf32> to vector<8x256xf32>
    %82 = arith.mulf %77, %81 : vector<8x256xf32>
    %83 = vector.broadcast %55 : vector<1x256xf32> to vector<8x256xf32>
    %84 = arith.mulf %82, %83 : vector<8x256xf32>
    %85 = vector.broadcast %56 : vector<1x256xf32> to vector<8x256xf32>
    %86 = arith.addf %84, %85 : vector<8x256xf32>
    %cst_46 = arith.constant 0.000000e+00 : f32
    %87 = vector.broadcast %cst_46 : f32 to vector<8x256xf32>
    %88 = arith.maximumf %86, %87 : vector<8x256xf32>
    %89 = arith.truncf %88 : vector<8x256xf32> to vector<8x256xbf16>
    %cst_47 = arith.constant dense<0.000000e+00> : vector<8x128xf32>
    %90 = tpu.matmul %89, %57, %cst_47 {dimension_numbers = #tpu.dot_dimension_numbers<[1], [0], [0], [1], [0, 0, 1, 1], [], []>} : vector<8x256xbf16>, vector<256x128xbf16>, vector<8x128xf32> -> vector<8x128xf32>
    %91 = vector.broadcast %58 : vector<1x128xf32> to vector<8x128xf32>
    %92 = arith.addf %90, %91 : vector<8x128xf32>
    %c0_48 = arith.constant 0 : index
    %c0_49 = arith.constant 0 : index
    %93 = vector.load %arg17[%c0_48, %c0_49] : memref<8x128xf32, #tpu.memory_space<vmem>>, vector<8x128xf32>
    tpu.vector_store %arg17[%c0_48, %c0_49], %92 {strides = array<i32>} : memref<8x128xf32, #tpu.memory_space<vmem>>, vector<8x128xf32>,
    return
  }
  func.func @transform_0(%arg0: i32) -> (i32, i32) {
    %c0_i32 = arith.constant 0 : i32
    %c0_i32_0 = arith.constant 0 : i32
    %c0_i32_1 = arith.constant 0 : i32
    return %c0_i32, %c0_i32_0 : i32, i32
  }
  func.func @transform_1(%arg0: i32) -> (i32, i32) {
    %c0_i32 = arith.constant 0 : i32
    %c0_i32_0 = arith.constant 0 : i32
    %c0_i32_1 = arith.constant 0 : i32
    return %c0_i32, %c0_i32_0 : i32, i32
  }
  func.func @transform_2(%arg0: i32) -> (i32, i32) {
    %c0_i32 = arith.constant 0 : i32
    %c0_i32_0 = arith.constant 0 : i32
    %c0_i32_1 = arith.constant 0 : i32
    return %c0_i32, %c0_i32_0 : i32, i32
  }
  func.func @transform_3(%arg0: i32) -> (i32, i32) {
    %c0_i32 = arith.constant 0 : i32
    %c0_i32_0 = arith.constant 0 : i32
    %c0_i32_1 = arith.constant 0 : i32
    return %c0_i32, %c0_i32_0 : i32, i32
  }
  func.func @transform_4(%arg0: i32) -> (i32, i32) {
    %c0_i32 = arith.constant 0 : i32
    %c0_i32_0 = arith.constant 0 : i32
    %c0_i32_1 = arith.constant 0 : i32
    return %c0_i32, %c0_i32_0 : i32, i32
  }
  func.func @transform_5(%arg0: i32) -> (i32, i32) {
    %c0_i32 = arith.constant 0 : i32
    %c0_i32_0 = arith.constant 0 : i32
    %c0_i32_1 = arith.constant 0 : i32
    return %c0_i32, %c0_i32_0 : i32, i32
  }
  func.func @transform_6(%arg0: i32) -> (i32, i32) {
    %c0_i32 = arith.constant 0 : i32
    %c0_i32_0 = arith.constant 0 : i32
    %c0_i32_1 = arith.constant 0 : i32
    return %c0_i32, %c0_i32_0 : i32, i32
  }
  func.func @transform_7(%arg0: i32) -> (i32, i32) {
    %c0_i32 = arith.constant 0 : i32
    %c0_i32_0 = arith.constant 0 : i32
    %c0_i32_1 = arith.constant 0 : i32
    return %c0_i32, %c0_i32_0 : i32, i32
  }
  func.func @transform_8(%arg0: i32) -> (i32, i32) {
    %c0_i32 = arith.constant 0 : i32
    %c0_i32_0 = arith.constant 0 : i32
    %c0_i32_1 = arith.constant 0 : i32
    return %c0_i32, %c0_i32_0 : i32, i32
  }
  func.func @transform_9(%arg0: i32) -> (i32, i32) {
    %c0_i32 = arith.constant 0 : i32
    %c0_i32_0 = arith.constant 0 : i32
    %c0_i32_1 = arith.constant 0 : i32
    return %c0_i32, %c0_i32_0 : i32, i32
  }
  func.func @transform_10(%arg0: i32) -> (i32, i32) {
    %c0_i32 = arith.constant 0 : i32
    %c0_i32_0 = arith.constant 0 : i32
    %c0_i32_1 = arith.constant 0 : i32
    return %c0_i32, %c0_i32_0 : i32, i32
  }
  func.func @transform_11(%arg0: i32) -> (i32, i32) {
    %c0_i32 = arith.constant 0 : i32
    %c0_i32_0 = arith.constant 0 : i32
    %c0_i32_1 = arith.constant 0 : i32
    return %c0_i32, %c0_i32_0 : i32, i32
  }
  func.func @transform_12(%arg0: i32) -> (i32, i32) {
    %c0_i32 = arith.constant 0 : i32
    %c0_i32_0 = arith.constant 0 : i32
    %c0_i32_1 = arith.constant 0 : i32
    return %c0_i32, %c0_i32_0 : i32, i32
  }
  func.func @transform_13(%arg0: i32) -> (i32, i32) {
    %c0_i32 = arith.constant 0 : i32
    %c0_i32_0 = arith.constant 0 : i32
    %c0_i32_1 = arith.constant 0 : i32
    return %c0_i32, %c0_i32_0 : i32, i32
  }
  func.func @transform_14(%arg0: i32) -> (i32, i32) {
    %c0_i32 = arith.constant 0 : i32
    %c0_i32_0 = arith.constant 0 : i32
    %c0_i32_1 = arith.constant 0 : i32
    return %c0_i32, %c0_i32_0 : i32, i32
  }
  func.func @transform_15(%arg0: i32) -> (i32, i32) {
    %c0_i32 = arith.constant 0 : i32
    %c0_i32_0 = arith.constant 0 : i32
    %c0_i32_1 = arith.constant 0 : i32
    return %c0_i32, %c0_i32_0 : i32, i32
  }
  func.func @transform_16(%arg0: i32) -> (i32, i32) {
    %c0_i32 = arith.constant 0 : i32
    %c0_i32_0 = arith.constant 0 : i32
    return %arg0, %c0_i32 : i32, i32
  }
}

</mosaic_0001>

<bundles_post_ra>
// kernel: byol_forward.3
= control target key start
LH: loop header
LB: loop body
LE: loop exit
PB: predicated region body
PF: predicated region fallthrough
CT: control target
= control target key end

     0   :  { %s1903_s13 = smov 0   ;;  %s2261_s0 = inlined_call_operand.vmem [shape: bf16[8,1024], index: 0, kind: input, shape index: {}]   ;;  %s2262_s1 = inlined_call_operand.vmem [shape: bf16[8,1024], index: 1, kind: input, shape index: {}]   ;;  %s2263_s2 = inlined_call_operand.vmem [shape: bf16[1024,128], index: 2, kind: input, shape index: {}]   ;;  %s2264_s3 = inlined_call_operand.vmem [shape: f32[1,128], index: 3, kind: input, shape index: {}]   ;;  %s2265_s4 = inlined_call_operand.vmem [shape: bf16[128,256], index: 4, kind: input, shape index: {}]   ;;  %s2266_s5 = inlined_call_operand.vmem [shape: f32[1,256], index: 5, kind: input, shape index: {}]   ;;  %s2267_s6 = inlined_call_operand.vmem [shape: f32[1,256], index: 6, kind: input, shape index: {}]   ;;  %s2268_s7 = inlined_call_operand.vmem [shape: f32[1,256], index: 7, kind: input, shape index: {}]   ;;  %s2269_s8 = inlined_call_operand.vmem [shape: bf16[256,128], index: 8, kind: input, shape index: {}]   ;;  %s2270_s9 = inlined_call_operand.vmem [shape: f32[1,128], index: 9, kind: input, shape index: {}]   ;;  %s2271_s10 = inlined_call_operand.vmem [shape: f32[16,128], index: 10, kind: output, shape index: {}]  }
   0x1 LB: > { %s1909_s14 = sadd.s32 4294967295, %s1845_s13   ;;  %p1502_p0 = scmp.ge.s32.totalorder %s1845_s13, 1  ;;  %s1845_s13 = sphi %s1903_s13, %s20_s13  }
   0x2   : > { %p302_p1 = scmp.lt.s32.totalorder %s1845_s13, 3 }
   0x4   : > { %p303_p2 = pnand %p1502_p0, %p302_p1 }
   0x5   : > { %v1731_v0 = vld [vmem:[%s2263_s2 + $0x40] sm:$0xff] (!%p303_p2)   ;;  %v1735_v4 = vld [vmem:[%s2263_s2 + $0x48] sm:$0xff] (!%p303_p2)   ;;  %v1739_v8 = vld [vmem:[%s2263_s2 + $0x50] sm:$0xff] (!%p303_p2)   ;;  %v347_v28 = vstv (!%p303_p2), %s1909_s14  ;;  %p334_p3 = scmp.lt.s32.totalorder (!%p303_p2), %s1909_s14, 1 }
   0x6   : > { %306 = sbr.rel (%p303_p2) target bundleno = 783 (0x30f), region = 60  ;;  %v1732_v1 = vld [vmem:[%s2263_s2 + $0xc0] sm:$0xff] (!%p303_p2)   ;;  %1612 = vmatprep.subr.bf16.mxu0 (!%p303_p2), %v1731_v0  ;;  %v1736_v5 = vld [vmem:[%s2263_s2 + $0xc8] sm:$0xff] (!%p303_p2)   ;;  %v1740_v9 = vld [vmem:[%s2263_s2 + $0xd0] sm:$0xff] (!%p303_p2)   ;;  %vm2007_vm0 = vcmp.eq.s32.totalorder (!%p303_p2), %v347_v28, 0 }
   0x7   : > { %v1733_v2 = vld [vmem:[%s2263_s2] sm:$0xff] (!%p303_p2)   ;;  %1634 = vmatprep.subr.bf16.mxu1 (!%p303_p2), %v1732_v1  ;;  %v1737_v6 = vld [vmem:[%s2263_s2 + $0x8] sm:$0xff] (!%p303_p2)   ;;  %v1741_v10 = vld [vmem:[%s2263_s2 + $0x10] sm:$0xff] (!%p303_p2)  }
   0x8   : > { %v1734_v3 = vld [vmem:[%s2263_s2 + $0x80] sm:$0xff] (!%p303_p2)   ;;  %1613 = vmatpush3.bf16.msra.mxu0 (!%p303_p2), %v1733_v2  ;;  %v1738_v7 = vld [vmem:[%s2263_s2 + $0x88] sm:$0xff] (!%p303_p2)   ;;  %v1742_v11 = vld [vmem:[%s2263_s2 + $0x90] sm:$0xff] (!%p303_p2)  }
   0x9   : > { %1635 = vmatpush3.bf16.msra.mxu1 (!%p303_p2), %v1734_v3  ;;  %1614 = vmatprep.subr.bf16.mxu0 (!%p303_p2), %v1735_v4  ;;  %v1743_v12 = vld [vmem:[%s2263_s2 + $0x58] sm:$0xff] (!%p303_p2)   ;;  %v1747_v16 = vld [vmem:[%s2263_s2 + $0x60] sm:$0xff] (!%p303_p2)   ;;  %v1751_v20 = vld [vmem:[%s2263_s2 + $0x68] sm:$0xff] (!%p303_p2)  }
   0xa   : > { %1636 = vmatprep.subr.bf16.mxu1 (!%p303_p2), %v1736_v5  ;;  %v1744_v13 = vld [vmem:[%s2263_s2 + $0xd8] sm:$0xff] (!%p303_p2)   ;;  %v1748_v17 = vld [vmem:[%s2263_s2 + $0xe0] sm:$0xff] (!%p303_p2)   ;;  %v1752_v21 = vld [vmem:[%s2263_s2 + $0xe8] sm:$0xff] (!%p303_p2)  }
   0xb   : > { %v1745_v14 = vld [vmem:[%s2263_s2 + $0x18] sm:$0xff] (!%p303_p2)   ;;  %v1749_v18 = vld [vmem:[%s2263_s2 + $0x20] sm:$0xff] (!%p303_p2)   ;;  %v1753_v22 = vld [vmem:[%s2263_s2 + $0x28] sm:$0xff] (!%p303_p2)  }
   0xc   : > { %1615 = vmatpush3.bf16.msra.mxu0 (!%p303_p2), %v1737_v6  ;;  %v1746_v15 = vld [vmem:[%s2263_s2 + $0x98] sm:$0xff] (!%p303_p2)   ;;  %v1750_v19 = vld [vmem:[%s2263_s2 + $0xa0] sm:$0xff] (!%p303_p2)   ;;  %v1754_v23 = vld [vmem:[%s2263_s2 + $0xa8] sm:$0xff] (!%p303_p2)  }
   0xd   : > { %1637 = vmatpush3.bf16.msra.mxu1 %v1738_v7  ;;  %1616 = vmatprep.subr.bf16.mxu0 %v1739_v8  ;;  %v1755_v24 = vld [vmem:[%s2263_s2 + $0x70] sm:$0xff]   ;;  %v1759_v29 = vld [vmem:[%s2263_s2 + $0x78] sm:$0xff]   ;;  %v339_v34 = vld [vmem:[%s2261_s0] sm:$0xff]  ;;  %s2275_s14 = smov (!%p334_p3, %s1909_s14), 1 }
   0xe   : > { %1638 = vmatprep.subr.bf16.mxu1 %v1740_v9  ;;  %v1756_v25 = vld [vmem:[%s2263_s2 + $0xf0] sm:$0xff]   ;;  %v1760_v30 = vld [vmem:[%s2263_s2 + $0xf8] sm:$0xff]   ;;  %v343_v35 = vld [vmem:[%s2262_s1] sm:$0xff]  ;;  %s1503_s15 = sshll.u32 %s2275_s14, 3 }
   0xf   : > { %v1757_v26 = vld [vmem:[%s2263_s2 + $0x30] sm:$0xff]   ;;  %v1761_v31 = vld [vmem:[%s2263_s2 + $0x38] sm:$0xff]   ;;  %v340_v36 = vld [vmem:[%s2261_s0 + $0x8] sm:$0xff]  ;;  %v349_v37 = vsel %vm2007_vm0, %v339_v34, %v343_v35  ;;  %s337_s20 = scalar_lea.vmem %s2271_s10, %s1503_s15 }
  0x10   : > { %1617 = vmatpush3.bf16.msra.mxu0 %v1741_v10  ;;  %v1758_v27 = vld [vmem:[%s2263_s2 + $0xb0] sm:$0xff]   ;;  %v1762_v33 = vld [vmem:[%s2263_s2 + $0xb8] sm:$0xff]   ;;  %v344_v38 = vld [vmem:[%s2262_s1 + $0x8] sm:$0xff]  ;;  %v1505_v39 = vcombine.low %v349_v37, %v349_v37  ;;  %v1506_v40 = vcombine.high %v349_v37, %v349_v37 }
  0x11   : > { %1639 = vmatpush3.bf16.msra.mxu1 %v1742_v11  ;;  %1618 = vmatprep.subr.bf16.mxu0 %v1743_v12  ;;  %v350_v41 = vsel %vm2007_vm0, %v340_v36, %v344_v38  ;;  %v1763_v42 = vld [vmem:[%s2263_s2 + $0x140] sm:$0xff]   ;;  %v1767_v48 = vld [vmem:[%s2263_s2 + $0x148] sm:$0xff]   ;;  %v1771_v52 = vld [vmem:[%s2263_s2 + $0x150] sm:$0xff]   ;;  %v1847_v38 = vmov 0  }
  0x12   : > { %1640 = vmatprep.subr.bf16.mxu1 %v1744_v13  ;;  %v1507_v43 = vcombine.low %v350_v41, %v350_v41  ;;  %v1508_v44 = vcombine.high %v350_v41, %v350_v41  ;;  %v1764_v45 = vld [vmem:[%s2263_s2 + $0x1c0] sm:$0xff]   ;;  %932 = vmatprep.mubr.bf16.mxu0 %v1506_v40  ;;  %v1768_v49 = vld [vmem:[%s2263_s2 + $0x1c8] sm:$0xff]   ;;  %v1772_v53 = vld [vmem:[%s2263_s2 + $0x1d0] sm:$0xff]  }
  0x13   : > { %v1765_v46 = vld [vmem:[%s2263_s2 + $0x100] sm:$0xff]   ;;  %v1769_v50 = vld [vmem:[%s2263_s2 + $0x108] sm:$0xff]   ;;  %v1773_v54 = vld [vmem:[%s2263_s2 + $0x110] sm:$0xff]  }
  0x14   : > { %1619 = vmatpush3.bf16.msra.mxu0 %v1745_v14  ;;  %972 = vmatprep.mubr.bf16.mxu1 %v1508_v44  ;;  %v1766_v47 = vld [vmem:[%s2263_s2 + $0x180] sm:$0xff]   ;;  %v1770_v51 = vld [vmem:[%s2263_s2 + $0x188] sm:$0xff]   ;;  %v1774_v55 = vld [vmem:[%s2263_s2 + $0x190] sm:$0xff]  }
  0x15   : > { %1641 = vmatpush3.bf16.msra.mxu1 %v1746_v15  ;;  %1620 = vmatprep.subr.bf16.mxu0 %v1747_v16  ;;  %v1775_v56 = vld [vmem:[%s2263_s2 + $0x158] sm:$0xff]   ;;  %v1779_v60 = vld [vmem:[%s2263_s2 + $0x160] sm:$0xff]   ;;  %v1783_v0 = vld [vmem:[%s2263_s2 + $0x168] sm:$0xff]  }
  0x16   : > { %1642 = vmatprep.subr.bf16.mxu1 %v1748_v17  ;;  %v1776_v57 = vld [vmem:[%s2263_s2 + $0x1d8] sm:$0xff]   ;;  %v1780_v61 = vld [vmem:[%s2263_s2 + $0x1e0] sm:$0xff]   ;;  %v1784_v1 = vld [vmem:[%s2263_s2 + $0x1e8] sm:$0xff]  }
  0x17   : > { %v1777_v58 = vld [vmem:[%s2263_s2 + $0x118] sm:$0xff]   ;;  %v1781_v62 = vld [vmem:[%s2263_s2 + $0x120] sm:$0xff]   ;;  %v1785_v2 = vld [vmem:[%s2263_s2 + $0x128] sm:$0xff]  }
  0x18   : > { %1621 = vmatpush3.bf16.msra.mxu0 %v1749_v18  ;;  %v1778_v59 = vld [vmem:[%s2263_s2 + $0x198] sm:$0xff]   ;;  %v1782_v63 = vld [vmem:[%s2263_s2 + $0x1a0] sm:$0xff]   ;;  %v1786_v3 = vld [vmem:[%s2263_s2 + $0x1a8] sm:$0xff]  }
  0x19   : > { %1643 = vmatpush3.bf16.msra.mxu1 %v1750_v19  ;;  %1622 = vmatprep.subr.bf16.mxu0 %v1751_v20  ;;  %v1787_v4 = vld [vmem:[%s2263_s2 + $0x170] sm:$0xff]   ;;  %v1791_v8 = vld [vmem:[%s2263_s2 + $0x178] sm:$0xff]   ;;  %v1815_v34 = vld [vmem:[%s2265_s4 + $0x64] ss:$8 sps:$4 sm:$0xff]  }
  0x1a   : > { %1644 = vmatprep.subr.bf16.mxu1 %v1752_v21  ;;  %v1788_v5 = vld [vmem:[%s2263_s2 + $0x1f0] sm:$0xff]   ;;  %v1792_v9 = vld [vmem:[%s2263_s2 + $0x1f8] sm:$0xff]   ;;  %v1813_v35 = vld [vmem:[%s2265_s4 + $0x60] ss:$8 sps:$4 sm:$0xff]  }
  0x1b   : > { %v1789_v6 = vld [vmem:[%s2263_s2 + $0x130] sm:$0xff]   ;;  %v1793_v10 = vld [vmem:[%s2263_s2 + $0x138] sm:$0xff]   ;;  %v1504_v41 = vld [vmem:[%s2264_s3] ss:$0 sm:$0xff] }
  0x1c   : > { %1623 = vmatpush3.bf16.msra.mxu0 %v1753_v22  ;;  %v1790_v7 = vld [vmem:[%s2263_s2 + $0x1b0] sm:$0xff]   ;;  %v1794_v11 = vld [vmem:[%s2263_s2 + $0x1b8] sm:$0xff]   ;;  %v1795_v22 = vld [vmem:[%s2265_s4] ss:$8 sps:$4 sm:$0xff]  }
  0x1d   : > { %1645 = vmatpush3.bf16.msra.mxu1 %v1754_v23  ;;  %1624 = vmatprep.subr.bf16.mxu0 %v1755_v24  ;;  %v341_v12 = vld [vmem:[%s2261_s0 + $0x10] sm:$0xff]  ;;  %v342_v15 = vld [vmem:[%s2261_s0 + $0x18] sm:$0xff]  ;;  %v1797_v23 = vld [vmem:[%s2265_s4 + $0x4] ss:$8 sps:$4 sm:$0xff]  }
  0x1e   : > { %1646 = vmatprep.subr.bf16.mxu1 %v1756_v25  ;;  %v345_v13 = vld [vmem:[%s2262_s1 + $0x10] sm:$0xff]  ;;  %v346_v16 = vld [vmem:[%s2262_s1 + $0x18] sm:$0xff] }
  0x1f   : > { %v351_v14 = vsel %vm2007_vm0, %v341_v12, %v345_v13  ;;  %v352_v19 = vsel %vm2007_vm0, %v342_v15, %v346_v16  ;;  %v1800_v24 = vld [vmem:[%s2265_s4 + $0x14] ss:$8 sps:$4 sm:$0xff]   ;;  %v1798_v25 = vld [vmem:[%s2265_s4 + $0x10] ss:$8 sps:$4 sm:$0xff]   ;;  %v1829_v12 = vld [vmem:[%s2269_s8 + $0x68] sm:$0xff]  }
  0x20   : > { %1625 = vmatpush3.bf16.msra.mxu0 %v1757_v26  ;;  %v1509_v17 = vcombine.low %v351_v14, %v351_v14  ;;  %v1510_v18 = vcombine.high %v351_v14, %v351_v14  ;;  %v1511_v20 = vcombine.low %v352_v19, %v352_v19  ;;  %v1512_v21 = vcombine.high %v352_v19, %v352_v19  ;;  %v1803_v26 = vld [vmem:[%s2265_s4 + $0x24] ss:$8 sps:$4 sm:$0xff]   ;;  %v1806_v28 = vld [vmem:[%s2265_s4 + $0x34] ss:$8 sps:$4 sm:$0xff]   ;;  %v1816_v37 = vld [vmem:[%s2265_s4 + $0x70] ss:$8 sps:$4 sm:$0xff]  }
  0x21   : > { %1647 = vmatpush3.bf16.msra.mxu1 %v1758_v27  ;;  %1626 = vmatprep.subr.bf16.mxu0 %v1759_v29  ;;  %v1801_v27 = vld [vmem:[%s2265_s4 + $0x20] ss:$8 sps:$4 sm:$0xff]   ;;  %v1804_v29 = vld [vmem:[%s2265_s4 + $0x30] ss:$8 sps:$4 sm:$0xff]   ;;  %v1812_v32 = vld [vmem:[%s2265_s4 + $0x54] ss:$8 sps:$4 sm:$0xff]  }
  0x22   : > { %1648 = vmatprep.subr.bf16.mxu1 %v1760_v30  ;;  %v1809_v30 = vld [vmem:[%s2265_s4 + $0x44] ss:$8 sps:$4 sm:$0xff]   ;;  %v1818_v36 = vld [vmem:[%s2265_s4 + $0x74] ss:$8 sps:$4 sm:$0xff]  }
  0x23   : > { %v1830_v13 = vld [vmem:[%s2269_s8 + $0x28] sm:$0xff]   ;;  %v1831_v14 = vld [vmem:[%s2269_s8 + $0x70] sm:$0xff]   ;;  %v1833_v16 = vld [vmem:[%s2269_s8 + $0x78] sm:$0xff]  }
  0x24   : > { %1627 = vmatpush3.bf16.msra.mxu0 %v1761_v31  ;;  %v1807_v31 = vld [vmem:[%s2265_s4 + $0x40] ss:$8 sps:$4 sm:$0xff]   ;;  %v1832_v15 = vld [vmem:[%s2269_s8 + $0x30] sm:$0xff]  }
  0x25   : > { %1649 = vmatpush3.bf16.msra.mxu1 %v1762_v33  ;;  %1656 = vmatprep.subr.bf16.mxu0 %v1763_v42  ;;  %v1810_v33 = vld [vmem:[%s2265_s4 + $0x50] ss:$8 sps:$4 sm:$0xff]  }
  0x26   : > { %1678 = vmatprep.subr.bf16.mxu1 %v1764_v45 }
  0x27   : > { %933 = vmatmul.mubr.bf16.vlgmr.msra.gmra.mrb[0].mxu0 %v1505_v39 }
  0x28   : > { %973 = vmatmul.mubr.bf16.vlgmr.msra.gmra.mrb[0].mxu1 %v1507_v43  ;;  %1657 = vmatpush3.bf16.msra.mxu0 %v1765_v46 }
  0x29   : > { %1679 = vmatpush3.bf16.msra.mxu1 %v1766_v47  ;;  %1658 = vmatprep.subr.bf16.mxu0 %v1767_v48 }
  0x2a   : > { %1680 = vmatprep.subr.bf16.mxu1 %v1768_v49  ;;  %1012 = vmatprep.mubr.bf16.mxu0 %v1510_v18  ;;  %v1115_v18 = vlaneseq }
  0x2b   : > { %1052 = vmatprep.mubr.bf16.mxu1 %v1512_v21  ;;  %v1077_v21 = vld [vmem:[%s2266_s5] sm:$0x3] }
  0x2c   : > { %1659 = vmatpush3.bf16.msra.mxu0 %v1769_v50  ;;  %v1116_v19 = vshrl.u32 %v1115_v18, 7 }
  0x2d   : > { %1681 = vmatpush3.bf16.msra.mxu1 %v1770_v51  ;;  %1660 = vmatprep.subr.bf16.mxu0 %v1771_v52 }
  0x2e   : > { %1682 = vmatprep.subr.bf16.mxu1 %v1772_v53 }
  0x30   : > { %1661 = vmatpush3.bf16.msra.mxu0 %v1773_v54 }
  0x31   : > { %1683 = vmatpush3.bf16.msra.mxu1 %v1774_v55  ;;  %1662 = vmatprep.subr.bf16.mxu0 %v1775_v56 }
  0x32   : > { %1684 = vmatprep.subr.bf16.mxu1 %v1776_v57 }
  0x34   : > { %1663 = vmatpush3.bf16.msra.mxu0 %v1777_v58 }
  0x35   : > { %1685 = vmatpush3.bf16.msra.mxu1 %v1778_v59  ;;  %1664 = vmatprep.subr.bf16.mxu0 %v1779_v60 }
  0x36   : > { %1686 = vmatprep.subr.bf16.mxu1 %v1780_v61 }
  0x38   : > { %1665 = vmatpush3.bf16.msra.mxu0 %v1781_v62 }
  0x39   : > { %1687 = vmatpush3.bf16.msra.mxu1 %v1782_v63  ;;  %1666 = vmatprep.subr.bf16.mxu0 %v1783_v0 }
  0x3a   : > { %1688 = vmatprep.subr.bf16.mxu1 %v1784_v1 }
  0x3c   : > { %1667 = vmatpush3.bf16.msra.mxu0 %v1785_v2  ;;  %v1819_v2 = vld [vmem:[%s2269_s8 + $0x40] sm:$0xff]  }
  0x3d   : > { %1689 = vmatpush3.bf16.msra.mxu1 %v1786_v3  ;;  %1668 = vmatprep.subr.bf16.mxu0 %v1787_v4  ;;  %v1820_v3 = vld [vmem:[%s2269_s8] sm:$0xff]   ;;  %v1821_v4 = vld [vmem:[%s2269_s8 + $0x48] sm:$0xff]  }
  0x3e   : > { %1690 = vmatprep.subr.bf16.mxu1 %v1788_v5  ;;  %v1822_v5 = vld [vmem:[%s2269_s8 + $0x8] sm:$0xff]  }
  0x40   : > { %1669 = vmatpush3.bf16.msra.mxu0 %v1789_v6  ;;  %v1823_v6 = vld [vmem:[%s2269_s8 + $0x50] sm:$0xff]  }
  0x41   : > { %1691 = vmatpush3.bf16.msra.mxu1 %v1790_v7  ;;  %1670 = vmatprep.subr.bf16.mxu0 %v1791_v8  ;;  %v1824_v7 = vld [vmem:[%s2269_s8 + $0x10] sm:$0xff]   ;;  %v1825_v8 = vld [vmem:[%s2269_s8 + $0x58] sm:$0xff]  }
  0x42   : > { %1692 = vmatprep.subr.bf16.mxu1 %v1792_v9  ;;  %v1826_v9 = vld [vmem:[%s2269_s8 + $0x18] sm:$0xff]  }
  0x44   : > { %1671 = vmatpush3.bf16.msra.mxu0 %v1793_v10  ;;  %v1827_v10 = vld [vmem:[%s2269_s8 + $0x60] sm:$0xff]  }
  0x45   : > { %1693 = vmatpush3.bf16.msra.mxu1 %v1794_v11  ;;  %1205 = vmatprep.subr.bf16.mxu0 %v1797_v23  ;;  %v1828_v11 = vld [vmem:[%s2269_s8 + $0x20] sm:$0xff]  }
  0x46   : > { %1700 = vmatprep.subr.bf16.mxu1 %v1819_v2  ;;  %v1079_v2 = vld [vmem:[%s2268_s7] sm:$0x3] }
  0x47   : > { %1013 = vmatmul.mubr.bf16.vlgmr.msra.gmra.mrb[4].mxu0 %v1509_v17  ;;  %v1834_v17 = vld [vmem:[%s2269_s8 + $0x38] sm:$0xff]  }
  0x48   : > { %1053 = vmatmul.mubr.bf16.vlgmr.msra.gmra.mrb[4].mxu1 %v1511_v20  ;;  %1206 = vmatpush1.bf16.msra.mxu0 %v1795_v22  ;;  %v1117_v20 = vsub.s32 0, %v1116_v19  ;;  %v1121_v22 = vsub.s32 1, %v1116_v19 }
  0x49   : > { %1207 = vmatprep.subr.bf16.mxu0 %v1800_v24  ;;  %1237 = vmatprep.mubr.bf16.mxu0 %v1847_v38 }
  0x4a   : > { %1701 = vmatpush3.bf16.msra.mxu1 %v1820_v3  ;;  %v1118_v23 = vrot.slane %v1077_v21, %v1117_v20  ;;  %v1122_v24 = vrot.slane %v1077_v21, %v1121_v22 }
  0x4b   : > { %1702 = vmatprep.subr.bf16.mxu1 %v1821_v4 }
  0x4c   : > { %1208 = vmatpush1.bf16.msra.mxu0 %v1798_v25 }
  0x4d   : > { %1209 = vmatprep.subr.bf16.mxu0 %v1803_v26 }
  0x4e   : > { %1703 = vmatpush3.bf16.msra.mxu1 %v1822_v5 }
  0x4f   : > { %1704 = vmatprep.subr.bf16.mxu1 %v1823_v6 }
  0x50   : > { %1210 = vmatpush1.bf16.msra.mxu0 %v1801_v27 }
  0x51   : > { %1211 = vmatprep.subr.bf16.mxu0 %v1806_v28 }
  0x52   : > { %1705 = vmatpush3.bf16.msra.mxu1 %v1824_v7 }
  0x53   : > { %1706 = vmatprep.subr.bf16.mxu1 %v1825_v8  ;;  %v1302_v8 = vrot.slane %v1079_v2, %v1117_v20 }
  0x54   : > { %1212 = vmatpush1.bf16.msra.mxu0 %v1804_v29 }
  0x55   : > { %1213 = vmatprep.subr.bf16.mxu0 %v1809_v30 }
  0x56   : > { %1707 = vmatpush3.bf16.msra.mxu1 %v1826_v9 }
  0x57   : > { %1708 = vmatprep.subr.bf16.mxu1 %v1827_v10  ;;  %v1306_v10 = vrot.slane %v1079_v2, %v1121_v22 }
  0x58   : > { %1214 = vmatpush1.bf16.msra.mxu0 %v1807_v31 }
  0x59   : > { %1215 = vmatprep.subr.bf16.mxu0 %v1812_v32 }
  0x5a   : > { %1709 = vmatpush3.bf16.msra.mxu1 %v1828_v11 }
  0x5b   : > { %1710 = vmatprep.subr.bf16.mxu1 %v1829_v12 }
  0x5c   : > { %1216 = vmatpush1.bf16.msra.mxu0 %v1810_v33 }
  0x5d   : > { %1217 = vmatprep.subr.bf16.mxu0 %v1815_v34 }
  0x5e   : > { %1711 = vmatpush3.bf16.msra.mxu1 %v1830_v13 }
  0x5f   : > { %1712 = vmatprep.subr.bf16.mxu1 %v1831_v14 }
  0x60   : > { %1218 = vmatpush1.bf16.msra.mxu0 %v1813_v35 }
  0x61   : > { %1219 = vmatprep.subr.bf16.mxu0 %v1818_v36 }
  0x62   : > { %1713 = vmatpush3.bf16.msra.mxu1 %v1832_v15 }
  0x63   : > { %1714 = vmatprep.subr.bf16.mxu1 %v1833_v16 }
  0x64   : > { %1220 = vmatpush1.bf16.msra.mxu0 %v1816_v37 }
  0x66   : > { %1715 = vmatpush3.bf16.msra.mxu1 %v1834_v17 }
  0xfa   : > { %v1628_v39 = vpop.f32.mrb[0].mxu0 }
  0xfb   : > { %v1650_v40 = vpop.f32.mrb[0].mxu1  ;;  %v1629_v42 = vpop.f32.mrb[1].mxu0 }
  0xfc   : > { %v1630_v43 = vadd.f32 %v1629_v42, %v1628_v39  ;;  %v1651_v44 = vpop.f32.mrb[1].mxu1  ;;  %v1631_v45 = vpop.f32.mrb[2].mxu0 }
  0xfd   : > { %v1652_v46 = vadd.f32 %v1651_v44, %v1650_v40  ;;  %v1653_v47 = vpop.f32.mrb[2].mxu1  ;;  %v1632_v48 = vpop.f32.mrb[3].mxu0 }
  0xfe   : > { %v935_v49 = vadd.f32 %v1630_v43, %v1504_v41  ;;  %v1654_v50 = vpop.f32.mrb[3].mxu1 }
 0x100   : > { %v975_v51 = vadd.f32 %v1652_v46, %v935_v49 }
 0x11a   : > { %v1672_v52 = vpop.f32.mrb[4].mxu0 }
 0x11b   : > { %v1694_v53 = vpop.f32.mrb[4].mxu1  ;;  %v1673_v54 = vpop.f32.mrb[5].mxu0 }
 0x11c   : > { %v1674_v55 = vadd.f32 %v1673_v54, %v1672_v52  ;;  %v1695_v56 = vpop.f32.mrb[5].mxu1  ;;  %v1675_v57 = vpop.f32.mrb[6].mxu0 }
 0x11d   : > { %v1696_v58 = vadd.f32 %v1695_v56, %v1694_v53  ;;  %v1697_v59 = vpop.f32.mrb[6].mxu1  ;;  %v1676_v60 = vpop.f32.mrb[7].mxu0 }
 0x11e   : > { %v1015_v61 = vadd.f32 %v1674_v55, %v975_v51  ;;  %v1698_v62 = vpop.f32.mrb[7].mxu1 }
 0x120   : > { %v1055_v63 = vadd.f32 %v1696_v58, %v1015_v61 }
 0x122   : > { %v1060_v0 = vmax.f32 %v1055_v63, 0.0 }
 0x124   : > { %v1113_v1 = vpack.c.bf16 %v1060_v0, %v1060_v0 }
 0x126   : > { %1238 = vmatmul.mubr.bf16.vlgmr.msra.gmra.mrb[8].mxu0 %v1113_v1  ;;  %v1078_v1 = vld [vmem:[%s2267_s6] sm:$0x3] }
 0x127   : > { %v1289_v3 = vrot.slane %v1078_v1, %v1117_v20  ;;  %v1293_v5 = vrot.slane %v1078_v1, %v1121_v22  ;;  %v1593_v20 = vld [vmem:[%s2270_s9] ss:$0 sm:$0xff] }
 0x1f9   : > { %v1239_v25 = vpop.f32.mrb[8].mxu0 }
 0x1fa   : > { %v1240_v26 = vadd.f32 %v1239_v25, %v1118_v23  ;;  %v1241_v27 = vpop.f32.mrb[9].mxu0 }
 0x1fb   : > { %v1242_v28 = vadd.f32 %v1241_v27, %v1122_v24  ;;  %v1243_v29 = vpop.f32.mrb[10].mxu0 }
 0x1fc   : > { %v1246_v30 = vrot.slane %v1240_v26, 4  ;;  %v1244_v31 = vpop.f32.mrb[11].mxu0 }
 0x1fd   : > { %v1252_v32 = vrot.slane %v1242_v28, 4 }
 0x1fe   : > { %v1247_v33 = vadd.f32 %v1246_v30, %v1240_v26 }
 0x1ff   : > { %v1253_v34 = vadd.f32 %v1252_v32, %v1242_v28 }
 0x200   : > { %v1248_v35 = vrot.slane %v1247_v33, 2 }
 0x201   : > { %v1254_v36 = vrot.slane %v1253_v34, 2 }
 0x202   : > { %v1249_v37 = vadd.f32 %v1248_v35, %v1247_v33 }
 0x203   : > { %v1255_v38 = vadd.f32 %v1254_v36, %v1253_v34 }
 0x204   : > { %v1250_v39 = vrot.slane %v1249_v37, 1 }
 0x205   : > { %v1256_v40 = vrot.slane %v1255_v38, 1 }
 0x206   : > { %v1251_v41 = vadd.f32 %v1250_v39, %v1249_v37 }
 0x207   : > { %v1257_v42 = vadd.f32 %v1256_v40, %v1255_v38 }
 0x208   : > { %v1259_v43 = vmul.f32 0.125, %v1251_v41 }
 0x209   : > { %v1260_v44 = vmul.f32 0.125, %v1257_v42 }
 0x20a   : > { %v1261_v45 = vsub.f32 %v1240_v26, %v1259_v43 }
 0x20b   : > { %v1262_v46 = vsub.f32 %v1242_v28, %v1260_v44 }
 0x20c   : > { %v1263_v47 = vmul.f32 %v1261_v45, %v1261_v45 }
 0x20d   : > { %v1264_v48 = vmul.f32 %v1262_v46, %v1262_v46 }
 0x20e   : > { %v1265_v49 = vrot.slane %v1263_v47, 4 }
 0x20f   : > { %v1271_v50 = vrot.slane %v1264_v48, 4 }
 0x210   : > { %v1266_v51 = vadd.f32 %v1265_v49, %v1263_v47 }
 0x211   : > { %v1272_v52 = vadd.f32 %v1271_v50, %v1264_v48 }
 0x212   : > { %v1267_v53 = vrot.slane %v1266_v51, 2 }
 0x213   : > { %v1273_v54 = vrot.slane %v1272_v52, 2 }
 0x214   : > { %v1268_v55 = vadd.f32 %v1267_v53, %v1266_v51 }
 0x215   : > { %v1274_v56 = vadd.f32 %v1273_v54, %v1272_v52 }
 0x216   : > { %v1269_v57 = vrot.slane %v1268_v55, 1 }
 0x217   : > { %v1275_v58 = vrot.slane %v1274_v56, 1 }
 0x218   : > { %v1270_v59 = vadd.f32 %v1269_v57, %v1268_v55 }
 0x219   : > { %v1276_v60 = vadd.f32 %v1275_v58, %v1274_v56 }
 0x21a   : > { %v1277_v61 = vmul.f32 0.125, %v1270_v59 }
 0x21b   : > { %v1278_v62 = vmul.f32 0.125, %v1276_v60 }
 0x21c   : > { %v1279_v63 = vadd.f32 1e-05, %v1277_v61 }
 0x21d   : > { %v1280_v0 = vadd.f32 1e-05, %v1278_v62 }
 0x21e   : > { %1835 = vrsqrt.f32 %v1279_v63 }
 0x21f   : > { %1837 = vrsqrt.f32 %v1280_v0 }
 0x228   : > { %v1836_v4 = vpop.eup %1835 }
 0x229   : > { %v1838_v6 = vpop.eup %1837  ;;  %v1283_v7 = vmul.f32 %v1836_v4, %v1261_v45 }
 0x22a   : > { %v1284_v9 = vmul.f32 %v1838_v6, %v1262_v46 }
 0x22b   : > { %v1296_v11 = vmul.f32 %v1289_v3, %v1283_v7 }
 0x22c   : > { %v1297_v12 = vmul.f32 %v1293_v5, %v1284_v9 }
 0x22d   : > { %v1309_v13 = vadd.f32 %v1302_v8, %v1296_v11 }
 0x22e   : > { %v1310_v14 = vadd.f32 %v1306_v10, %v1297_v12 }
 0x22f   : > { %v1311_v15 = vmax.f32 %v1309_v13, 0.0 }
 0x230   : > { %v1312_v16 = vmax.f32 %v1310_v14, 0.0 }
 0x231   : > { %v1313_v18 = vpack.c.bf16 %v1311_v15, %v1311_v15 }
 0x232   : > { %v1314_v17 = vpack.c.bf16 %v1312_v16, %v1312_v16 }
 0x234   : > { %1449 = vmatprep.mubr.bf16.mxu1 %v1314_v17 }
 0x235   : > { %1450 = vmatmul.mubr.bf16.vlgmr.msra.gmra.mrb[8].mxu1 %v1313_v18 }
 0x308   : > { %v1716_v19 = vpop.f32.mrb[8].mxu1 }
 0x309   : > { %v1717_v21 = vpop.f32.mrb[9].mxu1 }
 0x30a   : > { %v1718_v22 = vadd.f32 %v1717_v21, %v1716_v19  ;;  %v1719_v23 = vpop.f32.mrb[10].mxu1 }
 0x30b   : > { %v1720_v24 = vpop.f32.mrb[11].mxu1 }
 0x30c   : > { %v1452_v25 = vadd.f32 %v1718_v22, %v1593_v20 }
 0x30e   : > { %1457 = vst [vmem:[%s337_s20] sm:$0xff] %v1452_v25 }
 0x30f PF: > { %s20_s13 = sadd.s32 1, %s1845_s13  }
 0x310   : > { %p17_p4 = scmp.ge.s32.totalorder %s20_s13, 4  }
 0x312   :  { %19 = sbr.rel (!%p17_p4) target bundleno = 1 (0x1), region = 87 }

// kernel: byol_forward.2
= control target key start
LH: loop header
LB: loop body
LE: loop exit
PB: predicated region body
PF: predicated region fallthrough
CT: control target
= control target key end

     0   :  { %s2589_s21 = smov 0   ;;  %s3071_s0 = inlined_call_operand.vmem [shape: bf16[8,1024], index: 0, kind: input, shape index: {}]   ;;  %s3072_s1 = inlined_call_operand.vmem [shape: bf16[8,1024], index: 1, kind: input, shape index: {}]   ;;  %s3073_s2 = inlined_call_operand.vmem [shape: bf16[1024,128], index: 2, kind: input, shape index: {}]   ;;  %s3074_s3 = inlined_call_operand.vmem [shape: f32[1,128], index: 3, kind: input, shape index: {}]   ;;  %s3075_s4 = inlined_call_operand.vmem [shape: bf16[128,256], index: 4, kind: input, shape index: {}]   ;;  %s3076_s5 = inlined_call_operand.vmem [shape: f32[1,256], index: 5, kind: input, shape index: {}]   ;;  %s3077_s6 = inlined_call_operand.vmem [shape: f32[1,256], index: 6, kind: input, shape index: {}]   ;;  %s3078_s7 = inlined_call_operand.vmem [shape: f32[1,256], index: 7, kind: input, shape index: {}]   ;;  %s3079_s8 = inlined_call_operand.vmem [shape: bf16[256,128], index: 8, kind: input, shape index: {}]   ;;  %s3080_s9 = inlined_call_operand.vmem [shape: f32[1,128], index: 9, kind: input, shape index: {}]   ;;  %s3081_s10 = inlined_call_operand.vmem [shape: bf16[128,256], index: 10, kind: input, shape index: {}]   ;;  %s3082_s11 = inlined_call_operand.vmem [shape: f32[1,256], index: 11, kind: input, shape index: {}]   ;;  %s3083_s12 = inlined_call_operand.vmem [shape: f32[1,256], index: 12, kind: input, shape index: {}]   ;;  %s3084_s13 = inlined_call_operand.vmem [shape: f32[1,256], index: 13, kind: input, shape index: {}]   ;;  %s3085_s14 = inlined_call_operand.vmem [shape: bf16[256,128], index: 14, kind: input, shape index: {}]   ;;  %s3086_s15 = inlined_call_operand.vmem [shape: f32[1,128], index: 15, kind: input, shape index: {}]   ;;  %s3087_s16 = inlined_call_operand.vmem [shape: f32[16,128], index: 16, kind: output, shape index: {}]  }
   0x1   :  { %3089 = sst [smem:[#allocation2_spill]] %s3071_s0 }
   0x2 LB: > { %s2595_s22 = sadd.s32 4294967295, %s2501_s21   ;;  %p2059_p0 = scmp.ge.s32.totalorder %s2501_s21, 1  ;;  %s2501_s21 = sphi %s2589_s21, %s26_s21  }
   0x3   : > { %p452_p1 = scmp.lt.s32.totalorder %s2501_s21, 3 }
   0x5   : > { %p453_p2 = pnand %p2059_p0, %p452_p1 }
   0x6   : > { %v2343_v0 = vld [vmem:[%s3073_s2 + $0x40] sm:$0xff] (!%p453_p2)   ;;  %v2347_v4 = vld [vmem:[%s3073_s2 + $0x48] sm:$0xff] (!%p453_p2)   ;;  %v2351_v8 = vld [vmem:[%s3073_s2 + $0x50] sm:$0xff] (!%p453_p2)   ;;  %v509_v28 = vstv (!%p453_p2), %s2595_s22  ;;  %s3092_s24 = sld [smem:[#allocation2_spill]] (!%p453_p2)  ;;  %p496_p3 = scmp.lt.s32.totalorder (!%p453_p2), %s2595_s22, 1 }
   0x7   : > { %456 = sbr.rel (%p453_p2) target bundleno = 1274 (0x4fa), region = 84  ;;  %v2344_v1 = vld [vmem:[%s3073_s2 + $0xc0] sm:$0xff] (!%p453_p2)   ;;  %2202 = vmatprep.subr.bf16.mxu0 (!%p453_p2), %v2343_v0  ;;  %v2348_v5 = vld [vmem:[%s3073_s2 + $0xc8] sm:$0xff] (!%p453_p2)   ;;  %v2352_v9 = vld [vmem:[%s3073_s2 + $0xd0] sm:$0xff] (!%p453_p2)   ;;  %vm2693_vm0 = vcmp.eq.s32.totalorder (!%p453_p2), %v509_v28, 0 }
   0x8   : > { %v2345_v2 = vld [vmem:[%s3073_s2] sm:$0xff] (!%p453_p2)   ;;  %2224 = vmatprep.subr.bf16.mxu1 (!%p453_p2), %v2344_v1  ;;  %v2349_v6 = vld [vmem:[%s3073_s2 + $0x8] sm:$0xff] (!%p453_p2)   ;;  %v2353_v10 = vld [vmem:[%s3073_s2 + $0x10] sm:$0xff] (!%p453_p2)  }
   0x9   : > { %v2346_v3 = vld [vmem:[%s3073_s2 + $0x80] sm:$0xff] (!%p453_p2)   ;;  %2203 = vmatpush3.bf16.msra.mxu0 (!%p453_p2), %v2345_v2  ;;  %v2350_v7 = vld [vmem:[%s3073_s2 + $0x88] sm:$0xff] (!%p453_p2)   ;;  %v2354_v11 = vld [vmem:[%s3073_s2 + $0x90] sm:$0xff] (!%p453_p2)  }
   0xa   : > { %2225 = vmatpush3.bf16.msra.mxu1 (!%p453_p2), %v2346_v3  ;;  %2204 = vmatprep.subr.bf16.mxu0 (!%p453_p2), %v2347_v4  ;;  %v2355_v12 = vld [vmem:[%s3073_s2 + $0x58] sm:$0xff] (!%p453_p2)   ;;  %v2359_v16 = vld [vmem:[%s3073_s2 + $0x60] sm:$0xff] (!%p453_p2)   ;;  %v2363_v20 = vld [vmem:[%s3073_s2 + $0x68] sm:$0xff] (!%p453_p2)  }
   0xb   : > { %2226 = vmatprep.subr.bf16.mxu1 (!%p453_p2), %v2348_v5  ;;  %v2356_v13 = vld [vmem:[%s3073_s2 + $0xd8] sm:$0xff] (!%p453_p2)   ;;  %v2360_v17 = vld [vmem:[%s3073_s2 + $0xe0] sm:$0xff] (!%p453_p2)   ;;  %v2364_v21 = vld [vmem:[%s3073_s2 + $0xe8] sm:$0xff] (!%p453_p2)  }
   0xc   : > { %v2357_v14 = vld [vmem:[%s3073_s2 + $0x18] sm:$0xff] (!%p453_p2)   ;;  %v2361_v18 = vld [vmem:[%s3073_s2 + $0x20] sm:$0xff] (!%p453_p2)   ;;  %v2365_v22 = vld [vmem:[%s3073_s2 + $0x28] sm:$0xff] (!%p453_p2)  }
   0xd   : > { %2205 = vmatpush3.bf16.msra.mxu0 (!%p453_p2), %v2349_v6  ;;  %v2358_v15 = vld [vmem:[%s3073_s2 + $0x98] sm:$0xff] (!%p453_p2)   ;;  %v2362_v19 = vld [vmem:[%s3073_s2 + $0xa0] sm:$0xff] (!%p453_p2)   ;;  %v2366_v23 = vld [vmem:[%s3073_s2 + $0xa8] sm:$0xff] (!%p453_p2)  }
   0xe   : > { %2227 = vmatpush3.bf16.msra.mxu1 %v2350_v7  ;;  %2206 = vmatprep.subr.bf16.mxu0 %v2351_v8  ;;  %v2367_v24 = vld [vmem:[%s3073_s2 + $0x70] sm:$0xff]   ;;  %v2371_v29 = vld [vmem:[%s3073_s2 + $0x78] sm:$0xff]   ;;  %v501_v34 = vld [vmem:[%s3092_s24] sm:$0xff]  ;;  %s3094_s22 = smov (!%p496_p3, %s2595_s22), 1 }
   0xf   : > { %2228 = vmatprep.subr.bf16.mxu1 %v2352_v9  ;;  %v2368_v25 = vld [vmem:[%s3073_s2 + $0xf0] sm:$0xff]   ;;  %v2372_v30 = vld [vmem:[%s3073_s2 + $0xf8] sm:$0xff]   ;;  %v505_v35 = vld [vmem:[%s3072_s1] sm:$0xff]  ;;  %s2060_s0 = sshll.u32 %s3094_s22, 3 }
  0x10   : > { %v2369_v26 = vld [vmem:[%s3073_s2 + $0x30] sm:$0xff]   ;;  %v2373_v31 = vld [vmem:[%s3073_s2 + $0x38] sm:$0xff]   ;;  %v502_v36 = vld [vmem:[%s3092_s24 + $0x8] sm:$0xff]  ;;  %v511_v37 = vsel %vm2693_vm0, %v501_v34, %v505_v35  ;;  %s499_s23 = scalar_lea.vmem %s3087_s16, %s2060_s0 }
  0x11   : > { %2207 = vmatpush3.bf16.msra.mxu0 %v2353_v10  ;;  %v2370_v27 = vld [vmem:[%s3073_s2 + $0xb0] sm:$0xff]   ;;  %v2374_v33 = vld [vmem:[%s3073_s2 + $0xb8] sm:$0xff]   ;;  %v506_v38 = vld [vmem:[%s3072_s1 + $0x8] sm:$0xff]  ;;  %v2062_v39 = vcombine.low %v511_v37, %v511_v37  ;;  %v2063_v40 = vcombine.high %v511_v37, %v511_v37 }
  0x12   : > { %2229 = vmatpush3.bf16.msra.mxu1 %v2354_v11  ;;  %2208 = vmatprep.subr.bf16.mxu0 %v2355_v12  ;;  %v512_v41 = vsel %vm2693_vm0, %v502_v36, %v506_v38  ;;  %v2375_v42 = vld [vmem:[%s3073_s2 + $0x140] sm:$0xff]   ;;  %v2379_v48 = vld [vmem:[%s3073_s2 + $0x148] sm:$0xff]   ;;  %v2383_v52 = vld [vmem:[%s3073_s2 + $0x150] sm:$0xff]   ;;  %v2503_v38 = vmov 0  }
  0x13   : > { %2230 = vmatprep.subr.bf16.mxu1 %v2356_v13  ;;  %v2064_v43 = vcombine.low %v512_v41, %v512_v41  ;;  %v2065_v44 = vcombine.high %v512_v41, %v512_v41  ;;  %v2376_v45 = vld [vmem:[%s3073_s2 + $0x1c0] sm:$0xff]   ;;  %1094 = vmatprep.mubr.bf16.mxu0 %v2063_v40  ;;  %v2380_v49 = vld [vmem:[%s3073_s2 + $0x1c8] sm:$0xff]   ;;  %v2384_v53 = vld [vmem:[%s3073_s2 + $0x1d0] sm:$0xff]  }
  0x14   : > { %v2377_v46 = vld [vmem:[%s3073_s2 + $0x100] sm:$0xff]   ;;  %v2381_v50 = vld [vmem:[%s3073_s2 + $0x108] sm:$0xff]   ;;  %v2385_v54 = vld [vmem:[%s3073_s2 + $0x110] sm:$0xff]  }
  0x15   : > { %2209 = vmatpush3.bf16.msra.mxu0 %v2357_v14  ;;  %1134 = vmatprep.mubr.bf16.mxu1 %v2065_v44  ;;  %v2378_v47 = vld [vmem:[%s3073_s2 + $0x180] sm:$0xff]   ;;  %v2382_v51 = vld [vmem:[%s3073_s2 + $0x188] sm:$0xff]   ;;  %v2386_v55 = vld [vmem:[%s3073_s2 + $0x190] sm:$0xff]  }
  0x16   : > { %2231 = vmatpush3.bf16.msra.mxu1 %v2358_v15  ;;  %2210 = vmatprep.subr.bf16.mxu0 %v2359_v16  ;;  %v2387_v56 = vld [vmem:[%s3073_s2 + $0x158] sm:$0xff]   ;;  %v2391_v60 = vld [vmem:[%s3073_s2 + $0x160] sm:$0xff]   ;;  %v2395_v0 = vld [vmem:[%s3073_s2 + $0x168] sm:$0xff]  }
  0x17   : > { %2232 = vmatprep.subr.bf16.mxu1 %v2360_v17  ;;  %v2388_v57 = vld [vmem:[%s3073_s2 + $0x1d8] sm:$0xff]   ;;  %v2392_v61 = vld [vmem:[%s3073_s2 + $0x1e0] sm:$0xff]   ;;  %v2396_v1 = vld [vmem:[%s3073_s2 + $0x1e8] sm:$0xff]  }
  0x18   : > { %v2389_v58 = vld [vmem:[%s3073_s2 + $0x118] sm:$0xff]   ;;  %v2393_v62 = vld [vmem:[%s3073_s2 + $0x120] sm:$0xff]   ;;  %v2397_v2 = vld [vmem:[%s3073_s2 + $0x128] sm:$0xff]  }
  0x19   : > { %2211 = vmatpush3.bf16.msra.mxu0 %v2361_v18  ;;  %v2390_v59 = vld [vmem:[%s3073_s2 + $0x198] sm:$0xff]   ;;  %v2394_v63 = vld [vmem:[%s3073_s2 + $0x1a0] sm:$0xff]   ;;  %v2398_v3 = vld [vmem:[%s3073_s2 + $0x1a8] sm:$0xff]  }
  0x1a   : > { %2233 = vmatpush3.bf16.msra.mxu1 %v2362_v19  ;;  %2212 = vmatprep.subr.bf16.mxu0 %v2363_v20  ;;  %v2399_v4 = vld [vmem:[%s3073_s2 + $0x170] sm:$0xff]   ;;  %v2403_v8 = vld [vmem:[%s3073_s2 + $0x178] sm:$0xff]   ;;  %v2427_v34 = vld [vmem:[%s3075_s4 + $0x64] ss:$8 sps:$4 sm:$0xff]  }
  0x1b   : > { %2234 = vmatprep.subr.bf16.mxu1 %v2364_v21  ;;  %v2400_v5 = vld [vmem:[%s3073_s2 + $0x1f0] sm:$0xff]   ;;  %v2404_v9 = vld [vmem:[%s3073_s2 + $0x1f8] sm:$0xff]   ;;  %v2425_v35 = vld [vmem:[%s3075_s4 + $0x60] ss:$8 sps:$4 sm:$0xff]  }
  0x1c   : > { %v2401_v6 = vld [vmem:[%s3073_s2 + $0x130] sm:$0xff]   ;;  %v2405_v10 = vld [vmem:[%s3073_s2 + $0x138] sm:$0xff]   ;;  %v2061_v41 = vld [vmem:[%s3074_s3] ss:$0 sm:$0xff] }
  0x1d   : > { %2213 = vmatpush3.bf16.msra.mxu0 %v2365_v22  ;;  %v2402_v7 = vld [vmem:[%s3073_s2 + $0x1b0] sm:$0xff]   ;;  %v2406_v11 = vld [vmem:[%s3073_s2 + $0x1b8] sm:$0xff]   ;;  %v2407_v22 = vld [vmem:[%s3075_s4] ss:$8 sps:$4 sm:$0xff]  }
  0x1e   : > { %2235 = vmatpush3.bf16.msra.mxu1 %v2366_v23  ;;  %2214 = vmatprep.subr.bf16.mxu0 %v2367_v24  ;;  %v503_v12 = vld [vmem:[%s3092_s24 + $0x10] sm:$0xff]  ;;  %v504_v15 = vld [vmem:[%s3092_s24 + $0x18] sm:$0xff]  ;;  %v2409_v23 = vld [vmem:[%s3075_s4 + $0x4] ss:$8 sps:$4 sm:$0xff]  }
  0x1f   : > { %2236 = vmatprep.subr.bf16.mxu1 %v2368_v25  ;;  %v507_v13 = vld [vmem:[%s3072_s1 + $0x10] sm:$0xff]  ;;  %v508_v16 = vld [vmem:[%s3072_s1 + $0x18] sm:$0xff] }
  0x20   : > { %v513_v14 = vsel %vm2693_vm0, %v503_v12, %v507_v13  ;;  %v514_v19 = vsel %vm2693_vm0, %v504_v15, %v508_v16  ;;  %v2412_v24 = vld [vmem:[%s3075_s4 + $0x14] ss:$8 sps:$4 sm:$0xff]   ;;  %v2410_v25 = vld [vmem:[%s3075_s4 + $0x10] ss:$8 sps:$4 sm:$0xff]   ;;  %v2441_v12 = vld [vmem:[%s3079_s8 + $0x68] sm:$0xff]  }
  0x21   : > { %2215 = vmatpush3.bf16.msra.mxu0 %v2369_v26  ;;  %v2066_v17 = vcombine.low %v513_v14, %v513_v14  ;;  %v2067_v18 = vcombine.high %v513_v14, %v513_v14  ;;  %v2068_v20 = vcombine.low %v514_v19, %v514_v19  ;;  %v2069_v21 = vcombine.high %v514_v19, %v514_v19  ;;  %v2415_v26 = vld [vmem:[%s3075_s4 + $0x24] ss:$8 sps:$4 sm:$0xff]   ;;  %v2418_v28 = vld [vmem:[%s3075_s4 + $0x34] ss:$8 sps:$4 sm:$0xff]   ;;  %v2428_v37 = vld [vmem:[%s3075_s4 + $0x70] ss:$8 sps:$4 sm:$0xff]  }
  0x22   : > { %2237 = vmatpush3.bf16.msra.mxu1 %v2370_v27  ;;  %2216 = vmatprep.subr.bf16.mxu0 %v2371_v29  ;;  %v2413_v27 = vld [vmem:[%s3075_s4 + $0x20] ss:$8 sps:$4 sm:$0xff]   ;;  %v2416_v29 = vld [vmem:[%s3075_s4 + $0x30] ss:$8 sps:$4 sm:$0xff]   ;;  %v2424_v32 = vld [vmem:[%s3075_s4 + $0x54] ss:$8 sps:$4 sm:$0xff]  }
  0x23   : > { %2238 = vmatprep.subr.bf16.mxu1 %v2372_v30  ;;  %v2421_v30 = vld [vmem:[%s3075_s4 + $0x44] ss:$8 sps:$4 sm:$0xff]   ;;  %v2430_v36 = vld [vmem:[%s3075_s4 + $0x74] ss:$8 sps:$4 sm:$0xff]  }
  0x24   : > { %v2442_v13 = vld [vmem:[%s3079_s8 + $0x28] sm:$0xff]   ;;  %v2443_v14 = vld [vmem:[%s3079_s8 + $0x70] sm:$0xff]   ;;  %v2445_v16 = vld [vmem:[%s3079_s8 + $0x78] sm:$0xff]  }
  0x25   : > { %2217 = vmatpush3.bf16.msra.mxu0 %v2373_v31  ;;  %v2419_v31 = vld [vmem:[%s3075_s4 + $0x40] ss:$8 sps:$4 sm:$0xff]   ;;  %v2444_v15 = vld [vmem:[%s3079_s8 + $0x30] sm:$0xff]   ;;  %v2449_v19 = vld [vmem:[%s3081_s10 + $0x4] ss:$8 sps:$4 sm:$0xff]  }
  0x26   : > { %2239 = vmatpush3.bf16.msra.mxu1 %v2374_v33  ;;  %2246 = vmatprep.subr.bf16.mxu0 %v2375_v42  ;;  %v2422_v33 = vld [vmem:[%s3075_s4 + $0x50] ss:$8 sps:$4 sm:$0xff]  }
  0x27   : > { %2268 = vmatprep.subr.bf16.mxu1 %v2376_v45 }
  0x28   : > { %1095 = vmatmul.mubr.bf16.vlgmr.msra.gmra.mrb[0].mxu0 %v2062_v39 }
  0x29   : > { %1135 = vmatmul.mubr.bf16.vlgmr.msra.gmra.mrb[0].mxu1 %v2064_v43  ;;  %2247 = vmatpush3.bf16.msra.mxu0 %v2377_v46 }
  0x2a   : > { %2269 = vmatpush3.bf16.msra.mxu1 %v2378_v47  ;;  %2248 = vmatprep.subr.bf16.mxu0 %v2379_v48 }
  0x2b   : > { %2270 = vmatprep.subr.bf16.mxu1 %v2380_v49  ;;  %1174 = vmatprep.mubr.bf16.mxu0 %v2067_v18  ;;  %v2447_v18 = vld [vmem:[%s3081_s10] ss:$8 sps:$4 sm:$0xff]  }
  0x2c   : > { %1214 = vmatprep.mubr.bf16.mxu1 %v2069_v21  ;;  %v2450_v21 = vld [vmem:[%s3081_s10 + $0x10] ss:$8 sps:$4 sm:$0xff]  }
  0x2d   : > { %2249 = vmatpush3.bf16.msra.mxu0 %v2381_v50 }
  0x2e   : > { %2271 = vmatpush3.bf16.msra.mxu1 %v2382_v51  ;;  %2250 = vmatprep.subr.bf16.mxu0 %v2383_v52 }
  0x2f   : > { %2272 = vmatprep.subr.bf16.mxu1 %v2384_v53 }
  0x31   : > { %2251 = vmatpush3.bf16.msra.mxu0 %v2385_v54 }
  0x32   : > { %2273 = vmatpush3.bf16.msra.mxu1 %v2386_v55  ;;  %2252 = vmatprep.subr.bf16.mxu0 %v2387_v56 }
  0x33   : > { %2274 = vmatprep.subr.bf16.mxu1 %v2388_v57 }
  0x35   : > { %2253 = vmatpush3.bf16.msra.mxu0 %v2389_v58 }
  0x36   : > { %2275 = vmatpush3.bf16.msra.mxu1 %v2390_v59  ;;  %2254 = vmatprep.subr.bf16.mxu0 %v2391_v60 }
  0x37   : > { %2276 = vmatprep.subr.bf16.mxu1 %v2392_v61 }
  0x39   : > { %2255 = vmatpush3.bf16.msra.mxu0 %v2393_v62 }
  0x3a   : > { %2277 = vmatpush3.bf16.msra.mxu1 %v2394_v63  ;;  %2256 = vmatprep.subr.bf16.mxu0 %v2395_v0 }
  0x3b   : > { %2278 = vmatprep.subr.bf16.mxu1 %v2396_v1 }
  0x3d   : > { %2257 = vmatpush3.bf16.msra.mxu0 %v2397_v2  ;;  %v2431_v2 = vld [vmem:[%s3079_s8 + $0x40] sm:$0xff]  }
  0x3e   : > { %2279 = vmatpush3.bf16.msra.mxu1 %v2398_v3  ;;  %2258 = vmatprep.subr.bf16.mxu0 %v2399_v4  ;;  %v2432_v3 = vld [vmem:[%s3079_s8] sm:$0xff]   ;;  %v2433_v4 = vld [vmem:[%s3079_s8 + $0x48] sm:$0xff]  }
  0x3f   : > { %2280 = vmatprep.subr.bf16.mxu1 %v2400_v5  ;;  %v2434_v5 = vld [vmem:[%s3079_s8 + $0x8] sm:$0xff]  }
  0x41   : > { %2259 = vmatpush3.bf16.msra.mxu0 %v2401_v6  ;;  %v2435_v6 = vld [vmem:[%s3079_s8 + $0x50] sm:$0xff]  }
  0x42   : > { %2281 = vmatpush3.bf16.msra.mxu1 %v2402_v7  ;;  %2260 = vmatprep.subr.bf16.mxu0 %v2403_v8  ;;  %v2436_v7 = vld [vmem:[%s3079_s8 + $0x10] sm:$0xff]   ;;  %v2437_v8 = vld [vmem:[%s3079_s8 + $0x58] sm:$0xff]  }
  0x43   : > { %2282 = vmatprep.subr.bf16.mxu1 %v2404_v9  ;;  %v2438_v9 = vld [vmem:[%s3079_s8 + $0x18] sm:$0xff]  }
  0x45   : > { %2261 = vmatpush3.bf16.msra.mxu0 %v2405_v10  ;;  %v2439_v10 = vld [vmem:[%s3079_s8 + $0x60] sm:$0xff]  }
  0x46   : > { %2283 = vmatpush3.bf16.msra.mxu1 %v2406_v11  ;;  %1367 = vmatprep.subr.bf16.mxu0 %v2409_v23  ;;  %v2440_v11 = vld [vmem:[%s3079_s8 + $0x20] sm:$0xff]  }
  0x47   : > { %2290 = vmatprep.subr.bf16.mxu1 %v2431_v2  ;;  %v2453_v23 = vld [vmem:[%s3081_s10 + $0x20] ss:$8 sps:$4 sm:$0xff]  }
  0x48   : > { %1175 = vmatmul.mubr.bf16.vlgmr.msra.gmra.mrb[4].mxu0 %v2066_v17  ;;  %v2446_v17 = vld [vmem:[%s3079_s8 + $0x38] sm:$0xff]  }
  0x49   : > { %1215 = vmatmul.mubr.bf16.vlgmr.msra.gmra.mrb[4].mxu1 %v2068_v20  ;;  %1368 = vmatpush1.bf16.msra.mxu0 %v2407_v22  ;;  %v2452_v20 = vld [vmem:[%s3081_s10 + $0x14] ss:$8 sps:$4 sm:$0xff]   ;;  %v2455_v22 = vld [vmem:[%s3081_s10 + $0x24] ss:$8 sps:$4 sm:$0xff]  }
  0x4a   : > { %1369 = vmatprep.subr.bf16.mxu0 %v2412_v24  ;;  %1399 = vmatprep.mubr.bf16.mxu0 %v2503_v38  ;;  %v2458_v24 = vld [vmem:[%s3081_s10 + $0x34] ss:$8 sps:$4 sm:$0xff]  }
  0x4b   : > { %2291 = vmatpush3.bf16.msra.mxu1 %v2432_v3 }
  0x4c   : > { %2292 = vmatprep.subr.bf16.mxu1 %v2433_v4 }
  0x4d   : > { %1370 = vmatpush1.bf16.msra.mxu0 %v2410_v25  ;;  %v2456_v25 = vld [vmem:[%s3081_s10 + $0x30] ss:$8 sps:$4 sm:$0xff]  }
  0x4e   : > { %1371 = vmatprep.subr.bf16.mxu0 %v2415_v26  ;;  %v2461_v26 = vld [vmem:[%s3081_s10 + $0x44] ss:$8 sps:$4 sm:$0xff]  }
  0x4f   : > { %2293 = vmatpush3.bf16.msra.mxu1 %v2434_v5 }
  0x50   : > { %2294 = vmatprep.subr.bf16.mxu1 %v2435_v6 }
  0x51   : > { %1372 = vmatpush1.bf16.msra.mxu0 %v2413_v27  ;;  %v2459_v27 = vld [vmem:[%s3081_s10 + $0x40] ss:$8 sps:$4 sm:$0xff]  }
  0x52   : > { %1373 = vmatprep.subr.bf16.mxu0 %v2418_v28  ;;  %v2464_v28 = vld [vmem:[%s3081_s10 + $0x54] ss:$8 sps:$4 sm:$0xff]  }
  0x53   : > { %2295 = vmatpush3.bf16.msra.mxu1 %v2436_v7 }
  0x54   : > { %2296 = vmatprep.subr.bf16.mxu1 %v2437_v8 }
  0x55   : > { %1374 = vmatpush1.bf16.msra.mxu0 %v2416_v29  ;;  %v2462_v29 = vld [vmem:[%s3081_s10 + $0x50] ss:$8 sps:$4 sm:$0xff]  }
  0x56   : > { %1375 = vmatprep.subr.bf16.mxu0 %v2421_v30  ;;  %v1277_v30 = vlaneseq }
  0x57   : > { %2297 = vmatpush3.bf16.msra.mxu1 %v2438_v9 }
  0x58   : > { %2298 = vmatprep.subr.bf16.mxu1 %v2439_v10 }
  0x59   : > { %1376 = vmatpush1.bf16.msra.mxu0 %v2419_v31  ;;  %v1278_v31 = vshrl.u32 %v1277_v30, 7 }
  0x5a   : > { %1377 = vmatprep.subr.bf16.mxu0 %v2424_v32 }
  0x5b   : > { %2299 = vmatpush3.bf16.msra.mxu1 %v2440_v11  ;;  %v2963_v32 = vsub.s32 0, %v1278_v31 }
  0x5c   : > { %2300 = vmatprep.subr.bf16.mxu1 %v2441_v12 }
  0x5d   : > { %1378 = vmatpush1.bf16.msra.mxu0 %v2422_v33  ;;  %v1239_v33 = vld [vmem:[%s3076_s5] sm:$0x3] }
  0x5e   : > { %1379 = vmatprep.subr.bf16.mxu0 %v2427_v34  ;;  %v2968_v34 = vsub.s32 1, %v1278_v31  ;;  %v2467_v31 = vld [vmem:[%s3081_s10 + $0x64] ss:$8 sps:$4 sm:$0xff]  }
  0x5f   : > { %2301 = vmatpush3.bf16.msra.mxu1 %v2442_v13  ;;  %v1240_v13 = vld [vmem:[%s3077_s6] sm:$0x3] }
  0x60   : > { %2302 = vmatprep.subr.bf16.mxu1 %v2443_v14  ;;  %v1241_v14 = vld [vmem:[%s3078_s7] sm:$0x3] }
  0x61   : > { %1380 = vmatpush1.bf16.msra.mxu0 %v2425_v35  ;;  %v1280_v35 = vrot.slane %v1239_v33, %v2963_v32 }
  0x62   : > { %1381 = vmatprep.subr.bf16.mxu0 %v2430_v36  ;;  %v1284_v36 = vrot.slane %v1239_v33, %v2968_v34  ;;  %v2465_v33 = vld [vmem:[%s3081_s10 + $0x60] ss:$8 sps:$4 sm:$0xff]  }
  0x63   : > { %2303 = vmatpush3.bf16.msra.mxu1 %v2444_v15  ;;  %v1451_v15 = vrot.slane %v1240_v13, %v2963_v32 }
  0x64   : > { %2304 = vmatprep.subr.bf16.mxu1 %v2445_v16 }
  0x65   : > { %1382 = vmatpush1.bf16.msra.mxu0 %v2428_v37 }
  0x66   : > { %1763 = vmatprep.subr.bf16.mxu0 %v2449_v19 }
  0x67   : > { %2305 = vmatpush3.bf16.msra.mxu1 %v2446_v17  ;;  %v1455_v17 = vrot.slane %v1240_v13, %v2968_v34 }
  0xfb   : > { %v2218_v39 = vpop.f32.mrb[0].mxu0 }
  0xfc   : > { %v2240_v40 = vpop.f32.mrb[0].mxu1  ;;  %v2219_v42 = vpop.f32.mrb[1].mxu0 }
  0xfd   : > { %v2220_v43 = vadd.f32 %v2219_v42, %v2218_v39  ;;  %v2241_v44 = vpop.f32.mrb[1].mxu1  ;;  %v2221_v45 = vpop.f32.mrb[2].mxu0 }
  0xfe   : > { %v2242_v46 = vadd.f32 %v2241_v44, %v2240_v40  ;;  %v2243_v47 = vpop.f32.mrb[2].mxu1  ;;  %v2222_v48 = vpop.f32.mrb[3].mxu0 }
  0xff   : > { %v1097_v49 = vadd.f32 %v2220_v43, %v2061_v41  ;;  %v2244_v50 = vpop.f32.mrb[3].mxu1 }
 0x101   : > { %v1137_v51 = vadd.f32 %v2242_v46, %v1097_v49 }
 0x11b   : > { %v2262_v52 = vpop.f32.mrb[4].mxu0 }
 0x11c   : > { %v2284_v53 = vpop.f32.mrb[4].mxu1  ;;  %v2263_v54 = vpop.f32.mrb[5].mxu0 }
 0x11d   : > { %v2264_v55 = vadd.f32 %v2263_v54, %v2262_v52  ;;  %v2285_v56 = vpop.f32.mrb[5].mxu1  ;;  %v2265_v57 = vpop.f32.mrb[6].mxu0 }
 0x11e   : > { %v2286_v58 = vadd.f32 %v2285_v56, %v2284_v53  ;;  %v2287_v59 = vpop.f32.mrb[6].mxu1  ;;  %v2266_v60 = vpop.f32.mrb[7].mxu0 }
 0x11f   : > { %v1177_v61 = vadd.f32 %v2264_v55, %v1137_v51  ;;  %v2288_v62 = vpop.f32.mrb[7].mxu1 }
 0x121   : > { %v1217_v63 = vadd.f32 %v2286_v58, %v1177_v61 }
 0x123   : > { %v1222_v0 = vmax.f32 %v1217_v63, 0.0 }
 0x125   : > { %v1275_v1 = vpack.c.bf16 %v1222_v0, %v1222_v0 }
 0x127   : > { %1400 = vmatmul.mubr.bf16.vlgmr.msra.gmra.mrb[8].mxu0 %v1275_v1 }
 0x128   : > { %1795 = vmatprep.mubr.bf16.mxu0 %v2503_v38  ;;  %1764 = vmatpush1.bf16.msra.mxu0 %v2447_v18 }
 0x129   : > { %1765 = vmatprep.subr.bf16.mxu0 %v2452_v20  ;;  %v1464_v20 = vrot.slane %v1241_v14, %v2963_v32 }
 0x12c   : > { %1766 = vmatpush1.bf16.msra.mxu0 %v2450_v21 }
 0x12d   : > { %1767 = vmatprep.subr.bf16.mxu0 %v2455_v22  ;;  %v1468_v22 = vrot.slane %v1241_v14, %v2968_v34 }
 0x130   : > { %1768 = vmatpush1.bf16.msra.mxu0 %v2453_v23 }
 0x131   : > { %1769 = vmatprep.subr.bf16.mxu0 %v2458_v24 }
 0x134   : > { %1770 = vmatpush1.bf16.msra.mxu0 %v2456_v25 }
 0x135   : > { %1771 = vmatprep.subr.bf16.mxu0 %v2461_v26 }
 0x138   : > { %1772 = vmatpush1.bf16.msra.mxu0 %v2459_v27 }
 0x139   : > { %1773 = vmatprep.subr.bf16.mxu0 %v2464_v28 }
 0x13c   : > { %1774 = vmatpush1.bf16.msra.mxu0 %v2462_v29 }
 0x13d   : > { %1775 = vmatprep.subr.bf16.mxu0 %v2467_v31 }
 0x140   : > { %1776 = vmatpush1.bf16.msra.mxu0 %v2465_v33 }
 0x1fa   : > { %v1401_v37 = vpop.f32.mrb[8].mxu0 }
 0x1fb   : > { %v1402_v38 = vadd.f32 %v1401_v37, %v1280_v35  ;;  %v1403_v39 = vpop.f32.mrb[9].mxu0  ;;  %v2470_v35 = vld [vmem:[%s3081_s10 + $0x74] ss:$8 sps:$4 sm:$0xff]  }
 0x1fc   : > { %v1404_v40 = vadd.f32 %v1403_v39, %v1284_v36  ;;  %v1405_v41 = vpop.f32.mrb[10].mxu0  ;;  %v2468_v36 = vld [vmem:[%s3081_s10 + $0x70] ss:$8 sps:$4 sm:$0xff]   ;;  %1777 = vmatprep.subr.bf16.mxu0 %v2470_v35 }
 0x1fd   : > { %v1408_v42 = vrot.slane %v1402_v38, 4  ;;  %v1406_v43 = vpop.f32.mrb[11].mxu0  ;;  %1778 = vmatpush1.bf16.msra.mxu0 %v2468_v36 }
 0x1fe   : > { %v1414_v44 = vrot.slane %v1404_v40, 4 }
 0x1ff   : > { %v1409_v45 = vadd.f32 %v1408_v42, %v1402_v38 }
 0x200   : > { %v1415_v46 = vadd.f32 %v1414_v44, %v1404_v40 }
 0x201   : > { %v1410_v47 = vrot.slane %v1409_v45, 2 }
 0x202   : > { %v1416_v48 = vrot.slane %v1415_v46, 2 }
 0x203   : > { %v1411_v49 = vadd.f32 %v1410_v47, %v1409_v45  ;;  %v2471_v45 = vld [vmem:[%s3085_s14 + $0x40] sm:$0xff]   ;;  %v2473_v47 = vld [vmem:[%s3085_s14 + $0x48] sm:$0xff]  }
 0x204   : > { %v1417_v50 = vadd.f32 %v1416_v48, %v1415_v46  ;;  %v2472_v46 = vld [vmem:[%s3085_s14] sm:$0xff]   ;;  %2312 = vmatprep.subr.bf16.mxu1 %v2471_v45  ;;  %v2474_v48 = vld [vmem:[%s3085_s14 + $0x8] sm:$0xff]  }
 0x205   : > { %v1412_v51 = vrot.slane %v1411_v49, 1 }
 0x206   : > { %v1418_v52 = vrot.slane %v1417_v50, 1 }
 0x207   : > { %v1413_v53 = vadd.f32 %v1412_v51, %v1411_v49  ;;  %v2475_v49 = vld [vmem:[%s3085_s14 + $0x50] sm:$0xff]   ;;  %v2477_v51 = vld [vmem:[%s3085_s14 + $0x58] sm:$0xff]  }
 0x208   : > { %v1419_v54 = vadd.f32 %v1418_v52, %v1417_v50  ;;  %v2476_v50 = vld [vmem:[%s3085_s14 + $0x10] sm:$0xff]   ;;  %v2478_v52 = vld [vmem:[%s3085_s14 + $0x18] sm:$0xff]  }
 0x209   : > { %v1421_v55 = vmul.f32 0.125, %v1413_v53  ;;  %v2479_v53 = vld [vmem:[%s3085_s14 + $0x60] sm:$0xff]  }
 0x20a   : > { %v1422_v56 = vmul.f32 0.125, %v1419_v54  ;;  %v2480_v54 = vld [vmem:[%s3085_s14 + $0x20] sm:$0xff]  }
 0x20b   : > { %v1423_v57 = vsub.f32 %v1402_v38, %v1421_v55  ;;  %v2150_v38 = vld [vmem:[%s3080_s9] ss:$0 sm:$0xff]  ;;  %v2481_v55 = vld [vmem:[%s3085_s14 + $0x68] sm:$0xff]  }
 0x20c   : > { %v1424_v58 = vsub.f32 %v1404_v40, %v1422_v56  ;;  %v2482_v56 = vld [vmem:[%s3085_s14 + $0x28] sm:$0xff]  }
 0x20d   : > { %v1425_v59 = vmul.f32 %v1423_v57, %v1423_v57 }
 0x20e   : > { %v1426_v60 = vmul.f32 %v1424_v58, %v1424_v58 }
 0x20f   : > { %v1427_v61 = vrot.slane %v1425_v59, 4 }
 0x210   : > { %v1433_v62 = vrot.slane %v1426_v60, 4 }
 0x211   : > { %v1428_v63 = vadd.f32 %v1427_v61, %v1425_v59  ;;  %v2485_v59 = vld [vmem:[%s3085_s14 + $0x78] sm:$0xff]   ;;  %v1635_v61 = vld [vmem:[%s3082_s11] sm:$0x3] }
 0x212   : > { %v1434_v0 = vadd.f32 %v1433_v62, %v1426_v60  ;;  %v2486_v60 = vld [vmem:[%s3085_s14 + $0x38] sm:$0xff]   ;;  %v1676_v62 = vrot.slane %v1635_v61, %v2963_v32 }
 0x213   : > { %v1429_v1 = vrot.slane %v1428_v63, 2 }
 0x214   : > { %v1435_v2 = vrot.slane %v1434_v0, 2 }
 0x215   : > { %v1430_v3 = vadd.f32 %v1429_v1, %v1428_v63  ;;  %v1680_v63 = vrot.slane %v1635_v61, %v2968_v34 }
 0x216   : > { %v1436_v4 = vadd.f32 %v1435_v2, %v1434_v0 }
 0x217   : > { %v1431_v5 = vrot.slane %v1430_v3, 1 }
 0x218   : > { %v1437_v6 = vrot.slane %v1436_v4, 1 }
 0x219   : > { %v1432_v7 = vadd.f32 %v1431_v5, %v1430_v3 }
 0x21a   : > { %v1438_v8 = vadd.f32 %v1437_v6, %v1436_v4 }
 0x21b   : > { %v1439_v9 = vmul.f32 0.125, %v1432_v7 }
 0x21c   : > { %v1440_v10 = vmul.f32 0.125, %v1438_v8 }
 0x21d   : > { %v1441_v11 = vadd.f32 1e-05, %v1439_v9 }
 0x21e   : > { %v1442_v12 = vadd.f32 1e-05, %v1440_v10 }
 0x21f   : > { %2487 = vrsqrt.f32 %v1441_v11 }
 0x220   : > { %2489 = vrsqrt.f32 %v1442_v12 }
 0x229   : > { %v2488_v16 = vpop.eup %2487 }
 0x22a   : > { %v2490_v18 = vpop.eup %2489  ;;  %v1445_v19 = vmul.f32 %v2488_v16, %v1423_v57  ;;  %v2483_v57 = vld [vmem:[%s3085_s14 + $0x70] sm:$0xff]  }
 0x22b   : > { %v1446_v21 = vmul.f32 %v2490_v18, %v1424_v58  ;;  %v2484_v58 = vld [vmem:[%s3085_s14 + $0x30] sm:$0xff]  }
 0x22c   : > { %v1458_v23 = vmul.f32 %v1451_v15, %v1445_v19 }
 0x22d   : > { %v1459_v24 = vmul.f32 %v1455_v17, %v1446_v21 }
 0x22e   : > { %v1471_v25 = vadd.f32 %v1464_v20, %v1458_v23 }
 0x22f   : > { %v1472_v26 = vadd.f32 %v1468_v22, %v1459_v24 }
 0x230   : > { %v1473_v27 = vmax.f32 %v1471_v25, 0.0 }
 0x231   : > { %v1474_v28 = vmax.f32 %v1472_v26, 0.0 }
 0x232   : > { %v1475_v30 = vpack.c.bf16 %v1473_v27, %v1473_v27 }
 0x233   : > { %v1476_v29 = vpack.c.bf16 %v1474_v28, %v1474_v28 }
 0x235   : > { %1611 = vmatprep.mubr.bf16.mxu1 %v1476_v29 }
 0x236   : > { %1612 = vmatmul.mubr.bf16.vlgmr.msra.gmra.mrb[8].mxu1 %v1475_v30 }
 0x237   : > { %2313 = vmatpush3.bf16.msra.mxu1 %v2472_v46 }
 0x238   : > { %2314 = vmatprep.subr.bf16.mxu1 %v2473_v47 }
 0x23b   : > { %2315 = vmatpush3.bf16.msra.mxu1 %v2474_v48 }
 0x23c   : > { %2316 = vmatprep.subr.bf16.mxu1 %v2475_v49 }
 0x23f   : > { %2317 = vmatpush3.bf16.msra.mxu1 %v2476_v50 }
 0x240   : > { %2318 = vmatprep.subr.bf16.mxu1 %v2477_v51 }
 0x243   : > { %2319 = vmatpush3.bf16.msra.mxu1 %v2478_v52 }
 0x244   : > { %2320 = vmatprep.subr.bf16.mxu1 %v2479_v53 }
 0x247   : > { %2321 = vmatpush3.bf16.msra.mxu1 %v2480_v54 }
 0x248   : > { %2322 = vmatprep.subr.bf16.mxu1 %v2481_v55 }
 0x24b   : > { %2323 = vmatpush3.bf16.msra.mxu1 %v2482_v56 }
 0x24c   : > { %2324 = vmatprep.subr.bf16.mxu1 %v2483_v57 }
 0x24f   : > { %2325 = vmatpush3.bf16.msra.mxu1 %v2484_v58 }
 0x250   : > { %2326 = vmatprep.subr.bf16.mxu1 %v2485_v59 }
 0x253   : > { %2327 = vmatpush3.bf16.msra.mxu1 %v2486_v60 }
 0x309   : > { %v2306_v37 = vpop.f32.mrb[8].mxu1 }
 0x30a   : > { %v2307_v39 = vpop.f32.mrb[9].mxu1 }
 0x30b   : > { %v2308_v40 = vadd.f32 %v2307_v39, %v2306_v37  ;;  %v2309_v41 = vpop.f32.mrb[10].mxu1 }
 0x30c   : > { %v2310_v42 = vpop.f32.mrb[11].mxu1 }
 0x30d   : > { %v1614_v43 = vadd.f32 %v2308_v40, %v2150_v38  ;;  %v1636_v42 = vld [vmem:[%s3083_s12] sm:$0x3] }
 0x30e   : > { %v1850_v46 = vrot.slane %v1636_v42, %v2968_v34 }
 0x30f   : > { %v1671_v44 = vpack.c.bf16 %v1614_v43, %v1614_v43  ;;  %v1637_v43 = vld [vmem:[%s3084_s13] sm:$0x3] }
 0x310   : > { %v1859_v49 = vrot.slane %v1637_v43, %v2963_v32  ;;  %v1863_v51 = vrot.slane %v1637_v43, %v2968_v34 }
 0x311   : > { %1796 = vmatmul.mubr.bf16.vlgmr.msra.gmra.mrb[12].mxu0 %v1671_v44  ;;  %v1846_v44 = vrot.slane %v1636_v42, %v2963_v32  ;;  %v2183_v32 = vld [vmem:[%s3086_s15] ss:$0 sm:$0xff] }
 0x3e4   : > { %v1797_v0 = vpop.f32.mrb[12].mxu0 }
 0x3e5   : > { %v1798_v1 = vadd.f32 %v1797_v0, %v1676_v62  ;;  %v1799_v2 = vpop.f32.mrb[13].mxu0 }
 0x3e6   : > { %v1800_v3 = vadd.f32 %v1799_v2, %v1680_v63  ;;  %v1801_v4 = vpop.f32.mrb[14].mxu0 }
 0x3e7   : > { %v1804_v5 = vrot.slane %v1798_v1, 4  ;;  %v1802_v6 = vpop.f32.mrb[15].mxu0 }
 0x3e8   : > { %v1810_v7 = vrot.slane %v1800_v3, 4 }
 0x3e9   : > { %v1805_v8 = vadd.f32 %v1804_v5, %v1798_v1 }
 0x3ea   : > { %v1811_v9 = vadd.f32 %v1810_v7, %v1800_v3 }
 0x3eb   : > { %v1806_v10 = vrot.slane %v1805_v8, 2 }
 0x3ec   : > { %v1812_v11 = vrot.slane %v1811_v9, 2 }
 0x3ed   : > { %v1807_v12 = vadd.f32 %v1806_v10, %v1805_v8 }
 0x3ee   : > { %v1813_v13 = vadd.f32 %v1812_v11, %v1811_v9 }
 0x3ef   : > { %v1808_v14 = vrot.slane %v1807_v12, 1 }
 0x3f0   : > { %v1814_v15 = vrot.slane %v1813_v13, 1 }
 0x3f1   : > { %v1809_v16 = vadd.f32 %v1808_v14, %v1807_v12 }
 0x3f2   : > { %v1815_v17 = vadd.f32 %v1814_v15, %v1813_v13 }
 0x3f3   : > { %v1816_v18 = vmul.f32 0.125, %v1809_v16 }
 0x3f4   : > { %v1817_v19 = vmul.f32 0.125, %v1815_v17 }
 0x3f5   : > { %v1818_v20 = vsub.f32 %v1798_v1, %v1816_v18 }
 0x3f6   : > { %v1819_v21 = vsub.f32 %v1800_v3, %v1817_v19 }
 0x3f7   : > { %v1820_v22 = vmul.f32 %v1818_v20, %v1818_v20 }
 0x3f8   : > { %v1821_v23 = vmul.f32 %v1819_v21, %v1819_v21 }
 0x3f9   : > { %v1822_v24 = vrot.slane %v1820_v22, 4 }
 0x3fa   : > { %v1828_v25 = vrot.slane %v1821_v23, 4 }
 0x3fb   : > { %v1823_v26 = vadd.f32 %v1822_v24, %v1820_v22 }
 0x3fc   : > { %v1829_v27 = vadd.f32 %v1828_v25, %v1821_v23 }
 0x3fd   : > { %v1824_v28 = vrot.slane %v1823_v26, 2 }
 0x3fe   : > { %v1830_v29 = vrot.slane %v1829_v27, 2 }
 0x3ff   : > { %v1825_v30 = vadd.f32 %v1824_v28, %v1823_v26 }
 0x400   : > { %v1831_v31 = vadd.f32 %v1830_v29, %v1829_v27 }
 0x401   : > { %v1826_v33 = vrot.slane %v1825_v30, 1 }
 0x402   : > { %v1832_v35 = vrot.slane %v1831_v31, 1 }
 0x403   : > { %v1827_v36 = vadd.f32 %v1826_v33, %v1825_v30 }
 0x404   : > { %v1833_v37 = vadd.f32 %v1832_v35, %v1831_v31 }
 0x405   : > { %v1834_v38 = vmul.f32 0.125, %v1827_v36 }
 0x406   : > { %v1835_v39 = vmul.f32 0.125, %v1833_v37 }
 0x407   : > { %v1836_v40 = vadd.f32 1e-05, %v1834_v38 }
 0x408   : > { %v1837_v41 = vadd.f32 1e-05, %v1835_v39 }
 0x409   : > { %2491 = vrsqrt.f32 %v1836_v40 }
 0x40a   : > { %2493 = vrsqrt.f32 %v1837_v41 }
 0x413   : > { %v2492_v45 = vpop.eup %2491 }
 0x414   : > { %v2494_v47 = vpop.eup %2493  ;;  %v1840_v48 = vmul.f32 %v2492_v45, %v1818_v20 }
 0x415   : > { %v1841_v50 = vmul.f32 %v2494_v47, %v1819_v21 }
 0x416   : > { %v1853_v52 = vmul.f32 %v1846_v44, %v1840_v48 }
 0x417   : > { %v1854_v53 = vmul.f32 %v1850_v46, %v1841_v50 }
 0x418   : > { %v1866_v54 = vadd.f32 %v1859_v49, %v1853_v52 }
 0x419   : > { %v1867_v55 = vadd.f32 %v1863_v51, %v1854_v53 }
 0x41a   : > { %v1868_v56 = vmax.f32 %v1866_v54, 0.0 }
 0x41b   : > { %v1869_v57 = vmax.f32 %v1867_v55, 0.0 }
 0x41c   : > { %v1870_v59 = vpack.c.bf16 %v1868_v56, %v1868_v56 }
 0x41d   : > { %v1871_v58 = vpack.c.bf16 %v1869_v57, %v1869_v57 }
 0x41f   : > { %2006 = vmatprep.mubr.bf16.mxu1 %v1871_v58 }
 0x420   : > { %2007 = vmatmul.mubr.bf16.vlgmr.msra.gmra.mrb[12].mxu1 %v1870_v59 }
 0x4f3   : > { %v2328_v60 = vpop.f32.mrb[12].mxu1 }
 0x4f4   : > { %v2329_v61 = vpop.f32.mrb[13].mxu1 }
 0x4f5   : > { %v2330_v34 = vadd.f32 %v2329_v61, %v2328_v60  ;;  %v2331_v62 = vpop.f32.mrb[14].mxu1 }
 0x4f6   : > { %v2332_v63 = vpop.f32.mrb[15].mxu1 }
 0x4f7   : > { %v2009_v0 = vadd.f32 %v2330_v34, %v2183_v32 }
 0x4f9   : > { %2014 = vst [vmem:[%s499_s23] sm:$0xff] %v2009_v0 }
 0x4fa PF: > { %s26_s21 = sadd.s32 1, %s2501_s21  }
 0x4fb   : > { %p23_p4 = scmp.ge.s32.totalorder %s26_s21, 4  }
 0x4fd   :  { %25 = sbr.rel (!%p23_p4) target bundleno = 2 (0x2), region = 111 }

// kernel: byol_forward.3
= control target key start
LH: loop header
LB: loop body
LE: loop exit
PB: predicated region body
PF: predicated region fallthrough
CT: control target
= control target key end

     0   :  { %s1903_s13 = smov 0   ;;  %s2261_s0 = inlined_call_operand.vmem [shape: bf16[8,1024], index: 0, kind: input, shape index: {}]   ;;  %s2262_s1 = inlined_call_operand.vmem [shape: bf16[8,1024], index: 1, kind: input, shape index: {}]   ;;  %s2263_s2 = inlined_call_operand.vmem [shape: bf16[1024,128], index: 2, kind: input, shape index: {}]   ;;  %s2264_s3 = inlined_call_operand.vmem [shape: f32[1,128], index: 3, kind: input, shape index: {}]   ;;  %s2265_s4 = inlined_call_operand.vmem [shape: bf16[128,256], index: 4, kind: input, shape index: {}]   ;;  %s2266_s5 = inlined_call_operand.vmem [shape: f32[1,256], index: 5, kind: input, shape index: {}]   ;;  %s2267_s6 = inlined_call_operand.vmem [shape: f32[1,256], index: 6, kind: input, shape index: {}]   ;;  %s2268_s7 = inlined_call_operand.vmem [shape: f32[1,256], index: 7, kind: input, shape index: {}]   ;;  %s2269_s8 = inlined_call_operand.vmem [shape: bf16[256,128], index: 8, kind: input, shape index: {}]   ;;  %s2270_s9 = inlined_call_operand.vmem [shape: f32[1,128], index: 9, kind: input, shape index: {}]   ;;  %s2271_s10 = inlined_call_operand.vmem [shape: f32[16,128], index: 10, kind: output, shape index: {}]  }
   0x1 LB: > { %s1909_s14 = sadd.s32 4294967295, %s1845_s13   ;;  %p1502_p0 = scmp.ge.s32.totalorder %s1845_s13, 1  ;;  %s1845_s13 = sphi %s1903_s13, %s20_s13  }
   0x2   : > { %p302_p1 = scmp.lt.s32.totalorder %s1845_s13, 3 }
   0x4   : > { %p303_p2 = pnand %p1502_p0, %p302_p1 }
   0x5   : > { %v1731_v0 = vld [vmem:[%s2263_s2 + $0x40] sm:$0xff] (!%p303_p2)   ;;  %v1735_v4 = vld [vmem:[%s2263_s2 + $0x48] sm:$0xff] (!%p303_p2)   ;;  %v1739_v8 = vld [vmem:[%s2263_s2 + $0x50] sm:$0xff] (!%p303_p2)   ;;  %v347_v28 = vstv (!%p303_p2), %s1909_s14  ;;  %p334_p3 = scmp.lt.s32.totalorder (!%p303_p2), %s1909_s14, 1 }
   0x6   : > { %306 = sbr.rel (%p303_p2) target bundleno = 783 (0x30f), region = 60  ;;  %v1732_v1 = vld [vmem:[%s2263_s2 + $0xc0] sm:$0xff] (!%p303_p2)   ;;  %1612 = vmatprep.subr.bf16.mxu0 (!%p303_p2), %v1731_v0  ;;  %v1736_v5 = vld [vmem:[%s2263_s2 + $0xc8] sm:$0xff] (!%p303_p2)   ;;  %v1740_v9 = vld [vmem:[%s2263_s2 + $0xd0] sm:$0xff] (!%p303_p2)   ;;  %vm2007_vm0 = vcmp.eq.s32.totalorder (!%p303_p2), %v347_v28, 0 }
   0x7   : > { %v1733_v2 = vld [vmem:[%s2263_s2] sm:$0xff] (!%p303_p2)   ;;  %1634 = vmatprep.subr.bf16.mxu1 (!%p303_p2), %v1732_v1  ;;  %v1737_v6 = vld [vmem:[%s2263_s2 + $0x8] sm:$0xff] (!%p303_p2)   ;;  %v1741_v10 = vld [vmem:[%s2263_s2 + $0x10] sm:$0xff] (!%p303_p2)  }
   0x8   : > { %v1734_v3 = vld [vmem:[%s2263_s2 + $0x80] sm:$0xff] (!%p303_p2)   ;;  %1613 = vmatpush3.bf16.msra.mxu0 (!%p303_p2), %v1733_v2  ;;  %v1738_v7 = vld [vmem:[%s2263_s2 + $0x88] sm:$0xff] (!%p303_p2)   ;;  %v1742_v11 = vld [vmem:[%s2263_s2 + $0x90] sm:$0xff] (!%p303_p2)  }
   0x9   : > { %1635 = vmatpush3.bf16.msra.mxu1 (!%p303_p2), %v1734_v3  ;;  %1614 = vmatprep.subr.bf16.mxu0 (!%p303_p2), %v1735_v4  ;;  %v1743_v12 = vld [vmem:[%s2263_s2 + $0x58] sm:$0xff] (!%p303_p2)   ;;  %v1747_v16 = vld [vmem:[%s2263_s2 + $0x60] sm:$0xff] (!%p303_p2)   ;;  %v1751_v20 = vld [vmem:[%s2263_s2 + $0x68] sm:$0xff] (!%p303_p2)  }
   0xa   : > { %1636 = vmatprep.subr.bf16.mxu1 (!%p303_p2), %v1736_v5  ;;  %v1744_v13 = vld [vmem:[%s2263_s2 + $0xd8] sm:$0xff] (!%p303_p2)   ;;  %v1748_v17 = vld [vmem:[%s2263_s2 + $0xe0] sm:$0xff] (!%p303_p2)   ;;  %v1752_v21 = vld [vmem:[%s2263_s2 + $0xe8] sm:$0xff] (!%p303_p2)  }
   0xb   : > { %v1745_v14 = vld [vmem:[%s2263_s2 + $0x18] sm:$0xff] (!%p303_p2)   ;;  %v1749_v18 = vld [vmem:[%s2263_s2 + $0x20] sm:$0xff] (!%p303_p2)   ;;  %v1753_v22 = vld [vmem:[%s2263_s2 + $0x28] sm:$0xff] (!%p303_p2)  }
   0xc   : > { %1615 = vmatpush3.bf16.msra.mxu0 (!%p303_p2), %v1737_v6  ;;  %v1746_v15 = vld [vmem:[%s2263_s2 + $0x98] sm:$0xff] (!%p303_p2)   ;;  %v1750_v19 = vld [vmem:[%s2263_s2 + $0xa0] sm:$0xff] (!%p303_p2)   ;;  %v1754_v23 = vld [vmem:[%s2263_s2 + $0xa8] sm:$0xff] (!%p303_p2)  }
   0xd   : > { %1637 = vmatpush3.bf16.msra.mxu1 %v1738_v7  ;;  %1616 = vmatprep.subr.bf16.mxu0 %v1739_v8  ;;  %v1755_v24 = vld [vmem:[%s2263_s2 + $0x70] sm:$0xff]   ;;  %v1759_v29 = vld [vmem:[%s2263_s2 + $0x78] sm:$0xff]   ;;  %v339_v34 = vld [vmem:[%s2261_s0] sm:$0xff]  ;;  %s2275_s14 = smov (!%p334_p3, %s1909_s14), 1 }
   0xe   : > { %1638 = vmatprep.subr.bf16.mxu1 %v1740_v9  ;;  %v1756_v25 = vld [vmem:[%s2263_s2 + $0xf0] sm:$0xff]   ;;  %v1760_v30 = vld [vmem:[%s2263_s2 + $0xf8] sm:$0xff]   ;;  %v343_v35 = vld [vmem:[%s2262_s1] sm:$0xff]  ;;  %s1503_s15 = sshll.u32 %s2275_s14, 3 }
   0xf   : > { %v1757_v26 = vld [vmem:[%s2263_s2 + $0x30] sm:$0xff]   ;;  %v1761_v31 = vld [vmem:[%s2263_s2 + $0x38] sm:$0xff]   ;;  %v340_v36 = vld [vmem:[%s2261_s0 + $0x8] sm:$0xff]  ;;  %v349_v37 = vsel %vm2007_vm0, %v339_v34, %v343_v35  ;;  %s337_s20 = scalar_lea.vmem %s2271_s10, %s1503_s15 }
  0x10   : > { %1617 = vmatpush3.bf16.msra.mxu0 %v1741_v10  ;;  %v1758_v27 = vld [vmem:[%s2263_s2 + $0xb0] sm:$0xff]   ;;  %v1762_v33 = vld [vmem:[%s2263_s2 + $0xb8] sm:$0xff]   ;;  %v344_v38 = vld [vmem:[%s2262_s1 + $0x8] sm:$0xff]  ;;  %v1505_v39 = vcombine.low %v349_v37, %v349_v37  ;;  %v1506_v40 = vcombine.high %v349_v37, %v349_v37 }
  0x11   : > { %1639 = vmatpush3.bf16.msra.mxu1 %v1742_v11  ;;  %1618 = vmatprep.subr.bf16.mxu0 %v1743_v12  ;;  %v350_v41 = vsel %vm2007_vm0, %v340_v36, %v344_v38  ;;  %v1763_v42 = vld [vmem:[%s2263_s2 + $0x140] sm:$0xff]   ;;  %v1767_v48 = vld [vmem:[%s2263_s2 + $0x148] sm:$0xff]   ;;  %v1771_v52 = vld [vmem:[%s2263_s2 + $0x150] sm:$0xff]   ;;  %v1847_v38 = vmov 0  }
  0x12   : > { %1640 = vmatprep.subr.bf16.mxu1 %v1744_v13  ;;  %v1507_v43 = vcombine.low %v350_v41, %v350_v41  ;;  %v1508_v44 = vcombine.high %v350_v41, %v350_v41  ;;  %v1764_v45 = vld [vmem:[%s2263_s2 + $0x1c0] sm:$0xff]   ;;  %932 = vmatprep.mubr.bf16.mxu0 %v1506_v40  ;;  %v1768_v49 = vld [vmem:[%s2263_s2 + $0x1c8] sm:$0xff]   ;;  %v1772_v53 = vld [vmem:[%s2263_s2 + $0x1d0] sm:$0xff]  }
  0x13   : > { %v1765_v46 = vld [vmem:[%s2263_s2 + $0x100] sm:$0xff]   ;;  %v1769_v50 = vld [vmem:[%s2263_s2 + $0x108] sm:$0xff]   ;;  %v1773_v54 = vld [vmem:[%s2263_s2 + $0x110] sm:$0xff]  }
  0x14   : > { %1619 = vmatpush3.bf16.msra.mxu0 %v1745_v14  ;;  %972 = vmatprep.mubr.bf16.mxu1 %v1508_v44  ;;  %v1766_v47 = vld [vmem:[%s2263_s2 + $0x180] sm:$0xff]   ;;  %v1770_v51 = vld [vmem:[%s2263_s2 + $0x188] sm:$0xff]   ;;  %v1774_v55 = vld [vmem:[%s2263_s2 + $0x190] sm:$0xff]  }
  0x15   : > { %1641 = vmatpush3.bf16.msra.mxu1 %v1746_v15  ;;  %1620 = vmatprep.subr.bf16.mxu0 %v1747_v16  ;;  %v1775_v56 = vld [vmem:[%s2263_s2 + $0x158] sm:$0xff]   ;;  %v1779_v60 = vld [vmem:[%s2263_s2 + $0x160] sm:$0xff]   ;;  %v1783_v0 = vld [vmem:[%s2263_s2 + $0x168] sm:$0xff]  }
  0x16   : > { %1642 = vmatprep.subr.bf16.mxu1 %v1748_v17  ;;  %v1776_v57 = vld [vmem:[%s2263_s2 + $0x1d8] sm:$0xff]   ;;  %v1780_v61 = vld [vmem:[%s2263_s2 + $0x1e0] sm:$0xff]   ;;  %v1784_v1 = vld [vmem:[%s2263_s2 + $0x1e8] sm:$0xff]  }
  0x17   : > { %v1777_v58 = vld [vmem:[%s2263_s2 + $0x118] sm:$0xff]   ;;  %v1781_v62 = vld [vmem:[%s2263_s2 + $0x120] sm:$0xff]   ;;  %v1785_v2 = vld [vmem:[%s2263_s2 + $0x128] sm:$0xff]  }
  0x18   : > { %1621 = vmatpush3.bf16.msra.mxu0 %v1749_v18  ;;  %v1778_v59 = vld [vmem:[%s2263_s2 + $0x198] sm:$0xff]   ;;  %v1782_v63 = vld [vmem:[%s2263_s2 + $0x1a0] sm:$0xff]   ;;  %v1786_v3 = vld [vmem:[%s2263_s2 + $0x1a8] sm:$0xff]  }
  0x19   : > { %1643 = vmatpush3.bf16.msra.mxu1 %v1750_v19  ;;  %1622 = vmatprep.subr.bf16.mxu0 %v1751_v20  ;;  %v1787_v4 = vld [vmem:[%s2263_s2 + $0x170] sm:$0xff]   ;;  %v1791_v8 = vld [vmem:[%s2263_s2 + $0x178] sm:$0xff]   ;;  %v1815_v34 = vld [vmem:[%s2265_s4 + $0x64] ss:$8 sps:$4 sm:$0xff]  }
  0x1a   : > { %1644 = vmatprep.subr.bf16.mxu1 %v1752_v21  ;;  %v1788_v5 = vld [vmem:[%s2263_s2 + $0x1f0] sm:$0xff]   ;;  %v1792_v9 = vld [vmem:[%s2263_s2 + $0x1f8] sm:$0xff]   ;;  %v1813_v35 = vld [vmem:[%s2265_s4 + $0x60] ss:$8 sps:$4 sm:$0xff]  }
  0x1b   : > { %v1789_v6 = vld [vmem:[%s2263_s2 + $0x130] sm:$0xff]   ;;  %v1793_v10 = vld [vmem:[%s2263_s2 + $0x138] sm:$0xff]   ;;  %v1504_v41 = vld [vmem:[%s2264_s3] ss:$0 sm:$0xff] }
  0x1c   : > { %1623 = vmatpush3.bf16.msra.mxu0 %v1753_v22  ;;  %v1790_v7 = vld [vmem:[%s2263_s2 + $0x1b0] sm:$0xff]   ;;  %v1794_v11 = vld [vmem:[%s2263_s2 + $0x1b8] sm:$0xff]   ;;  %v1795_v22 = vld [vmem:[%s2265_s4] ss:$8 sps:$4 sm:$0xff]  }
  0x1d   : > { %1645 = vmatpush3.bf16.msra.mxu1 %v1754_v23  ;;  %1624 = vmatprep.subr.bf16.mxu0 %v1755_v24  ;;  %v341_v12 = vld [vmem:[%s2261_s0 + $0x10] sm:$0xff]  ;;  %v342_v15 = vld [vmem:[%s2261_s0 + $0x18] sm:$0xff]  ;;  %v1797_v23 = vld [vmem:[%s2265_s4 + $0x4] ss:$8 sps:$4 sm:$0xff]  }
  0x1e   : > { %1646 = vmatprep.subr.bf16.mxu1 %v1756_v25  ;;  %v345_v13 = vld [vmem:[%s2262_s1 + $0x10] sm:$0xff]  ;;  %v346_v16 = vld [vmem:[%s2262_s1 + $0x18] sm:$0xff] }
  0x1f   : > { %v351_v14 = vsel %vm2007_vm0, %v341_v12, %v345_v13  ;;  %v352_v19 = vsel %vm2007_vm0, %v342_v15, %v346_v16  ;;  %v1800_v24 = vld [vmem:[%s2265_s4 + $0x14] ss:$8 sps:$4 sm:$0xff]   ;;  %v1798_v25 = vld [vmem:[%s2265_s4 + $0x10] ss:$8 sps:$4 sm:$0xff]   ;;  %v1829_v12 = vld [vmem:[%s2269_s8 + $0x68] sm:$0xff]  }
  0x20   : > { %1625 = vmatpush3.bf16.msra.mxu0 %v1757_v26  ;;  %v1509_v17 = vcombine.low %v351_v14, %v351_v14  ;;  %v1510_v18 = vcombine.high %v351_v14, %v351_v14  ;;  %v1511_v20 = vcombine.low %v352_v19, %v352_v19  ;;  %v1512_v21 = vcombine.high %v352_v19, %v352_v19  ;;  %v1803_v26 = vld [vmem:[%s2265_s4 + $0x24] ss:$8 sps:$4 sm:$0xff]   ;;  %v1806_v28 = vld [vmem:[%s2265_s4 + $0x34] ss:$8 sps:$4 sm:$0xff]   ;;  %v1816_v37 = vld [vmem:[%s2265_s4 + $0x70] ss:$8 sps:$4 sm:$0xff]  }
  0x21   : > { %1647 = vmatpush3.bf16.msra.mxu1 %v1758_v27  ;;  %1626 = vmatprep.subr.bf16.mxu0 %v1759_v29  ;;  %v1801_v27 = vld [vmem:[%s2265_s4 + $0x20] ss:$8 sps:$4 sm:$0xff]   ;;  %v1804_v29 = vld [vmem:[%s2265_s4 + $0x30] ss:$8 sps:$4 sm:$0xff]   ;;  %v1812_v32 = vld [vmem:[%s2265_s4 + $0x54] ss:$8 sps:$4 sm:$0xff]  }
  0x22   : > { %1648 = vmatprep.subr.bf16.mxu1 %v1760_v30  ;;  %v1809_v30 = vld [vmem:[%s2265_s4 + $0x44] ss:$8 sps:$4 sm:$0xff]   ;;  %v1818_v36 = vld [vmem:[%s2265_s4 + $0x74] ss:$8 sps:$4 sm:$0xff]  }
  0x23   : > { %v1830_v13 = vld [vmem:[%s2269_s8 + $0x28] sm:$0xff]   ;;  %v1831_v14 = vld [vmem:[%s2269_s8 + $0x70] sm:$0xff]   ;;  %v1833_v16 = vld [vmem:[%s2269_s8 + $0x78] sm:$0xff]  }
  0x24   : > { %1627 = vmatpush3.bf16.msra.mxu0 %v1761_v31  ;;  %v1807_v31 = vld [vmem:[%s2265_s4 + $0x40] ss:$8 sps:$4 sm:$0xff]   ;;  %v1832_v15 = vld [vmem:[%s2269_s8 + $0x30] sm:$0xff]  }
  0x25   : > { %1649 = vmatpush3.bf16.msra.mxu1 %v1762_v33  ;;  %1656 = vmatprep.subr.bf16.mxu0 %v1763_v42  ;;  %v1810_v33 = vld [vmem:[%s2265_s4 + $0x50] ss:$8 sps:$4 sm:$0xff]  }
  0x26   : > { %1678 = vmatprep.subr.bf16.mxu1 %v1764_v45 }
  0x27   : > { %933 = vmatmul.mubr.bf16.vlgmr.msra.gmra.mrb[0].mxu0 %v1505_v39 }
  0x28   : > { %973 = vmatmul.mubr.bf16.vlgmr.msra.gmra.mrb[0].mxu1 %v1507_v43  ;;  %1657 = vmatpush3.bf16.msra.mxu0 %v1765_v46 }
  0x29   : > { %1679 = vmatpush3.bf16.msra.mxu1 %v1766_v47  ;;  %1658 = vmatprep.subr.bf16.mxu0 %v1767_v48 }
  0x2a   : > { %1680 = vmatprep.subr.bf16.mxu1 %v1768_v49  ;;  %1012 = vmatprep.mubr.bf16.mxu0 %v1510_v18  ;;  %v1115_v18 = vlaneseq }
  0x2b   : > { %1052 = vmatprep.mubr.bf16.mxu1 %v1512_v21  ;;  %v1077_v21 = vld [vmem:[%s2266_s5] sm:$0x3] }
  0x2c   : > { %1659 = vmatpush3.bf16.msra.mxu0 %v1769_v50  ;;  %v1116_v19 = vshrl.u32 %v1115_v18, 7 }
  0x2d   : > { %1681 = vmatpush3.bf16.msra.mxu1 %v1770_v51  ;;  %1660 = vmatprep.subr.bf16.mxu0 %v1771_v52 }
  0x2e   : > { %1682 = vmatprep.subr.bf16.mxu1 %v1772_v53 }
  0x30   : > { %1661 = vmatpush3.bf16.msra.mxu0 %v1773_v54 }
  0x31   : > { %1683 = vmatpush3.bf16.msra.mxu1 %v1774_v55  ;;  %1662 = vmatprep.subr.bf16.mxu0 %v1775_v56 }
  0x32   : > { %1684 = vmatprep.subr.bf16.mxu1 %v1776_v57 }
  0x34   : > { %1663 = vmatpush3.bf16.msra.mxu0 %v1777_v58 }
  0x35   : > { %1685 = vmatpush3.bf16.msra.mxu1 %v1778_v59  ;;  %1664 = vmatprep.subr.bf16.mxu0 %v1779_v60 }
  0x36   : > { %1686 = vmatprep.subr.bf16.mxu1 %v1780_v61 }
  0x38   : > { %1665 = vmatpush3.bf16.msra.mxu0 %v1781_v62 }
  0x39   : > { %1687 = vmatpush3.bf16.msra.mxu1 %v1782_v63  ;;  %1666 = vmatprep.subr.bf16.mxu0 %v1783_v0 }
  0x3a   : > { %1688 = vmatprep.subr.bf16.mxu1 %v1784_v1 }
  0x3c   : > { %1667 = vmatpush3.bf16.msra.mxu0 %v1785_v2  ;;  %v1819_v2 = vld [vmem:[%s2269_s8 + $0x40] sm:$0xff]  }
  0x3d   : > { %1689 = vmatpush3.bf16.msra.mxu1 %v1786_v3  ;;  %1668 = vmatprep.subr.bf16.mxu0 %v1787_v4  ;;  %v1820_v3 = vld [vmem:[%s2269_s8] sm:$0xff]   ;;  %v1821_v4 = vld [vmem:[%s2269_s8 + $0x48] sm:$0xff]  }
  0x3e   : > { %1690 = vmatprep.subr.bf16.mxu1 %v1788_v5  ;;  %v1822_v5 = vld [vmem:[%s2269_s8 + $0x8] sm:$0xff]  }
  0x40   : > { %1669 = vmatpush3.bf16.msra.mxu0 %v1789_v6  ;;  %v1823_v6 = vld [vmem:[%s2269_s8 + $0x50] sm:$0xff]  }
  0x41   : > { %1691 = vmatpush3.bf16.msra.mxu1 %v1790_v7  ;;  %1670 = vmatprep.subr.bf16.mxu0 %v1791_v8  ;;  %v1824_v7 = vld [vmem:[%s2269_s8 + $0x10] sm:$0xff]   ;;  %v1825_v8 = vld [vmem:[%s2269_s8 + $0x58] sm:$0xff]  }
  0x42   : > { %1692 = vmatprep.subr.bf16.mxu1 %v1792_v9  ;;  %v1826_v9 = vld [vmem:[%s2269_s8 + $0x18] sm:$0xff]  }
  0x44   : > { %1671 = vmatpush3.bf16.msra.mxu0 %v1793_v10  ;;  %v1827_v10 = vld [vmem:[%s2269_s8 + $0x60] sm:$0xff]  }
  0x45   : > { %1693 = vmatpush3.bf16.msra.mxu1 %v1794_v11  ;;  %1205 = vmatprep.subr.bf16.mxu0 %v1797_v23  ;;  %v1828_v11 = vld [vmem:[%s2269_s8 + $0x20] sm:$0xff]  }
  0x46   : > { %1700 = vmatprep.subr.bf16.mxu1 %v1819_v2  ;;  %v1079_v2 = vld [vmem:[%s2268_s7] sm:$0x3] }
  0x47   : > { %1013 = vmatmul.mubr.bf16.vlgmr.msra.gmra.mrb[4].mxu0 %v1509_v17  ;;  %v1834_v17 = vld [vmem:[%s2269_s8 + $0x38] sm:$0xff]  }
  0x48   : > { %1053 = vmatmul.mubr.bf16.vlgmr.msra.gmra.mrb[4].mxu1 %v1511_v20  ;;  %1206 = vmatpush1.bf16.msra.mxu0 %v1795_v22  ;;  %v1117_v20 = vsub.s32 0, %v1116_v19  ;;  %v1121_v22 = vsub.s32 1, %v1116_v19 }
  0x49   : > { %1207 = vmatprep.subr.bf16.mxu0 %v1800_v24  ;;  %1237 = vmatprep.mubr.bf16.mxu0 %v1847_v38 }
  0x4a   : > { %1701 = vmatpush3.bf16.msra.mxu1 %v1820_v3  ;;  %v1118_v23 = vrot.slane %v1077_v21, %v1117_v20  ;;  %v1122_v24 = vrot.slane %v1077_v21, %v1121_v22 }
  0x4b   : > { %1702 = vmatprep.subr.bf16.mxu1 %v1821_v4 }
  0x4c   : > { %1208 = vmatpush1.bf16.msra.mxu0 %v1798_v25 }
  0x4d   : > { %1209 = vmatprep.subr.bf16.mxu0 %v1803_v26 }
  0x4e   : > { %1703 = vmatpush3.bf16.msra.mxu1 %v1822_v5 }
  0x4f   : > { %1704 = vmatprep.subr.bf16.mxu1 %v1823_v6 }
  0x50   : > { %1210 = vmatpush1.bf16.msra.mxu0 %v1801_v27 }
  0x51   : > { %1211 = vmatprep.subr.bf16.mxu0 %v1806_v28 }
  0x52   : > { %1705 = vmatpush3.bf16.msra.mxu1 %v1824_v7 }
  0x53   : > { %1706 = vmatprep.subr.bf16.mxu1 %v1825_v8  ;;  %v1302_v8 = vrot.slane %v1079_v2, %v1117_v20 }
  0x54   : > { %1212 = vmatpush1.bf16.msra.mxu0 %v1804_v29 }
  0x55   : > { %1213 = vmatprep.subr.bf16.mxu0 %v1809_v30 }
  0x56   : > { %1707 = vmatpush3.bf16.msra.mxu1 %v1826_v9 }
  0x57   : > { %1708 = vmatprep.subr.bf16.mxu1 %v1827_v10  ;;  %v1306_v10 = vrot.slane %v1079_v2, %v1121_v22 }
  0x58   : > { %1214 = vmatpush1.bf16.msra.mxu0 %v1807_v31 }
  0x59   : > { %1215 = vmatprep.subr.bf16.mxu0 %v1812_v32 }
  0x5a   : > { %1709 = vmatpush3.bf16.msra.mxu1 %v1828_v11 }
  0x5b   : > { %1710 = vmatprep.subr.bf16.mxu1 %v1829_v12 }
  0x5c   : > { %1216 = vmatpush1.bf16.msra.mxu0 %v1810_v33 }
  0x5d   : > { %1217 = vmatprep.subr.bf16.mxu0 %v1815_v34 }
  0x5e   : > { %1711 = vmatpush3.bf16.msra.mxu1 %v1830_v13 }
  0x5f   : > { %1712 = vmatprep.subr.bf16.mxu1 %v1831_v14 }
  0x60   : > { %1218 = vmatpush1.bf16.msra.mxu0 %v1813_v35 }
  0x61   : > { %1219 = vmatprep.subr.bf16.mxu0 %v1818_v36 }
  0x62   : > { %1713 = vmatpush3.bf16.msra.mxu1 %v1832_v15 }
  0x63   : > { %1714 = vmatprep.subr.bf16.mxu1 %v1833_v16 }
  0x64   : > { %1220 = vmatpush1.bf16.msra.mxu0 %v1816_v37 }
  0x66   : > { %1715 = vmatpush3.bf16.msra.mxu1 %v1834_v17 }
  0xfa   : > { %v1628_v39 = vpop.f32.mrb[0].mxu0 }
  0xfb   : > { %v1650_v40 = vpop.f32.mrb[0].mxu1  ;;  %v1629_v42 = vpop.f32.mrb[1].mxu0 }
  0xfc   : > { %v1630_v43 = vadd.f32 %v1629_v42, %v1628_v39  ;;  %v1651_v44 = vpop.f32.mrb[1].mxu1  ;;  %v1631_v45 = vpop.f32.mrb[2].mxu0 }
  0xfd   : > { %v1652_v46 = vadd.f32 %v1651_v44, %v1650_v40  ;;  %v1653_v47 = vpop.f32.mrb[2].mxu1  ;;  %v1632_v48 = vpop.f32.mrb[3].mxu0 }
  0xfe   : > { %v935_v49 = vadd.f32 %v1630_v43, %v1504_v41  ;;  %v1654_v50 = vpop.f32.mrb[3].mxu1 }
 0x100   : > { %v975_v51 = vadd.f32 %v1652_v46, %v935_v49 }
 0x11a   : > { %v1672_v52 = vpop.f32.mrb[4].mxu0 }
 0x11b   : > { %v1694_v53 = vpop.f32.mrb[4].mxu1  ;;  %v1673_v54 = vpop.f32.mrb[5].mxu0 }
 0x11c   : > { %v1674_v55 = vadd.f32 %v1673_v54, %v1672_v52  ;;  %v1695_v56 = vpop.f32.mrb[5].mxu1  ;;  %v1675_v57 = vpop.f32.mrb[6].mxu0 }
 0x11d   : > { %v1696_v58 = vadd.f32 %v1695_v56, %v1694_v53  ;;  %v1697_v59 = vpop.f32.mrb[6].mxu1  ;;  %v1676_v60 = vpop.f32.mrb[7].mxu0 }
 0x11e   : > { %v1015_v61 = vadd.f32 %v1674_v55, %v975_v51  ;;  %v1698_v62 = vpop.f32.mrb[7].mxu1 }
 0x120   : > { %v1055_v63 = vadd.f32 %v1696_v58, %v1015_v61 }
 0x122   : > { %v1060_v0 = vmax.f32 %v1055_v63, 0.0 }
 0x124   : > { %v1113_v1 = vpack.c.bf16 %v1060_v0, %v1060_v0 }
 0x126   : > { %1238 = vmatmul.mubr.bf16.vlgmr.msra.gmra.mrb[8].mxu0 %v1113_v1  ;;  %v1078_v1 = vld [vmem:[%s2267_s6] sm:$0x3] }
 0x127   : > { %v1289_v3 = vrot.slane %v1078_v1, %v1117_v20  ;;  %v1293_v5 = vrot.slane %v1078_v1, %v1121_v22  ;;  %v1593_v20 = vld [vmem:[%s2270_s9] ss:$0 sm:$0xff] }
 0x1f9   : > { %v1239_v25 = vpop.f32.mrb[8].mxu0 }
 0x1fa   : > { %v1240_v26 = vadd.f32 %v1239_v25, %v1118_v23  ;;  %v1241_v27 = vpop.f32.mrb[9].mxu0 }
 0x1fb   : > { %v1242_v28 = vadd.f32 %v1241_v27, %v1122_v24  ;;  %v1243_v29 = vpop.f32.mrb[10].mxu0 }
 0x1fc   : > { %v1246_v30 = vrot.slane %v1240_v26, 4  ;;  %v1244_v31 = vpop.f32.mrb[11].mxu0 }
 0x1fd   : > { %v1252_v32 = vrot.slane %v1242_v28, 4 }
 0x1fe   : > { %v1247_v33 = vadd.f32 %v1246_v30, %v1240_v26 }
 0x1ff   : > { %v1253_v34 = vadd.f32 %v1252_v32, %v1242_v28 }
 0x200   : > { %v1248_v35 = vrot.slane %v1247_v33, 2 }
 0x201   : > { %v1254_v36 = vrot.slane %v1253_v34, 2 }
 0x202   : > { %v1249_v37 = vadd.f32 %v1248_v35, %v1247_v33 }
 0x203   : > { %v1255_v38 = vadd.f32 %v1254_v36, %v1253_v34 }
 0x204   : > { %v1250_v39 = vrot.slane %v1249_v37, 1 }
 0x205   : > { %v1256_v40 = vrot.slane %v1255_v38, 1 }
 0x206   : > { %v1251_v41 = vadd.f32 %v1250_v39, %v1249_v37 }
 0x207   : > { %v1257_v42 = vadd.f32 %v1256_v40, %v1255_v38 }
 0x208   : > { %v1259_v43 = vmul.f32 0.125, %v1251_v41 }
 0x209   : > { %v1260_v44 = vmul.f32 0.125, %v1257_v42 }
 0x20a   : > { %v1261_v45 = vsub.f32 %v1240_v26, %v1259_v43 }
 0x20b   : > { %v1262_v46 = vsub.f32 %v1242_v28, %v1260_v44 }
 0x20c   : > { %v1263_v47 = vmul.f32 %v1261_v45, %v1261_v45 }
 0x20d   : > { %v1264_v48 = vmul.f32 %v1262_v46, %v1262_v46 }
 0x20e   : > { %v1265_v49 = vrot.slane %v1263_v47, 4 }
 0x20f   : > { %v1271_v50 = vrot.slane %v1264_v48, 4 }
 0x210   : > { %v1266_v51 = vadd.f32 %v1265_v49, %v1263_v47 }
 0x211   : > { %v1272_v52 = vadd.f32 %v1271_v50, %v1264_v48 }
 0x212   : > { %v1267_v53 = vrot.slane %v1266_v51, 2 }
 0x213   : > { %v1273_v54 = vrot.slane %v1272_v52, 2 }
 0x214   : > { %v1268_v55 = vadd.f32 %v1267_v53, %v1266_v51 }
 0x215   : > { %v1274_v56 = vadd.f32 %v1273_v54, %v1272_v52 }
 0x216   : > { %v1269_v57 = vrot.slane %v1268_v55, 1 }
 0x217   : > { %v1275_v58 = vrot.slane %v1274_v56, 1 }
 0x218   : > { %v1270_v59 = vadd.f32 %v1269_v57, %v1268_v55 }
 0x219   : > { %v1276_v60 = vadd.f32 %v1275_v58, %v1274_v56 }
 0x21a   : > { %v1277_v61 = vmul.f32 0.125, %v1270_v59 }
 0x21b   : > { %v1278_v62 = vmul.f32 0.125, %v1276_v60 }
 0x21c   : > { %v1279_v63 = vadd.f32 1e-05, %v1277_v61 }
 0x21d   : > { %v1280_v0 = vadd.f32 1e-05, %v1278_v62 }
 0x21e   : > { %1835 = vrsqrt.f32 %v1279_v63 }
 0x21f   : > { %1837 = vrsqrt.f32 %v1280_v0 }
 0x228   : > { %v1836_v4 = vpop.eup %1835 }
 0x229   : > { %v1838_v6 = vpop.eup %1837  ;;  %v1283_v7 = vmul.f32 %v1836_v4, %v1261_v45 }
 0x22a   : > { %v1284_v9 = vmul.f32 %v1838_v6, %v1262_v46 }
 0x22b   : > { %v1296_v11 = vmul.f32 %v1289_v3, %v1283_v7 }
 0x22c   : > { %v1297_v12 = vmul.f32 %v1293_v5, %v1284_v9 }
 0x22d   : > { %v1309_v13 = vadd.f32 %v1302_v8, %v1296_v11 }
 0x22e   : > { %v1310_v14 = vadd.f32 %v1306_v10, %v1297_v12 }
 0x22f   : > { %v1311_v15 = vmax.f32 %v1309_v13, 0.0 }
 0x230   : > { %v1312_v16 = vmax.f32 %v1310_v14, 0.0 }
 0x231   : > { %v1313_v18 = vpack.c.bf16 %v1311_v15, %v1311_v15 }
 0x232   : > { %v1314_v17 = vpack.c.bf16 %v1312_v16, %v1312_v16 }
 0x234   : > { %1449 = vmatprep.mubr.bf16.mxu1 %v1314_v17 }
 0x235   : > { %1450 = vmatmul.mubr.bf16.vlgmr.msra.gmra.mrb[8].mxu1 %v1313_v18 }
 0x308   : > { %v1716_v19 = vpop.f32.mrb[8].mxu1 }
 0x309   : > { %v1717_v21 = vpop.f32.mrb[9].mxu1 }
 0x30a   : > { %v1718_v22 = vadd.f32 %v1717_v21, %v1716_v19  ;;  %v1719_v23 = vpop.f32.mrb[10].mxu1 }
 0x30b   : > { %v1720_v24 = vpop.f32.mrb[11].mxu1 }
 0x30c   : > { %v1452_v25 = vadd.f32 %v1718_v22, %v1593_v20 }
 0x30e   : > { %1457 = vst [vmem:[%s337_s20] sm:$0xff] %v1452_v25 }
 0x30f PF: > { %s20_s13 = sadd.s32 1, %s1845_s13  }
 0x310   : > { %p17_p4 = scmp.ge.s32.totalorder %s20_s13, 4  }
 0x312   :  { %19 = sbr.rel (!%p17_p4) target bundleno = 1 (0x1), region = 87 }

// kernel: byol_forward.2
= control target key start
LH: loop header
LB: loop body
LE: loop exit
PB: predicated region body
PF: predicated region fallthrough
CT: control target
= control target key end

     0   :  { %s2589_s21 = smov 0   ;;  %s3071_s0 = inlined_call_operand.vmem [shape: bf16[8,1024], index: 0, kind: input, shape index: {}]   ;;  %s3072_s1 = inlined_call_operand.vmem [shape: bf16[8,1024], index: 1, kind: input, shape index: {}]   ;;  %s3073_s2 = inlined_call_operand.vmem [shape: bf16[1024,128], index: 2, kind: input, shape index: {}]   ;;  %s3074_s3 = inlined_call_operand.vmem [shape: f32[1,128], index: 3, kind: input, shape index: {}]   ;;  %s3075_s4 = inlined_call_operand.vmem [shape: bf16[128,256], index: 4, kind: input, shape index: {}]   ;;  %s3076_s5 = inlined_call_operand.vmem [shape: f32[1,256], index: 5, kind: input, shape index: {}]   ;;  %s3077_s6 = inlined_call_operand.vmem [shape: f32[1,256], index: 6, kind: input, shape index: {}]   ;;  %s3078_s7 = inlined_call_operand.vmem [shape: f32[1,256], index: 7, kind: input, shape index: {}]   ;;  %s3079_s8 = inlined_call_operand.vmem [shape: bf16[256,128], index: 8, kind: input, shape index: {}]   ;;  %s3080_s9 = inlined_call_operand.vmem [shape: f32[1,128], index: 9, kind: input, shape index: {}]   ;;  %s3081_s10 = inlined_call_operand.vmem [shape: bf16[128,256], index: 10, kind: input, shape index: {}]   ;;  %s3082_s11 = inlined_call_operand.vmem [shape: f32[1,256], index: 11, kind: input, shape index: {}]   ;;  %s3083_s12 = inlined_call_operand.vmem [shape: f32[1,256], index: 12, kind: input, shape index: {}]   ;;  %s3084_s13 = inlined_call_operand.vmem [shape: f32[1,256], index: 13, kind: input, shape index: {}]   ;;  %s3085_s14 = inlined_call_operand.vmem [shape: bf16[256,128], index: 14, kind: input, shape index: {}]   ;;  %s3086_s15 = inlined_call_operand.vmem [shape: f32[1,128], index: 15, kind: input, shape index: {}]   ;;  %s3087_s16 = inlined_call_operand.vmem [shape: f32[16,128], index: 16, kind: output, shape index: {}]  }
   0x1   :  { %3089 = sst [smem:[#allocation2_spill]] %s3071_s0 }
   0x2 LB: > { %s2595_s22 = sadd.s32 4294967295, %s2501_s21   ;;  %p2059_p0 = scmp.ge.s32.totalorder %s2501_s21, 1  ;;  %s2501_s21 = sphi %s2589_s21, %s26_s21  }
   0x3   : > { %p452_p1 = scmp.lt.s32.totalorder %s2501_s21, 3 }
   0x5   : > { %p453_p2 = pnand %p2059_p0, %p452_p1 }
   0x6   : > { %v2343_v0 = vld [vmem:[%s3073_s2 + $0x40] sm:$0xff] (!%p453_p2)   ;;  %v2347_v4 = vld [vmem:[%s3073_s2 + $0x48] sm:$0xff] (!%p453_p2)   ;;  %v2351_v8 = vld [vmem:[%s3073_s2 + $0x50] sm:$0xff] (!%p453_p2)   ;;  %v509_v28 = vstv (!%p453_p2), %s2595_s22  ;;  %s3092_s24 = sld [smem:[#allocation2_spill]] (!%p453_p2)  ;;  %p496_p3 = scmp.lt.s32.totalorder (!%p453_p2), %s2595_s22, 1 }
   0x7   : > { %456 = sbr.rel (%p453_p2) target bundleno = 1274 (0x4fa), region = 84  ;;  %v2344_v1 = vld [vmem:[%s3073_s2 + $0xc0] sm:$0xff] (!%p453_p2)   ;;  %2202 = vmatprep.subr.bf16.mxu0 (!%p453_p2), %v2343_v0  ;;  %v2348_v5 = vld [vmem:[%s3073_s2 + $0xc8] sm:$0xff] (!%p453_p2)   ;;  %v2352_v9 = vld [vmem:[%s3073_s2 + $0xd0] sm:$0xff] (!%p453_p2)   ;;  %vm2693_vm0 = vcmp.eq.s32.totalorder (!%p453_p2), %v509_v28, 0 }
   0x8   : > { %v2345_v2 = vld [vmem:[%s3073_s2] sm:$0xff] (!%p453_p2)   ;;  %2224 = vmatprep.subr.bf16.mxu1 (!%p453_p2), %v2344_v1  ;;  %v2349_v6 = vld [vmem:[%s3073_s2 + $0x8] sm:$0xff] (!%p453_p2)   ;;  %v2353_v10 = vld [vmem:[%s3073_s2 + $0x10] sm:$0xff] (!%p453_p2)  }
   0x9   : > { %v2346_v3 = vld [vmem:[%s3073_s2 + $0x80] sm:$0xff] (!%p453_p2)   ;;  %2203 = vmatpush3.bf16.msra.mxu0 (!%p453_p2), %v2345_v2  ;;  %v2350_v7 = vld [vmem:[%s3073_s2 + $0x88] sm:$0xff] (!%p453_p2)   ;;  %v2354_v11 = vld [vmem:[%s3073_s2 + $0x90] sm:$0xff] (!%p453_p2)  }
   0xa   : > { %2225 = vmatpush3.bf16.msra.mxu1 (!%p453_p2), %v2346_v3  ;;  %2204 = vmatprep.subr.bf16.mxu0 (!%p453_p2), %v2347_v4  ;;  %v2355_v12 = vld [vmem:[%s3073_s2 + $0x58] sm:$0xff] (!%p453_p2)   ;;  %v2359_v16 = vld [vmem:[%s3073_s2 + $0x60] sm:$0xff] (!%p453_p2)   ;;  %v2363_v20 = vld [vmem:[%s3073_s2 + $0x68] sm:$0xff] (!%p453_p2)  }
   0xb   : > { %2226 = vmatprep.subr.bf16.mxu1 (!%p453_p2), %v2348_v5  ;;  %v2356_v13 = vld [vmem:[%s3073_s2 + $0xd8] sm:$0xff] (!%p453_p2)   ;;  %v2360_v17 = vld [vmem:[%s3073_s2 + $0xe0] sm:$0xff] (!%p453_p2)   ;;  %v2364_v21 = vld [vmem:[%s3073_s2 + $0xe8] sm:$0xff] (!%p453_p2)  }
   0xc   : > { %v2357_v14 = vld [vmem:[%s3073_s2 + $0x18] sm:$0xff] (!%p453_p2)   ;;  %v2361_v18 = vld [vmem:[%s3073_s2 + $0x20] sm:$0xff] (!%p453_p2)   ;;  %v2365_v22 = vld [vmem:[%s3073_s2 + $0x28] sm:$0xff] (!%p453_p2)  }
   0xd   : > { %2205 = vmatpush3.bf16.msra.mxu0 (!%p453_p2), %v2349_v6  ;;  %v2358_v15 = vld [vmem:[%s3073_s2 + $0x98] sm:$0xff] (!%p453_p2)   ;;  %v2362_v19 = vld [vmem:[%s3073_s2 + $0xa0] sm:$0xff] (!%p453_p2)   ;;  %v2366_v23 = vld [vmem:[%s3073_s2 + $0xa8] sm:$0xff] (!%p453_p2)  }
   0xe   : > { %2227 = vmatpush3.bf16.msra.mxu1 %v2350_v7  ;;  %2206 = vmatprep.subr.bf16.mxu0 %v2351_v8  ;;  %v2367_v24 = vld [vmem:[%s3073_s2 + $0x70] sm:$0xff]   ;;  %v2371_v29 = vld [vmem:[%s3073_s2 + $0x78] sm:$0xff]   ;;  %v501_v34 = vld [vmem:[%s3092_s24] sm:$0xff]  ;;  %s3094_s22 = smov (!%p496_p3, %s2595_s22), 1 }
   0xf   : > { %2228 = vmatprep.subr.bf16.mxu1 %v2352_v9  ;;  %v2368_v25 = vld [vmem:[%s3073_s2 + $0xf0] sm:$0xff]   ;;  %v2372_v30 = vld [vmem:[%s3073_s2 + $0xf8] sm:$0xff]   ;;  %v505_v35 = vld [vmem:[%s3072_s1] sm:$0xff]  ;;  %s2060_s0 = sshll.u32 %s3094_s22, 3 }
  0x10   : > { %v2369_v26 = vld [vmem:[%s3073_s2 + $0x30] sm:$0xff]   ;;  %v2373_v31 = vld [vmem:[%s3073_s2 + $0x38] sm:$0xff]   ;;  %v502_v36 = vld [vmem:[%s3092_s24 + $0x8] sm:$0xff]  ;;  %v511_v37 = vsel %vm2693_vm0, %v501_v34, %v505_v35  ;;  %s499_s23 = scalar_lea.vmem %s3087_s16, %s2060_s0 }
  0x11   : > { %2207 = vmatpush3.bf16.msra.mxu0 %v2353_v10  ;;  %v2370_v27 = vld [vmem:[%s3073_s2 + $0xb0] sm:$0xff]   ;;  %v2374_v33 = vld [vmem:[%s3073_s2 + $0xb8] sm:$0xff]   ;;  %v506_v38 = vld [vmem:[%s3072_s1 + $0x8] sm:$0xff]  ;;  %v2062_v39 = vcombine.low %v511_v37, %v511_v37  ;;  %v2063_v40 = vcombine.high %v511_v37, %v511_v37 }
  0x12   : > { %2229 = vmatpush3.bf16.msra.mxu1 %v2354_v11  ;;  %2208 = vmatprep.subr.bf16.mxu0 %v2355_v12  ;;  %v512_v41 = vsel %vm2693_vm0, %v502_v36, %v506_v38  ;;  %v2375_v42 = vld [vmem:[%s3073_s2 + $0x140] sm:$0xff]   ;;  %v2379_v48 = vld [vmem:[%s3073_s2 + $0x148] sm:$0xff]   ;;  %v2383_v52 = vld [vmem:[%s3073_s2 + $0x150] sm:$0xff]   ;;  %v2503_v38 = vmov 0  }
  0x13   : > { %2230 = vmatprep.subr.bf16.mxu1 %v2356_v13  ;;  %v2064_v43 = vcombine.low %v512_v41, %v512_v41  ;;  %v2065_v44 = vcombine.high %v512_v41, %v512_v41  ;;  %v2376_v45 = vld [vmem:[%s3073_s2 + $0x1c0] sm:$0xff]   ;;  %1094 = vmatprep.mubr.bf16.mxu0 %v2063_v40  ;;  %v2380_v49 = vld [vmem:[%s3073_s2 + $0x1c8] sm:$0xff]   ;;  %v2384_v53 = vld [vmem:[%s3073_s2 + $0x1d0] sm:$0xff]  }
  0x14   : > { %v2377_v46 = vld [vmem:[%s3073_s2 + $0x100] sm:$0xff]   ;;  %v2381_v50 = vld [vmem:[%s3073_s2 + $0x108] sm:$0xff]   ;;  %v2385_v54 = vld [vmem:[%s3073_s2 + $0x110] sm:$0xff]  }
  0x15   : > { %2209 = vmatpush3.bf16.msra.mxu0 %v2357_v14  ;;  %1134 = vmatprep.mubr.bf16.mxu1 %v2065_v44  ;;  %v2378_v47 = vld [vmem:[%s3073_s2 + $0x180] sm:$0xff]   ;;  %v2382_v51 = vld [vmem:[%s3073_s2 + $0x188] sm:$0xff]   ;;  %v2386_v55 = vld [vmem:[%s3073_s2 + $0x190] sm:$0xff]  }
  0x16   : > { %2231 = vmatpush3.bf16.msra.mxu1 %v2358_v15  ;;  %2210 = vmatprep.subr.bf16.mxu0 %v2359_v16  ;;  %v2387_v56 = vld [vmem:[%s3073_s2 + $0x158] sm:$0xff]   ;;  %v2391_v60 = vld [vmem:[%s3073_s2 + $0x160] sm:$0xff]   ;;  %v2395_v0 = vld [vmem:[%s3073_s2 + $0x168] sm:$0xff]  }
  0x17   : > { %2232 = vmatprep.subr.bf16.mxu1 %v2360_v17  ;;  %v2388_v57 = vld [vmem:[%s3073_s2 + $0x1d8] sm:$0xff]   ;;  %v2392_v61 = vld [vmem:[%s3073_s2 + $0x1e0] sm:$0xff]   ;;  %v2396_v1 = vld [vmem:[%s3073_s2 + $0x1e8] sm:$0xff]  }
  0x18   : > { %v2389_v58 = vld [vmem:[%s3073_s2 + $0x118] sm:$0xff]   ;;  %v2393_v62 = vld [vmem:[%s3073_s2 + $0x120] sm:$0xff]   ;;  %v2397_v2 = vld [vmem:[%s3073_s2 + $0x128] sm:$0xff]  }
  0x19   : > { %2211 = vmatpush3.bf16.msra.mxu0 %v2361_v18  ;;  %v2390_v59 = vld [vmem:[%s3073_s2 + $0x198] sm:$0xff]   ;;  %v2394_v63 = vld [vmem:[%s3073_s2 + $0x1a0] sm:$0xff]   ;;  %v2398_v3 = vld [vmem:[%s3073_s2 + $0x1a8] sm:$0xff]  }
  0x1a   : > { %2233 = vmatpush3.bf16.msra.mxu1 %v2362_v19  ;;  %2212 = vmatprep.subr.bf16.mxu0 %v2363_v20  ;;  %v2399_v4 = vld [vmem:[%s3073_s2 + $0x170] sm:$0xff]   ;;  %v2403_v8 = vld [vmem:[%s3073_s2 + $0x178] sm:$0xff]   ;;  %v2427_v34 = vld [vmem:[%s3075_s4 + $0x64] ss:$8 sps:$4 sm:$0xff]  }
  0x1b   : > { %2234 = vmatprep.subr.bf16.mxu1 %v2364_v21  ;;  %v2400_v5 = vld [vmem:[%s3073_s2 + $0x1f0] sm:$0xff]   ;;  %v2404_v9 = vld [vmem:[%s3073_s2 + $0x1f8] sm:$0xff]   ;;  %v2425_v35 = vld [vmem:[%s3075_s4 + $0x60] ss:$8 sps:$4 sm:$0xff]  }
  0x1c   : > { %v2401_v6 = vld [vmem:[%s3073_s2 + $0x130] sm:$0xff]   ;;  %v2405_v10 = vld [vmem:[%s3073_s2 + $0x138] sm:$0xff]   ;;  %v2061_v41 = vld [vmem:[%s3074_s3] ss:$0 sm:$0xff] }
  0x1d   : > { %2213 = vmatpush3.bf16.msra.mxu0 %v2365_v22  ;;  %v2402_v7 = vld [vmem:[%s3073_s2 + $0x1b0] sm:$0xff]   ;;  %v2406_v11 = vld [vmem:[%s3073_s2 + $0x1b8] sm:$0xff]   ;;  %v2407_v22 = vld [vmem:[%s3075_s4] ss:$8 sps:$4 sm:$0xff]  }
  0x1e   : > { %2235 = vmatpush3.bf16.msra.mxu1 %v2366_v23  ;;  %2214 = vmatprep.subr.bf16.mxu0 %v2367_v24  ;;  %v503_v12 = vld [vmem:[%s3092_s24 + $0x10] sm:$0xff]  ;;  %v504_v15 = vld [vmem:[%s3092_s24 + $0x18] sm:$0xff]  ;;  %v2409_v23 = vld [vmem:[%s3075_s4 + $0x4] ss:$8 sps:$4 sm:$0xff]  }
  0x1f   : > { %2236 = vmatprep.subr.bf16.mxu1 %v2368_v25  ;;  %v507_v13 = vld [vmem:[%s3072_s1 + $0x10] sm:$0xff]  ;;  %v508_v16 = vld [vmem:[%s3072_s1 + $0x18] sm:$0xff] }
  0x20   : > { %v513_v14 = vsel %vm2693_vm0, %v503_v12, %v507_v13  ;;  %v514_v19 = vsel %vm2693_vm0, %v504_v15, %v508_v16  ;;  %v2412_v24 = vld [vmem:[%s3075_s4 + $0x14] ss:$8 sps:$4 sm:$0xff]   ;;  %v2410_v25 = vld [vmem:[%s3075_s4 + $0x10] ss:$8 sps:$4 sm:$0xff]   ;;  %v2441_v12 = vld [vmem:[%s3079_s8 + $0x68] sm:$0xff]  }
  0x21   : > { %2215 = vmatpush3.bf16.msra.mxu0 %v2369_v26  ;;  %v2066_v17 = vcombine.low %v513_v14, %v513_v14  ;;  %v2067_v18 = vcombine.high %v513_v14, %v513_v14  ;;  %v2068_v20 = vcombine.low %v514_v19, %v514_v19  ;;  %v2069_v21 = vcombine.high %v514_v19, %v514_v19  ;;  %v2415_v26 = vld [vmem:[%s3075_s4 + $0x24] ss:$8 sps:$4 sm:$0xff]   ;;  %v2418_v28 = vld [vmem:[%s3075_s4 + $0x34] ss:$8 sps:$4 sm:$0xff]   ;;  %v2428_v37 = vld [vmem:[%s3075_s4 + $0x70] ss:$8 sps:$4 sm:$0xff]  }
  0x22   : > { %2237 = vmatpush3.bf16.msra.mxu1 %v2370_v27  ;;  %2216 = vmatprep.subr.bf16.mxu0 %v2371_v29  ;;  %v2413_v27 = vld [vmem:[%s3075_s4 + $0x20] ss:$8 sps:$4 sm:$0xff]   ;;  %v2416_v29 = vld [vmem:[%s3075_s4 + $0x30] ss:$8 sps:$4 sm:$0xff]   ;;  %v2424_v32 = vld [vmem:[%s3075_s4 + $0x54] ss:$8 sps:$4 sm:$0xff]  }
  0x23   : > { %2238 = vmatprep.subr.bf16.mxu1 %v2372_v30  ;;  %v2421_v30 = vld [vmem:[%s3075_s4 + $0x44] ss:$8 sps:$4 sm:$0xff]   ;;  %v2430_v36 = vld [vmem:[%s3075_s4 + $0x74] ss:$8 sps:$4 sm:$0xff]  }
  0x24   : > { %v2442_v13 = vld [vmem:[%s3079_s8 + $0x28] sm:$0xff]   ;;  %v2443_v14 = vld [vmem:[%s3079_s8 + $0x70] sm:$0xff]   ;;  %v2445_v16 = vld [vmem:[%s3079_s8 + $0x78] sm:$0xff]  }
  0x25   : > { %2217 = vmatpush3.bf16.msra.mxu0 %v2373_v31  ;;  %v2419_v31 = vld [vmem:[%s3075_s4 + $0x40] ss:$8 sps:$4 sm:$0xff]   ;;  %v2444_v15 = vld [vmem:[%s3079_s8 + $0x30] sm:$0xff]   ;;  %v2449_v19 = vld [vmem:[%s3081_s10 + $0x4] ss:$8 sps:$4 sm:$0xff]  }
  0x26   : > { %2239 = vmatpush3.bf16.msra.mxu1 %v2374_v33  ;;  %2246 = vmatprep.subr.bf16.mxu0 %v2375_v42  ;;  %v2422_v33 = vld [vmem:[%s3075_s4 + $0x50] ss:$8 sps:$4 sm:$0xff]  }
  0x27   : > { %2268 = vmatprep.subr.bf16.mxu1 %v2376_v45 }
  0x28   : > { %1095 = vmatmul.mubr.bf16.vlgmr.msra.gmra.mrb[0].mxu0 %v2062_v39 }
  0x29   : > { %1135 = vmatmul.mubr.bf16.vlgmr.msra.gmra.mrb[0].mxu1 %v2064_v43  ;;  %2247 = vmatpush3.bf16.msra.mxu0 %v2377_v46 }
  0x2a   : > { %2269 = vmatpush3.bf16.msra.mxu1 %v2378_v47  ;;  %2248 = vmatprep.subr.bf16.mxu0 %v2379_v48 }
  0x2b   : > { %2270 = vmatprep.subr.bf16.mxu1 %v2380_v49  ;;  %1174 = vmatprep.mubr.bf16.mxu0 %v2067_v18  ;;  %v2447_v18 = vld [vmem:[%s3081_s10] ss:$8 sps:$4 sm:$0xff]  }
  0x2c   : > { %1214 = vmatprep.mubr.bf16.mxu1 %v2069_v21  ;;  %v2450_v21 = vld [vmem:[%s3081_s10 + $0x10] ss:$8 sps:$4 sm:$0xff]  }
  0x2d   : > { %2249 = vmatpush3.bf16.msra.mxu0 %v2381_v50 }
  0x2e   : > { %2271 = vmatpush3.bf16.msra.mxu1 %v2382_v51  ;;  %2250 = vmatprep.subr.bf16.mxu0 %v2383_v52 }
  0x2f   : > { %2272 = vmatprep.subr.bf16.mxu1 %v2384_v53 }
  0x31   : > { %2251 = vmatpush3.bf16.msra.mxu0 %v2385_v54 }
  0x32   : > { %2273 = vmatpush3.bf16.msra.mxu1 %v2386_v55  ;;  %2252 = vmatprep.subr.bf16.mxu0 %v2387_v56 }
  0x33   : > { %2274 = vmatprep.subr.bf16.mxu1 %v2388_v57 }
  0x35   : > { %2253 = vmatpush3.bf16.msra.mxu0 %v2389_v58 }
  0x36   : > { %2275 = vmatpush3.bf16.msra.mxu1 %v2390_v59  ;;  %2254 = vmatprep.subr.bf16.mxu0 %v2391_v60 }
  0x37   : > { %2276 = vmatprep.subr.bf16.mxu1 %v2392_v61 }
  0x39   : > { %2255 = vmatpush3.bf16.msra.mxu0 %v2393_v62 }
  0x3a   : > { %2277 = vmatpush3.bf16.msra.mxu1 %v2394_v63  ;;  %2256 = vmatprep.subr.bf16.mxu0 %v2395_v0 }
  0x3b   : > { %2278 = vmatprep.subr.bf16.mxu1 %v2396_v1 }
  0x3d   : > { %2257 = vmatpush3.bf16.msra.mxu0 %v2397_v2  ;;  %v2431_v2 = vld [vmem:[%s3079_s8 + $0x40] sm:$0xff]  }
  0x3e   : > { %2279 = vmatpush3.bf16.msra.mxu1 %v2398_v3  ;;  %2258 = vmatprep.subr.bf16.mxu0 %v2399_v4  ;;  %v2432_v3 = vld [vmem:[%s3079_s8] sm:$0xff]   ;;  %v2433_v4 = vld [vmem:[%s3079_s8 + $0x48] sm:$0xff]  }
  0x3f   : > { %2280 = vmatprep.subr.bf16.mxu1 %v2400_v5  ;;  %v2434_v5 = vld [vmem:[%s3079_s8 + $0x8] sm:$0xff]  }
  0x41   : > { %2259 = vmatpush3.bf16.msra.mxu0 %v2401_v6  ;;  %v2435_v6 = vld [vmem:[%s3079_s8 + $0x50] sm:$0xff]  }
  0x42   : > { %2281 = vmatpush3.bf16.msra.mxu1 %v2402_v7  ;;  %2260 = vmatprep.subr.bf16.mxu0 %v2403_v8  ;;  %v2436_v7 = vld [vmem:[%s3079_s8 + $0x10] sm:$0xff]   ;;  %v2437_v8 = vld [vmem:[%s3079_s8 + $0x58] sm:$0xff]  }
  0x43   : > { %2282 = vmatprep.subr.bf16.mxu1 %v2404_v9  ;;  %v2438_v9 = vld [vmem:[%s3079_s8 + $0x18] sm:$0xff]  }
  0x45   : > { %2261 = vmatpush3.bf16.msra.mxu0 %v2405_v10  ;;  %v2439_v10 = vld [vmem:[%s3079_s8 + $0x60] sm:$0xff]  }
  0x46   : > { %2283 = vmatpush3.bf16.msra.mxu1 %v2406_v11  ;;  %1367 = vmatprep.subr.bf16.mxu0 %v2409_v23  ;;  %v2440_v11 = vld [vmem:[%s3079_s8 + $0x20] sm:$0xff]  }
  0x47   : > { %2290 = vmatprep.subr.bf16.mxu1 %v2431_v2  ;;  %v2453_v23 = vld [vmem:[%s3081_s10 + $0x20] ss:$8 sps:$4 sm:$0xff]  }
  0x48   : > { %1175 = vmatmul.mubr.bf16.vlgmr.msra.gmra.mrb[4].mxu0 %v2066_v17  ;;  %v2446_v17 = vld [vmem:[%s3079_s8 + $0x38] sm:$0xff]  }
  0x49   : > { %1215 = vmatmul.mubr.bf16.vlgmr.msra.gmra.mrb[4].mxu1 %v2068_v20  ;;  %1368 = vmatpush1.bf16.msra.mxu0 %v2407_v22  ;;  %v2452_v20 = vld [vmem:[%s3081_s10 + $0x14] ss:$8 sps:$4 sm:$0xff]   ;;  %v2455_v22 = vld [vmem:[%s3081_s10 + $0x24] ss:$8 sps:$4 sm:$0xff]  }
  0x4a   : > { %1369 = vmatprep.subr.bf16.mxu0 %v2412_v24  ;;  %1399 = vmatprep.mubr.bf16.mxu0 %v2503_v38  ;;  %v2458_v24 = vld [vmem:[%s3081_s10 + $0x34] ss:$8 sps:$4 sm:$0xff]  }
  0x4b   : > { %2291 = vmatpush3.bf16.msra.mxu1 %v2432_v3 }
  0x4c   : > { %2292 = vmatprep.subr.bf16.mxu1 %v2433_v4 }
  0x4d   : > { %1370 = vmatpush1.bf16.msra.mxu0 %v2410_v25  ;;  %v2456_v25 = vld [vmem:[%s3081_s10 + $0x30] ss:$8 sps:$4 sm:$0xff]  }
  0x4e   : > { %1371 = vmatprep.subr.bf16.mxu0 %v2415_v26  ;;  %v2461_v26 = vld [vmem:[%s3081_s10 + $0x44] ss:$8 sps:$4 sm:$0xff]  }
  0x4f   : > { %2293 = vmatpush3.bf16.msra.mxu1 %v2434_v5 }
  0x50   : > { %2294 = vmatprep.subr.bf16.mxu1 %v2435_v6 }
  0x51   : > { %1372 = vmatpush1.bf16.msra.mxu0 %v2413_v27  ;;  %v2459_v27 = vld [vmem:[%s3081_s10 + $0x40] ss:$8 sps:$4 sm:$0xff]  }
  0x52   : > { %1373 = vmatprep.subr.bf16.mxu0 %v2418_v28  ;;  %v2464_v28 = vld [vmem:[%s3081_s10 + $0x54] ss:$8 sps:$4 sm:$0xff]  }
  0x53   : > { %2295 = vmatpush3.bf16.msra.mxu1 %v2436_v7 }
  0x54   : > { %2296 = vmatprep.subr.bf16.mxu1 %v2437_v8 }
  0x55   : > { %1374 = vmatpush1.bf16.msra.mxu0 %v2416_v29  ;;  %v2462_v29 = vld [vmem:[%s3081_s10 + $0x50] ss:$8 sps:$4 sm:$0xff]  }
  0x56   : > { %1375 = vmatprep.subr.bf16.mxu0 %v2421_v30  ;;  %v1277_v30 = vlaneseq }
  0x57   : > { %2297 = vmatpush3.bf16.msra.mxu1 %v2438_v9 }
  0x58   : > { %2298 = vmatprep.subr.bf16.mxu1 %v2439_v10 }
  0x59   : > { %1376 = vmatpush1.bf16.msra.mxu0 %v2419_v31  ;;  %v1278_v31 = vshrl.u32 %v1277_v30, 7 }
  0x5a   : > { %1377 = vmatprep.subr.bf16.mxu0 %v2424_v32 }
  0x5b   : > { %2299 = vmatpush3.bf16.msra.mxu1 %v2440_v11  ;;  %v2963_v32 = vsub.s32 0, %v1278_v31 }
  0x5c   : > { %2300 = vmatprep.subr.bf16.mxu1 %v2441_v12 }
  0x5d   : > { %1378 = vmatpush1.bf16.msra.mxu0 %v2422_v33  ;;  %v1239_v33 = vld [vmem:[%s3076_s5] sm:$0x3] }
  0x5e   : > { %1379 = vmatprep.subr.bf16.mxu0 %v2427_v34  ;;  %v2968_v34 = vsub.s32 1, %v1278_v31  ;;  %v2467_v31 = vld [vmem:[%s3081_s10 + $0x64] ss:$8 sps:$4 sm:$0xff]  }
  0x5f   : > { %2301 = vmatpush3.bf16.msra.mxu1 %v2442_v13  ;;  %v1240_v13 = vld [vmem:[%s3077_s6] sm:$0x3] }
  0x60   : > { %2302 = vmatprep.subr.bf16.mxu1 %v2443_v14  ;;  %v1241_v14 = vld [vmem:[%s3078_s7] sm:$0x3] }
  0x61   : > { %1380 = vmatpush1.bf16.msra.mxu0 %v2425_v35  ;;  %v1280_v35 = vrot.slane %v1239_v33, %v2963_v32 }
  0x62   : > { %1381 = vmatprep.subr.bf16.mxu0 %v2430_v36  ;;  %v1284_v36 = vrot.slane %v1239_v33, %v2968_v34  ;;  %v2465_v33 = vld [vmem:[%s3081_s10 + $0x60] ss:$8 sps:$4 sm:$0xff]  }
  0x63   : > { %2303 = vmatpush3.bf16.msra.mxu1 %v2444_v15  ;;  %v1451_v15 = vrot.slane %v1240_v13, %v2963_v32 }
  0x64   : > { %2304 = vmatprep.subr.bf16.mxu1 %v2445_v16 }
  0x65   : > { %1382 = vmatpush1.bf16.msra.mxu0 %v2428_v37 }
  0x66   : > { %1763 = vmatprep.subr.bf16.mxu0 %v2449_v19 }
  0x67   : > { %2305 = vmatpush3.bf16.msra.mxu1 %v2446_v17  ;;  %v1455_v17 = vrot.slane %v1240_v13, %v2968_v34 }
  0xfb   : > { %v2218_v39 = vpop.f32.mrb[0].mxu0 }
  0xfc   : > { %v2240_v40 = vpop.f32.mrb[0].mxu1  ;;  %v2219_v42 = vpop.f32.mrb[1].mxu0 }
  0xfd   : > { %v2220_v43 = vadd.f32 %v2219_v42, %v2218_v39  ;;  %v2241_v44 = vpop.f32.mrb[1].mxu1  ;;  %v2221_v45 = vpop.f32.mrb[2].mxu0 }
  0xfe   : > { %v2242_v46 = vadd.f32 %v2241_v44, %v2240_v40  ;;  %v2243_v47 = vpop.f32.mrb[2].mxu1  ;;  %v2222_v48 = vpop.f32.mrb[3].mxu0 }
  0xff   : > { %v1097_v49 = vadd.f32 %v2220_v43, %v2061_v41  ;;  %v2244_v50 = vpop.f32.mrb[3].mxu1 }
 0x101   : > { %v1137_v51 = vadd.f32 %v2242_v46, %v1097_v49 }
 0x11b   : > { %v2262_v52 = vpop.f32.mrb[4].mxu0 }
 0x11c   : > { %v2284_v53 = vpop.f32.mrb[4].mxu1  ;;  %v2263_v54 = vpop.f32.mrb[5].mxu0 }
 0x11d   : > { %v2264_v55 = vadd.f32 %v2263_v54, %v2262_v52  ;;  %v2285_v56 = vpop.f32.mrb[5].mxu1  ;;  %v2265_v57 = vpop.f32.mrb[6].mxu0 }
 0x11e   : > { %v2286_v58 = vadd.f32 %v2285_v56, %v2284_v53  ;;  %v2287_v59 = vpop.f32.mrb[6].mxu1  ;;  %v2266_v60 = vpop.f32.mrb[7].mxu0 }
 0x11f   : > { %v1177_v61 = vadd.f32 %v2264_v55, %v1137_v51  ;;  %v2288_v62 = vpop.f32.mrb[7].mxu1 }
 0x121   : > { %v1217_v63 = vadd.f32 %v2286_v58, %v1177_v61 }
 0x123   : > { %v1222_v0 = vmax.f32 %v1217_v63, 0.0 }
 0x125   : > { %v1275_v1 = vpack.c.bf16 %v1222_v0, %v1222_v0 }
 0x127   : > { %1400 = vmatmul.mubr.bf16.vlgmr.msra.gmra.mrb[8].mxu0 %v1275_v1 }
 0x128   : > { %1795 = vmatprep.mubr.bf16.mxu0 %v2503_v38  ;;  %1764 = vmatpush1.bf16.msra.mxu0 %v2447_v18 }
 0x129   : > { %1765 = vmatprep.subr.bf16.mxu0 %v2452_v20  ;;  %v1464_v20 = vrot.slane %v1241_v14, %v2963_v32 }
 0x12c   : > { %1766 = vmatpush1.bf16.msra.mxu0 %v2450_v21 }
 0x12d   : > { %1767 = vmatprep.subr.bf16.mxu0 %v2455_v22  ;;  %v1468_v22 = vrot.slane %v1241_v14, %v2968_v34 }
 0x130   : > { %1768 = vmatpush1.bf16.msra.mxu0 %v2453_v23 }
 0x131   : > { %1769 = vmatprep.subr.bf16.mxu0 %v2458_v24 }
 0x134   : > { %1770 = vmatpush1.bf16.msra.mxu0 %v2456_v25 }
 0x135   : > { %1771 = vmatprep.subr.bf16.mxu0 %v2461_v26 }
 0x138   : > { %1772 = vmatpush1.bf16.msra.mxu0 %v2459_v27 }
 0x139   : > { %1773 = vmatprep.subr.bf16.mxu0 %v2464_v28 }
 0x13c   : > { %1774 = vmatpush1.bf16.msra.mxu0 %v2462_v29 }
 0x13d   : > { %1775 = vmatprep.subr.bf16.mxu0 %v2467_v31 }
 0x140   : > { %1776 = vmatpush1.bf16.msra.mxu0 %v2465_v33 }
 0x1fa   : > { %v1401_v37 = vpop.f32.mrb[8].mxu0 }
 0x1fb   : > { %v1402_v38 = vadd.f32 %v1401_v37, %v1280_v35  ;;  %v1403_v39 = vpop.f32.mrb[9].mxu0  ;;  %v2470_v35 = vld [vmem:[%s3081_s10 + $0x74] ss:$8 sps:$4 sm:$0xff]  }
 0x1fc   : > { %v1404_v40 = vadd.f32 %v1403_v39, %v1284_v36  ;;  %v1405_v41 = vpop.f32.mrb[10].mxu0  ;;  %v2468_v36 = vld [vmem:[%s3081_s10 + $0x70] ss:$8 sps:$4 sm:$0xff]   ;;  %1777 = vmatprep.subr.bf16.mxu0 %v2470_v35 }
 0x1fd   : > { %v1408_v42 = vrot.slane %v1402_v38, 4  ;;  %v1406_v43 = vpop.f32.mrb[11].mxu0  ;;  %1778 = vmatpush1.bf16.msra.mxu0 %v2468_v36 }
 0x1fe   : > { %v1414_v44 = vrot.slane %v1404_v40, 4 }
 0x1ff   : > { %v1409_v45 = vadd.f32 %v1408_v42, %v1402_v38 }
 0x200   : > { %v1415_v46 = vadd.f32 %v1414_v44, %v1404_v40 }
 0x201   : > { %v1410_v47 = vrot.slane %v1409_v45, 2 }
 0x202   : > { %v1416_v48 = vrot.slane %v1415_v46, 2 }
 0x203   : > { %v1411_v49 = vadd.f32 %v1410_v47, %v1409_v45  ;;  %v2471_v45 = vld [vmem:[%s3085_s14 + $0x40] sm:$0xff]   ;;  %v2473_v47 = vld [vmem:[%s3085_s14 + $0x48] sm:$0xff]  }
 0x204   : > { %v1417_v50 = vadd.f32 %v1416_v48, %v1415_v46  ;;  %v2472_v46 = vld [vmem:[%s3085_s14] sm:$0xff]   ;;  %2312 = vmatprep.subr.bf16.mxu1 %v2471_v45  ;;  %v2474_v48 = vld [vmem:[%s3085_s14 + $0x8] sm:$0xff]  }
 0x205   : > { %v1412_v51 = vrot.slane %v1411_v49, 1 }
 0x206   : > { %v1418_v52 = vrot.slane %v1417_v50, 1 }
 0x207   : > { %v1413_v53 = vadd.f32 %v1412_v51, %v1411_v49  ;;  %v2475_v49 = vld [vmem:[%s3085_s14 + $0x50] sm:$0xff]   ;;  %v2477_v51 = vld [vmem:[%s3085_s14 + $0x58] sm:$0xff]  }
 0x208   : > { %v1419_v54 = vadd.f32 %v1418_v52, %v1417_v50  ;;  %v2476_v50 = vld [vmem:[%s3085_s14 + $0x10] sm:$0xff]   ;;  %v2478_v52 = vld [vmem:[%s3085_s14 + $0x18] sm:$0xff]  }
 0x209   : > { %v1421_v55 = vmul.f32 0.125, %v1413_v53  ;;  %v2479_v53 = vld [vmem:[%s3085_s14 + $0x60] sm:$0xff]  }
 0x20a   : > { %v1422_v56 = vmul.f32 0.125, %v1419_v54  ;;  %v2480_v54 = vld [vmem:[%s3085_s14 + $0x20] sm:$0xff]  }
 0x20b   : > { %v1423_v57 = vsub.f32 %v1402_v38, %v1421_v55  ;;  %v2150_v38 = vld [vmem:[%s3080_s9] ss:$0 sm:$0xff]  ;;  %v2481_v55 = vld [vmem:[%s3085_s14 + $0x68] sm:$0xff]  }
 0x20c   : > { %v1424_v58 = vsub.f32 %v1404_v40, %v1422_v56  ;;  %v2482_v56 = vld [vmem:[%s3085_s14 + $0x28] sm:$0xff]  }
 0x20d   : > { %v1425_v59 = vmul.f32 %v1423_v57, %v1423_v57 }
 0x20e   : > { %v1426_v60 = vmul.f32 %v1424_v58, %v1424_v58 }
 0x20f   : > { %v1427_v61 = vrot.slane %v1425_v59, 4 }
 0x210   : > { %v1433_v62 = vrot.slane %v1426_v60, 4 }
 0x211   : > { %v1428_v63 = vadd.f32 %v1427_v61, %v1425_v59  ;;  %v2485_v59 = vld [vmem:[%s3085_s14 + $0x78] sm:$0xff]   ;;  %v1635_v61 = vld [vmem:[%s3082_s11] sm:$0x3] }
 0x212   : > { %v1434_v0 = vadd.f32 %v1433_v62, %v1426_v60  ;;  %v2486_v60 = vld [vmem:[%s3085_s14 + $0x38] sm:$0xff]   ;;  %v1676_v62 = vrot.slane %v1635_v61, %v2963_v32 }
 0x213   : > { %v1429_v1 = vrot.slane %v1428_v63, 2 }
 0x214   : > { %v1435_v2 = vrot.slane %v1434_v0, 2 }
 0x215   : > { %v1430_v3 = vadd.f32 %v1429_v1, %v1428_v63  ;;  %v1680_v63 = vrot.slane %v1635_v61, %v2968_v34 }
 0x216   : > { %v1436_v4 = vadd.f32 %v1435_v2, %v1434_v0 }
 0x217   : > { %v1431_v5 = vrot.slane %v1430_v3, 1 }
 0x218   : > { %v1437_v6 = vrot.slane %v1436_v4, 1 }
 0x219   : > { %v1432_v7 = vadd.f32 %v1431_v5, %v1430_v3 }
 0x21a   : > { %v1438_v8 = vadd.f32 %v1437_v6, %v1436_v4 }
 0x21b   : > { %v1439_v9 = vmul.f32 0.125, %v1432_v7 }
 0x21c   : > { %v1440_v10 = vmul.f32 0.125, %v1438_v8 }
 0x21d   : > { %v1441_v11 = vadd.f32 1e-05, %v1439_v9 }
 0x21e   : > { %v1442_v12 = vadd.f32 1e-05, %v1440_v10 }
 0x21f   : > { %2487 = vrsqrt.f32 %v1441_v11 }
 0x220   : > { %2489 = vrsqrt.f32 %v1442_v12 }
 0x229   : > { %v2488_v16 = vpop.eup %2487 }
 0x22a   : > { %v2490_v18 = vpop.eup %2489  ;;  %v1445_v19 = vmul.f32 %v2488_v16, %v1423_v57  ;;  %v2483_v57 = vld [vmem:[%s3085_s14 + $0x70] sm:$0xff]  }
 0x22b   : > { %v1446_v21 = vmul.f32 %v2490_v18, %v1424_v58  ;;  %v2484_v58 = vld [vmem:[%s3085_s14 + $0x30] sm:$0xff]  }
 0x22c   : > { %v1458_v23 = vmul.f32 %v1451_v15, %v1445_v19 }
 0x22d   : > { %v1459_v24 = vmul.f32 %v1455_v17, %v1446_v21 }
 0x22e   : > { %v1471_v25 = vadd.f32 %v1464_v20, %v1458_v23 }
 0x22f   : > { %v1472_v26 = vadd.f32 %v1468_v22, %v1459_v24 }
 0x230   : > { %v1473_v27 = vmax.f32 %v1471_v25, 0.0 }
 0x231   : > { %v1474_v28 = vmax.f32 %v1472_v26, 0.0 }
 0x232   : > { %v1475_v30 = vpack.c.bf16 %v1473_v27, %v1473_v27 }
 0x233   : > { %v1476_v29 = vpack.c.bf16 %v1474_v28, %v1474_v28 }
 0x235   : > { %1611 = vmatprep.mubr.bf16.mxu1 %v1476_v29 }
 0x236   : > { %1612 = vmatmul.mubr.bf16.vlgmr.msra.gmra.mrb[8].mxu1 %v1475_v30 }
 0x237   : > { %2313 = vmatpush3.bf16.msra.mxu1 %v2472_v46 }
 0x238   : > { %2314 = vmatprep.subr.bf16.mxu1 %v2473_v47 }
 0x23b   : > { %2315 = vmatpush3.bf16.msra.mxu1 %v2474_v48 }
 0x23c   : > { %2316 = vmatprep.subr.bf16.mxu1 %v2475_v49 }
 0x23f   : > { %2317 = vmatpush3.bf16.msra.mxu1 %v2476_v50 }
 0x240   : > { %2318 = vmatprep.subr.bf16.mxu1 %v2477_v51 }
 0x243   : > { %2319 = vmatpush3.bf16.msra.mxu1 %v2478_v52 }
 0x244   : > { %2320 = vmatprep.subr.bf16.mxu1 %v2479_v53 }
 0x247   : > { %2321 = vmatpush3.bf16.msra.mxu1 %v2480_v54 }
 0x248   : > { %2322 = vmatprep.subr.bf16.mxu1 %v2481_v55 }
 0x24b   : > { %2323 = vmatpush3.bf16.msra.mxu1 %v2482_v56 }
 0x24c   : > { %2324 = vmatprep.subr.bf16.mxu1 %v2483_v57 }
 0x24f   : > { %2325 = vmatpush3.bf16.msra.mxu1 %v2484_v58 }
 0x250   : > { %2326 = vmatprep.subr.bf16.mxu1 %v2485_v59 }
 0x253   : > { %2327 = vmatpush3.bf16.msra.mxu1 %v2486_v60 }
 0x309   : > { %v2306_v37 = vpop.f32.mrb[8].mxu1 }
 0x30a   : > { %v2307_v39 = vpop.f32.mrb[9].mxu1 }
 0x30b   : > { %v2308_v40 = vadd.f32 %v2307_v39, %v2306_v37  ;;  %v2309_v41 = vpop.f32.mrb[10].mxu1 }
 0x30c   : > { %v2310_v42 = vpop.f32.mrb[11].mxu1 }
 0x30d   : > { %v1614_v43 = vadd.f32 %v2308_v40, %v2150_v38  ;;  %v1636_v42 = vld [vmem:[%s3083_s12] sm:$0x3] }
 0x30e   : > { %v1850_v46 = vrot.slane %v1636_v42, %v2968_v34 }
 0x30f   : > { %v1671_v44 = vpack.c.bf16 %v1614_v43, %v1614_v43  ;;  %v1637_v43 = vld [vmem:[%s3084_s13] sm:$0x3] }
 0x310   : > { %v1859_v49 = vrot.slane %v1637_v43, %v2963_v32  ;;  %v1863_v51 = vrot.slane %v1637_v43, %v2968_v34 }
 0x311   : > { %1796 = vmatmul.mubr.bf16.vlgmr.msra.gmra.mrb[12].mxu0 %v1671_v44  ;;  %v1846_v44 = vrot.slane %v1636_v42, %v2963_v32  ;;  %v2183_v32 = vld [vmem:[%s3086_s15] ss:$0 sm:$0xff] }
 0x3e4   : > { %v1797_v0 = vpop.f32.mrb[12].mxu0 }
 0x3e5   : > { %v1798_v1 = vadd.f32 %v1797_v0, %v1676_v62  ;;  %v1799_v2 = vpop.f32.mrb[13].mxu0 }
 0x3e6   : > { %v1800_v3 = vadd.f32 %v1799_v2, %v1680_v63  ;;  %v1801_v4 = vpop.f32.mrb[14].mxu0 }
 0x3e7   : > { %v1804_v5 = vrot.slane %v1798_v1, 4  ;;  %v1802_v6 = vpop.f32.mrb[15].mxu0 }
 0x3e8   : > { %v1810_v7 = vrot.slane %v1800_v3, 4 }
 0x3e9   : > { %v1805_v8 = vadd.f32 %v1804_v5, %v1798_v1 }
 0x3ea   : > { %v1811_v9 = vadd.f32 %v1810_v7, %v1800_v3 }
 0x3eb   : > { %v1806_v10 = vrot.slane %v1805_v8, 2 }
 0x3ec   : > { %v1812_v11 = vrot.slane %v1811_v9, 2 }
 0x3ed   : > { %v1807_v12 = vadd.f32 %v1806_v10, %v1805_v8 }
 0x3ee   : > { %v1813_v13 = vadd.f32 %v1812_v11, %v1811_v9 }
 0x3ef   : > { %v1808_v14 = vrot.slane %v1807_v12, 1 }
 0x3f0   : > { %v1814_v15 = vrot.slane %v1813_v13, 1 }
 0x3f1   : > { %v1809_v16 = vadd.f32 %v1808_v14, %v1807_v12 }
 0x3f2   : > { %v1815_v17 = vadd.f32 %v1814_v15, %v1813_v13 }
 0x3f3   : > { %v1816_v18 = vmul.f32 0.125, %v1809_v16 }
 0x3f4   : > { %v1817_v19 = vmul.f32 0.125, %v1815_v17 }
 0x3f5   : > { %v1818_v20 = vsub.f32 %v1798_v1, %v1816_v18 }
 0x3f6   : > { %v1819_v21 = vsub.f32 %v1800_v3, %v1817_v19 }
 0x3f7   : > { %v1820_v22 = vmul.f32 %v1818_v20, %v1818_v20 }
 0x3f8   : > { %v1821_v23 = vmul.f32 %v1819_v21, %v1819_v21 }
 0x3f9   : > { %v1822_v24 = vrot.slane %v1820_v22, 4 }
 0x3fa   : > { %v1828_v25 = vrot.slane %v1821_v23, 4 }
 0x3fb   : > { %v1823_v26 = vadd.f32 %v1822_v24, %v1820_v22 }
 0x3fc   : > { %v1829_v27 = vadd.f32 %v1828_v25, %v1821_v23 }
 0x3fd   : > { %v1824_v28 = vrot.slane %v1823_v26, 2 }
 0x3fe   : > { %v1830_v29 = vrot.slane %v1829_v27, 2 }
 0x3ff   : > { %v1825_v30 = vadd.f32 %v1824_v28, %v1823_v26 }
 0x400   : > { %v1831_v31 = vadd.f32 %v1830_v29, %v1829_v27 }
 0x401   : > { %v1826_v33 = vrot.slane %v1825_v30, 1 }
 0x402   : > { %v1832_v35 = vrot.slane %v1831_v31, 1 }
 0x403   : > { %v1827_v36 = vadd.f32 %v1826_v33, %v1825_v30 }
 0x404   : > { %v1833_v37 = vadd.f32 %v1832_v35, %v1831_v31 }
 0x405   : > { %v1834_v38 = vmul.f32 0.125, %v1827_v36 }
 0x406   : > { %v1835_v39 = vmul.f32 0.125, %v1833_v37 }
 0x407   : > { %v1836_v40 = vadd.f32 1e-05, %v1834_v38 }
 0x408   : > { %v1837_v41 = vadd.f32 1e-05, %v1835_v39 }
 0x409   : > { %2491 = vrsqrt.f32 %v1836_v40 }
 0x40a   : > { %2493 = vrsqrt.f32 %v1837_v41 }
 0x413   : > { %v2492_v45 = vpop.eup %2491 }
 0x414   : > { %v2494_v47 = vpop.eup %2493  ;;  %v1840_v48 = vmul.f32 %v2492_v45, %v1818_v20 }
 0x415   : > { %v1841_v50 = vmul.f32 %v2494_v47, %v1819_v21 }
 0x416   : > { %v1853_v52 = vmul.f32 %v1846_v44, %v1840_v48 }
 0x417   : > { %v1854_v53 = vmul.f32 %v1850_v46, %v1841_v50 }
 0x418   : > { %v1866_v54 = vadd.f32 %v1859_v49, %v1853_v52 }
 0x419   : > { %v1867_v55 = vadd.f32 %v1863_v51, %v1854_v53 }
 0x41a   : > { %v1868_v56 = vmax.f32 %v1866_v54, 0.0 }
 0x41b   : > { %v1869_v57 = vmax.f32 %v1867_v55, 0.0 }
 0x41c   : > { %v1870_v59 = vpack.c.bf16 %v1868_v56, %v1868_v56 }
 0x41d   : > { %v1871_v58 = vpack.c.bf16 %v1869_v57, %v1869_v57 }
 0x41f   : > { %2006 = vmatprep.mubr.bf16.mxu1 %v1871_v58 }
 0x420   : > { %2007 = vmatmul.mubr.bf16.vlgmr.msra.gmra.mrb[12].mxu1 %v1870_v59 }
 0x4f3   : > { %v2328_v60 = vpop.f32.mrb[12].mxu1 }
 0x4f4   : > { %v2329_v61 = vpop.f32.mrb[13].mxu1 }
 0x4f5   : > { %v2330_v34 = vadd.f32 %v2329_v61, %v2328_v60  ;;  %v2331_v62 = vpop.f32.mrb[14].mxu1 }
 0x4f6   : > { %v2332_v63 = vpop.f32.mrb[15].mxu1 }
 0x4f7   : > { %v2009_v0 = vadd.f32 %v2330_v34, %v2183_v32 }
 0x4f9   : > { %2014 = vst [vmem:[%s499_s23] sm:$0xff] %v2009_v0 }
 0x4fa PF: > { %s26_s21 = sadd.s32 1, %s2501_s21  }
 0x4fb   : > { %p23_p4 = scmp.ge.s32.totalorder %s26_s21, 4  }
 0x4fd   :  { %25 = sbr.rel (!%p23_p4) target bundleno = 2 (0x2), region = 111 }

</bundles_post_ra>
